<compile_context>
chip_gen: v7x
topology: tpu7x:2x2x1
jax: 0.10.0
libtpu: 0.0.40
codegen_flags: <defaults>
</compile_context>

<pallas_src>
import functools
import types

import numpy as np

import jax
import jax.numpy as jnp
from jax.experimental import pallas as pl
from jax.experimental.pallas import tpu as pltpu


# -----------------------------------------------------------------------------
# Fused Pallas block kernel
# -----------------------------------------------------------------------------
def _block_kernel(*args, N, Hl, Wl, C, two_inputs, epilogue):
    """One fused UNet block:  [conv3x3 -> BN -> ReLU] x 2  (+ optional epilogue).

    epilogue: "out"   -> write padded-rows activation (skip / pooling input)
              "tconv" -> ConvTranspose2d(k=2, s=2) GEMM, even/odd output rows
              "head"  -> final 1x1 conv + log_softmax(dim=ch) + scope update
    """
    Rpad = N * (Hl + 2)          # padded rows
    Rz = Rpad - 2                # conv output rows (incl. masked invalid rows)
    WC = Wl * C                  # lane width of this block's activations
    inv_count = 1.0 / float(N * Hl * Wl)

    n_out = 1 if epilogue == "out" else 2
    halo_ref = args[-1]                      # VMEM scratch (Rpad, WC)
    out_refs = args[-1 - n_out:-1]
    in_refs = args[:-1 - n_out]

    k = 0
    x0_ref = in_refs[k]; k += 1
    x1_ref = None
    if two_inputs:
        x1_ref = in_refs[k]; k += 1
    t1a_ref = in_refs[k]; k += 1
    t1b_ref = None
    if two_inputs:
        t1b_ref = in_refs[k]; k += 1
    t2_ref = in_refs[k]; k += 1
    p_ref = in_refs[k]; k += 1                       # (WC, WC) channel-pool matrix
    g1 = in_refs[k][...]; b1 = in_refs[k + 1][...]   # widened BN affine (1, WC)
    g2 = in_refs[k + 2][...]; b2 = in_refs[k + 3][...]
    k += 4
    mask = in_refs[k][...]; k += 1                   # (Rz, 1)  1.0 on valid rows

    def conv_taps(src_ref, t_ref):
        # 3x3 conv as three row-shifted GEMMs against block-Toeplitz weights.
        acc = None
        for r in range(3):
            xs = src_ref[pl.ds(r, Rz), :].astype(jnp.bfloat16)
            part = jnp.dot(xs, t_ref[r], preferred_element_type=jnp.float32)
            acc = part if acc is None else acc + part
        return acc

    def bn_relu(z, gw, bw):
        # Train-mode BatchNorm (batch stats, biased variance) + ReLU.
        zm = z * mask
        colsum = jnp.sum(zm, axis=0, keepdims=True)                     # (1, WC)
        mean_w = jnp.dot(colsum, p_ref[...],
                         preferred_element_type=jnp.float32) * inv_count
        cen = (z - mean_w) * mask
        sqsum = jnp.sum(cen * cen, axis=0, keepdims=True)
        var_w = jnp.dot(sqsum, p_ref[...],
                        preferred_element_type=jnp.float32) * inv_count
        scale = gw * jax.lax.rsqrt(var_w + 1e-5)
        shift = bw - mean_w * scale
        return jnp.maximum(z * scale + shift, 0.0) * mask

    # conv1 (skip-connection concat == two accumulated GEMMs)
    z1 = conv_taps(x0_ref, t1a_ref)
    if two_inputs:
        z1 = z1 + conv_taps(x1_ref, t1b_ref)
    a1 = bn_relu(z1, g1, b1)

    # re-pad in VMEM for conv2 (halo rows are zero)
    zero_row = jnp.zeros((1, WC), jnp.float32)
    halo_ref[pl.ds(0, 1), :] = zero_row
    halo_ref[pl.ds(Rpad - 1, 1), :] = zero_row
    halo_ref[pl.ds(1, Rz), :] = a1

    z2 = conv_taps(halo_ref, t2_ref)
    a2 = bn_relu(z2, g2, b2)

    if epilogue == "out":
        out_ref = out_refs[0]
        out_ref[pl.ds(0, 1), :] = zero_row
        out_ref[pl.ds(Rpad - 1, 1), :] = zero_row
        out_ref[pl.ds(1, Rz), :] = a2
    elif epilogue == "tconv":
        tt_ref = in_refs[k]                       # (2, WC, Lup) bf16
        tbias = in_refs[k + 1][...]               # (1, Lup)
        a2_bf = a2.astype(jnp.bfloat16)
        for a in range(2):                        # even / odd output-row parity
            out_refs[a][...] = jnp.dot(
                a2_bf, tt_ref[a], preferred_element_type=jnp.float32) + tbias
    else:  # "head": 1x1 conv (2 ch) + log_softmax + scope update
        f0 = in_refs[k][...]; f1 = in_refs[k + 1][...]       # (WC, Wl)
        fb0 = in_refs[k + 2][...]; fb1 = in_refs[k + 3][...]  # (1, Wl)
        ls = in_refs[k + 4][...]                              # (Rz, Wl)
        l0 = jnp.dot(a2, f0, preferred_element_type=jnp.float32) + fb0
        l1 = jnp.dot(a2, f1, preferred_element_type=jnp.float32) + fb1
        m = jnp.maximum(l0, l1)
        lse = m + jnp.log(jnp.exp(l0 - m) + jnp.exp(l1 - m))
        out_refs[0][...] = ls + (l0 - lse)        # log_mask rows
        out_refs[1][...] = ls + (l1 - lse)        # new log_scope rows


def _run_block(x_pads, bp, *, N, Hl, Wl, C, epilogue, extra=()):
    """pallas_call wrapper for one fused block (whole problem fits VMEM)."""
    Rpad = N * (Hl + 2)
    Rz = Rpad - 2
    WC = Wl * C
    inputs = (list(x_pads) + list(bp["T1"]) +
              [bp["T2"], bp["P"], bp["g1"], bp["b1"], bp["g2"], bp["b2"], bp["mask"]] +
              list(extra))
    if epilogue == "out":
        out_shape = jax.ShapeDtypeStruct((Rpad, WC), jnp.float32)
    elif epilogue == "tconv":
        lup = extra[0].shape[-1]
        out_shape = (jax.ShapeDtypeStruct((Rz, lup), jnp.float32),
                     jax.ShapeDtypeStruct((Rz, lup), jnp.float32))
    else:  # "head"
        out_shape = (jax.ShapeDtypeStruct((Rz, Wl), jnp.float32),
                     jax.ShapeDtypeStruct((Rz, Wl), jnp.float32))
    kern = functools.partial(_block_kernel, N=N, Hl=Hl, Wl=Wl, C=C,
                             two_inputs=(len(x_pads) == 2), epilogue=epilogue)
    return pl.pallas_call(
        kern,
        out_shape=out_shape,
        scratch_shapes=[pltpu.VMEM((Rpad, WC), jnp.float32)],
    )(*inputs)


# -----------------------------------------------------------------------------
# Parameter initialization (PyTorch layouts, deterministic)
# -----------------------------------------------------------------------------
def _conv_params(key, cout, cin, kh, kw, scale=0.1):
    k1, k2 = jax.random.split(key)
    w = jax.random.normal(k1, (cout, cin, kh, kw), jnp.float32) * scale
    b = jax.random.normal(k2, (cout,), jnp.float32) * scale
    return w, b


def _double_conv_params(key, cin, cout):
    k1, k2 = jax.random.split(key)
    w1, b1 = _conv_params(k1, cout, cin, 3, 3)
    w2, b2 = _conv_params(k2, cout, cout, 3, 3)
    return {
        "w1": w1, "b1": b1, "g1": jnp.ones((cout,)), "be1": jnp.zeros((cout,)),
        "w2": w2, "b2": b2, "g2": jnp.ones((cout,)), "be2": jnp.zeros((cout,)),
    }


def init_unet_params(key, num_blocks, in_channels, out_channels, channel_base):
    keys = jax.random.split(key, 4 * num_blocks + 4)
    ki = 0
    params = {"down": [], "tconv": [], "up": []}
    cur_in = in_channels
    for i in range(num_blocks):
        cout = channel_base * 2 ** i
        params["down"].append(_double_conv_params(keys[ki], cur_in, cout)); ki += 1
        cur_in = cout
    for i in range(num_blocks - 1, 0, -1):
        cin = channel_base * 2 ** i
        cout = channel_base * 2 ** (i - 1)
        k1, k2 = jax.random.split(keys[ki]); ki += 1
        w = jax.random.normal(k1, (cin, cout, 2, 2), jnp.float32) * 0.1
        b = jax.random.normal(k2, (cout,), jnp.float32) * 0.1
        params["tconv"].append({"w": w, "b": b})
    for i in range(num_blocks - 2, -1, -1):
        cin = channel_base * 2 ** (i + 1)
        cout = channel_base * 2 ** i
        params["up"].append(_double_conv_params(keys[ki], cin, cout)); ki += 1
    fw, fb = _conv_params(keys[ki], out_channels, channel_base, 1, 1); ki += 1
    params["final_w"] = fw
    params["final_b"] = fb
    return params


# -----------------------------------------------------------------------------
# Kernel-ready weight preparation (numpy, done once outside jit)
# -----------------------------------------------------------------------------
def _conv_toeplitz_np(w, Wl):
    """(Cout, Cin, 3, 3) -> (3, Wl*Cin, Wl*Cout) block-Toeplitz per row tap."""
    w = np.asarray(w, np.float32)
    cout, cin = w.shape[0], w.shape[1]
    t = np.zeros((3, Wl * cin, Wl * cout), np.float32)
    for r in range(3):
        for dw in (-1, 0, 1):
            for wo in range(Wl):
                wi = wo + dw
                if 0 <= wi < Wl:
                    t[r, wi * cin:(wi + 1) * cin, wo * cout:(wo + 1) * cout] = \
                        w[:, :, r, dw + 1].T
    return t


def _tconv_toeplitz_np(w, Wl):
    """(Cin, Cout, 2, 2) -> (2, Wl*Cin, 2*Wl*Cout) per output-row parity."""
    w = np.asarray(w, np.float32)
    cin, cout = w.shape[0], w.shape[1]
    t = np.zeros((2, Wl * cin, 2 * Wl * cout), np.float32)
    for a in range(2):
        for b in range(2):
            for wo in range(Wl):
                t[a, wo * cin:(wo + 1) * cin,
                  (2 * wo + b) * cout:(2 * wo + b + 1) * cout] = w[:, :, a, b]
    return t


def _chan_pool_np(Wl, c):
    idx = np.arange(Wl * c)
    return (idx[:, None] % c == idx[None, :] % c).astype(np.float32)


def _widen_np(v, Wl):
    return np.tile(np.asarray(v, np.float32), Wl)[None, :]


def _row_mask_np(N, Hl):
    rz = N * (Hl + 2) - 2
    j = np.arange(rz)
    return ((j % (Hl + 2)) < Hl).astype(np.float32)[:, None]


def _prep_double_conv(dc, N, Hl, Wl, split_in=None):
    c = int(dc["w1"].shape[0])
    w1 = np.asarray(dc["w1"], np.float32)
    w2 = np.asarray(dc["w2"], np.float32)
    if split_in is None:
        t1 = [jnp.asarray(_conv_toeplitz_np(w1, Wl), jnp.bfloat16)]
    else:  # up block: split conv1 over [tconv branch | skip branch] in-channels
        t1 = [jnp.asarray(_conv_toeplitz_np(w1[:, :split_in], Wl), jnp.bfloat16),
              jnp.asarray(_conv_toeplitz_np(w1[:, split_in:], Wl), jnp.bfloat16)]
    # NOTE: conv biases b1/b2 are intentionally dropped: they are followed by
    # BatchNorm whose batch-mean subtraction absorbs them exactly.
    return {
        "T1": t1,
        "T2": jnp.asarray(_conv_toeplitz_np(w2, Wl), jnp.bfloat16),
        "P": jnp.asarray(_chan_pool_np(Wl, c)),
        "g1": jnp.asarray(_widen_np(dc["g1"], Wl)),
        "b1": jnp.asarray(_widen_np(dc["be1"], Wl)),
        "g2": jnp.asarray(_widen_np(dc["g2"], Wl)),
        "b2": jnp.asarray(_widen_np(dc["be2"], Wl)),
        "mask": jnp.asarray(_row_mask_np(N, Hl)),
    }


def prepare_params(params, num_blocks, channel_base, N, H, W):
    assert num_blocks >= 2
    prep = {"down": [], "up": [], "tconv": [], "head": None}

    for i in range(num_blocks):
        Hl, Wl = H >> i, W >> i
        prep["down"].append(_prep_double_conv(params["down"][i], N, Hl, Wl))

    for j in range(num_blocks - 1):
        wl_in = W >> (num_blocks - 1 - j)
        t = params["tconv"][j]
        prep["tconv"].append({
            "T": jnp.asarray(_tconv_toeplitz_np(t["w"], wl_in), jnp.bfloat16),
            "b": jnp.asarray(np.tile(np.asarray(t["b"], np.float32), 2 * wl_in)[None, :]),
        })

    for j in range(num_blocks - 1):
        lvl = num_blocks - 2 - j
        Hl, Wl = H >> lvl, W >> lvl
        cu = channel_base << lvl            # channels coming from the tconv branch
        prep["up"].append(_prep_double_conv(params["up"][j], N, Hl, Wl, split_in=cu))

    c0 = channel_base
    wf = np.asarray(params["final_w"], np.float32).reshape(2, c0)
    bf = np.asarray(params["final_b"], np.float32)
    f_sel = np.zeros((2, W * c0, W), np.float32)
    for w in range(W):
        f_sel[:, w * c0:(w + 1) * c0, w] = wf
    prep["head"] = {
        "F0": jnp.asarray(f_sel[0]),
        "F1": jnp.asarray(f_sel[1]),
        "b0": jnp.asarray(np.full((1, W), bf[0], np.float32)),
        "b1": jnp.asarray(np.full((1, W), bf[1], np.float32)),
    }
    return prep


# -----------------------------------------------------------------------------
# Forward pass (XLA glue: layout reshapes / pads, 2x2 maxpool, row interleave)
# -----------------------------------------------------------------------------
def _pad_rows(a):
    """(N, Hl, L) -> (N*(Hl+2), L) with one zero row above/below each image."""
    n, hl, l = a.shape
    return jnp.pad(a, ((0, 0), (1, 1), (0, 0))).reshape(n * (hl + 2), l)


def _assemble_upsampled(ue, uo, N, Hl_in):
    """Interleave even/odd ConvTranspose rows and re-pad for the next block."""
    rz, l = ue.shape
    hz = Hl_in + 2

    def valid(u):
        return jnp.pad(u, ((0, N * hz - rz), (0, 0))).reshape(N, hz, l)[:, :Hl_in]

    u = jnp.stack([valid(ue), valid(uo)], axis=2).reshape(N, 2 * Hl_in, l)
    return _pad_rows(u)


def attention_net_forward(prep, x_nchw, log_scope_nchw, *, num_blocks, channel_base):
    N = x_nchw.shape[0]
    H, W = x_nchw.shape[2], x_nchw.shape[3]

    x_nhwc = jnp.transpose(x_nchw, (0, 2, 3, 1))
    ls_nhwc = jnp.transpose(log_scope_nchw, (0, 2, 3, 1))
    inp = jnp.concatenate([x_nhwc, ls_nhwc], axis=-1)     # torch.cat((x, log_scope), 1)
    cin0 = inp.shape[-1]
    cur_pad = _pad_rows(inp.reshape(N, H, W * cin0))

    skips = []
    up_pad = None
    # ---- down path ----
    for i in range(num_blocks):
        Hl, Wl, C = H >> i, W >> i, channel_base << i
        bp = prep["down"][i]
        if i < num_blocks - 1:
            out = _run_block([cur_pad], bp, N=N, Hl=Hl, Wl=Wl, C=C, epilogue="out")
            skips.append(out)
            # TODO(synk): 2x2 max-pool kept as tiny XLA glue.
            d = out.reshape(N, Hl + 2, Wl, C)[:, 1:Hl + 1]
            p = jnp.max(d.reshape(N, Hl // 2, 2, Wl // 2, 2, C), axis=(2, 4))
            cur_pad = _pad_rows(p.reshape(N, Hl // 2, (Wl // 2) * C))
        else:
            # bottleneck double-conv with fused ConvTranspose epilogue
            tp = prep["tconv"][0]
            ue, uo = _run_block([cur_pad], bp, N=N, Hl=Hl, Wl=Wl, C=C,
                                epilogue="tconv", extra=(tp["T"], tp["b"]))
            up_pad = _assemble_upsampled(ue, uo, N, Hl)

    # ---- up path ----
    log_mask_rows = new_scope_rows = None
    for j in range(num_blocks - 1):
        lvl = num_blocks - 2 - j
        Hl, Wl, C = H >> lvl, W >> lvl, channel_base << lvl
        bp = prep["up"][j]
        skip_pad = skips[lvl]
        if j < num_blocks - 2:
            tp = prep["tconv"][j + 1]
            ue, uo = _run_block([up_pad, skip_pad], bp, N=N, Hl=Hl, Wl=Wl, C=C,
                                epilogue="tconv", extra=(tp["T"], tp["b"]))
            up_pad = _assemble_upsampled(ue, uo, N, Hl)
        else:
            hp = prep["head"]
            rz0 = N * (H + 2) - 2
            ls3 = ls_nhwc[..., 0]                                    # (N, H, W)
            ls_rows = jnp.pad(ls3, ((0, 0), (0, 2), (0, 0))).reshape(
                N * (H + 2), W)[:rz0]
            log_mask_rows, new_scope_rows = _run_block(
                [up_pad, skip_pad], bp, N=N, Hl=Hl, Wl=Wl, C=C, epilogue="head",
                extra=(hp["F0"], hp["F1"], hp["b0"], hp["b1"], ls_rows))

    def rows_to_nchw(r):
        rp = jnp.pad(r, ((0, 2), (0, 0))).reshape(N, H + 2, W)[:, :H]
        return rp[:, None, :, :]

    return rows_to_nchw(log_mask_rows), rows_to_nchw(new_scope_rows)


# -----------------------------------------------------------------------------
# Main
# -----------------------------------------------------------------------------
if __name__ == "__main__":
    conf = types.SimpleNamespace(num_blocks=2, channel_base=8)
    B, H, W = 2, 16, 16

    root = jax.random.PRNGKey(0)
    k_param, k_x, k_s = jax.random.split(root, 3)

    params = init_unet_params(k_param, conf.num_blocks,
                              in_channels=4, out_channels=2,
                              channel_base=conf.channel_base)
    prep = prepare_params(params, conf.num_blocks, conf.channel_base, B, H, W)

    x = jax.random.normal(k_x, (B, 3, H, W), jnp.float32)
    # log_scope starts near log(1)=0 (valid log-probabilities)
    log_scope = -jnp.abs(jax.random.normal(k_s, (B, 1, H, W), jnp.float32)) * 0.1

    fwd = jax.jit(functools.partial(attention_net_forward,
                                    num_blocks=conf.num_blocks,
                                    channel_base=conf.channel_base))
    log_mask, new_log_scope = fwd(prep, x, log_scope)
    jax.block_until_ready((log_mask, new_log_scope))

    assert log_mask.shape == (B, 1, H, W)
    assert new_log_scope.shape == (B, 1, H, W)
    # softmax property: exp(log_mask) + exp(new_log_scope) == exp(log_scope)
    total = jnp.exp(log_mask) + jnp.exp(new_log_scope)
    assert jnp.allclose(total, jnp.exp(log_scope), atol=1e-4), "probability check failed"

    print("KERNEL_OK")
</pallas_src>

<mosaic_0001>
module attributes {stable_mosaic.version = 11 : i64} {
  func.func @_block_kernel(%arg0: memref<36x64xf32, #tpu.memory_space<vmem>>, %arg1: memref<3x64x128xbf16, #tpu.memory_space<vmem>>, %arg2: memref<3x128x128xbf16, #tpu.memory_space<vmem>>, %arg3: memref<128x128xf32, #tpu.memory_space<vmem>>, %arg4: memref<1x128xf32, #tpu.memory_space<vmem>>, %arg5: memref<1x128xf32, #tpu.memory_space<vmem>>, %arg6: memref<1x128xf32, #tpu.memory_space<vmem>>, %arg7: memref<1x128xf32, #tpu.memory_space<vmem>>, %arg8: memref<34x1xf32, #tpu.memory_space<vmem>>, %arg9: memref<36x128xf32, #tpu.memory_space<vmem>>, %arg10: memref<36x128xf32, #tpu.memory_space<vmem>>) attributes {dimension_semantics = [], scalar_prefetch = 0 : i64, scratch_operands = 1 : i64, tpu.core_type = #tpu.core_type<tc>} {
    %c0 = arith.constant 0 : index
    %c0_0 = arith.constant 0 : index
    %0 = vector.load %arg4[%c0, %c0_0] : memref<1x128xf32, #tpu.memory_space<vmem>>, vector<1x128xf32>
    %c0_1 = arith.constant 0 : index
    %c0_2 = arith.constant 0 : index
    %1 = vector.load %arg5[%c0_1, %c0_2] : memref<1x128xf32, #tpu.memory_space<vmem>>, vector<1x128xf32>
    %c0_3 = arith.constant 0 : index
    %c0_4 = arith.constant 0 : index
    %2 = vector.load %arg6[%c0_3, %c0_4] : memref<1x128xf32, #tpu.memory_space<vmem>>, vector<1x128xf32>
    %c0_5 = arith.constant 0 : index
    %c0_6 = arith.constant 0 : index
    %3 = vector.load %arg7[%c0_5, %c0_6] : memref<1x128xf32, #tpu.memory_space<vmem>>, vector<1x128xf32>
    %c0_7 = arith.constant 0 : index
    %c0_8 = arith.constant 0 : index
    %4 = vector.load %arg8[%c0_7, %c0_8] : memref<34x1xf32, #tpu.memory_space<vmem>>, vector<34x1xf32>
    %c0_9 = arith.constant 0 : index
    %c0_10 = arith.constant 0 : index
    %5 = vector.load %arg0[%c0_9, %c0_10] : memref<36x64xf32, #tpu.memory_space<vmem>>, vector<34x64xf32>
    %6 = arith.truncf %5 : vector<34x64xf32> to vector<34x64xbf16>
    %c0_11 = arith.constant 0 : index
    %c0_12 = arith.constant 0 : index
    %c0_13 = arith.constant 0 : index
    %7 = vector.load %arg1[%c0_11, %c0_12, %c0_13] : memref<3x64x128xbf16, #tpu.memory_space<vmem>>, vector<1x64x128xbf16>
    %8 = vector.shape_cast %7 : vector<1x64x128xbf16> to vector<64x128xbf16>
    %cst = arith.constant dense<0.000000e+00> : vector<34x128xf32>
    %9 = tpu.matmul %6, %8, %cst {dimension_numbers = #tpu.dot_dimension_numbers<[1], [0], [0], [1], [0, 0, 1, 1], [], []>} : vector<34x64xbf16>, vector<64x128xbf16>, vector<34x128xf32> -> vector<34x128xf32>
    %c1 = arith.constant 1 : index
    %c0_14 = arith.constant 0 : index
    %10 = vector.load %arg0[%c1, %c0_14] : memref<36x64xf32, #tpu.memory_space<vmem>>, vector<34x64xf32>
    %11 = arith.truncf %10 : vector<34x64xf32> to vector<34x64xbf16>
    %c1_15 = arith.constant 1 : index
    %c0_16 = arith.constant 0 : index
    %c0_17 = arith.constant 0 : index
    %12 = vector.load %arg1[%c1_15, %c0_16, %c0_17] : memref<3x64x128xbf16, #tpu.memory_space<vmem>>, vector<1x64x128xbf16>
    %13 = vector.shape_cast %12 : vector<1x64x128xbf16> to vector<64x128xbf16>
    %cst_18 = arith.constant dense<0.000000e+00> : vector<34x128xf32>
    %14 = tpu.matmul %11, %13, %cst_18 {dimension_numbers = #tpu.dot_dimension_numbers<[1], [0], [0], [1], [0, 0, 1, 1], [], []>} : vector<34x64xbf16>, vector<64x128xbf16>, vector<34x128xf32> -> vector<34x128xf32>
    %15 = arith.addf %9, %14 : vector<34x128xf32>
    %c2 = arith.constant 2 : index
    %c0_19 = arith.constant 0 : index
    %16 = vector.load %arg0[%c2, %c0_19] : memref<36x64xf32, #tpu.memory_space<vmem>>, vector<34x64xf32>
    %17 = arith.truncf %16 : vector<34x64xf32> to vector<34x64xbf16>
    %c2_20 = arith.constant 2 : index
    %c0_21 = arith.constant 0 : index
    %c0_22 = arith.constant 0 : index
    %18 = vector.load %arg1[%c2_20, %c0_21, %c0_22] : memref<3x64x128xbf16, #tpu.memory_space<vmem>>, vector<1x64x128xbf16>
    %19 = vector.shape_cast %18 : vector<1x64x128xbf16> to vector<64x128xbf16>
    %cst_23 = arith.constant dense<0.000000e+00> : vector<34x128xf32>
    %20 = tpu.matmul %17, %19, %cst_23 {dimension_numbers = #tpu.dot_dimension_numbers<[1], [0], [0], [1], [0, 0, 1, 1], [], []>} : vector<34x64xbf16>, vector<64x128xbf16>, vector<34x128xf32> -> vector<34x128xf32>
    %21 = arith.addf %15, %20 : vector<34x128xf32>
    %22 = vector.broadcast %4 : vector<34x1xf32> to vector<34x128xf32>
    %23 = arith.mulf %21, %22 : vector<34x128xf32>
    %cst_24 = arith.constant dense<0.000000e+00> : vector<128xf32>
    %24 = vector.multi_reduction <add>, %23, %cst_24 [0] : vector<34x128xf32> to vector<128xf32>
    %25 = vector.shape_cast %24 : vector<128xf32> to vector<1x128xf32>
    %c0_25 = arith.constant 0 : index
    %c0_26 = arith.constant 0 : index
    %26 = vector.load %arg3[%c0_25, %c0_26] : memref<128x128xf32, #tpu.memory_space<vmem>>, vector<128x128xf32>
    %cst_27 = arith.constant dense<0.000000e+00> : vector<1x128xf32>
    %27 = tpu.matmul %25, %26, %cst_27 {dimension_numbers = #tpu.dot_dimension_numbers<[1], [0], [0], [1], [0, 0, 1, 1], [], []>} : vector<1x128xf32>, vector<128x128xf32>, vector<1x128xf32> -> vector<1x128xf32>
    %cst_28 = arith.constant 0.001953125 : f32
    %28 = vector.broadcast %cst_28 : f32 to vector<1x128xf32>
    %29 = arith.mulf %27, %28 : vector<1x128xf32>
    %30 = vector.broadcast %29 : vector<1x128xf32> to vector<34x128xf32>
    %31 = arith.subf %21, %30 : vector<34x128xf32>
    %32 = vector.broadcast %4 : vector<34x1xf32> to vector<34x128xf32>
    %33 = arith.mulf %31, %32 : vector<34x128xf32>
    %34 = arith.mulf %33, %33 : vector<34x128xf32>
    %cst_29 = arith.constant dense<0.000000e+00> : vector<128xf32>
    %35 = vector.multi_reduction <add>, %34, %cst_29 [0] : vector<34x128xf32> to vector<128xf32>
    %36 = vector.shape_cast %35 : vector<128xf32> to vector<1x128xf32>
    %c0_30 = arith.constant 0 : index
    %c0_31 = arith.constant 0 : index
    %37 = vector.load %arg3[%c0_30, %c0_31] : memref<128x128xf32, #tpu.memory_space<vmem>>, vector<128x128xf32>
    %cst_32 = arith.constant dense<0.000000e+00> : vector<1x128xf32>
    %38 = tpu.matmul %36, %37, %cst_32 {dimension_numbers = #tpu.dot_dimension_numbers<[1], [0], [0], [1], [0, 0, 1, 1], [], []>} : vector<1x128xf32>, vector<128x128xf32>, vector<1x128xf32> -> vector<1x128xf32>
    %cst_33 = arith.constant 0.001953125 : f32
    %39 = vector.broadcast %cst_33 : f32 to vector<1x128xf32>
    %40 = arith.mulf %38, %39 : vector<1x128xf32>
    %cst_34 = arith.constant 9.99999974E-6 : f32
    %41 = vector.broadcast %cst_34 : f32 to vector<1x128xf32>
    %42 = arith.addf %40, %41 : vector<1x128xf32>
    %43 = math.rsqrt %42 : vector<1x128xf32>
    %44 = arith.mulf %0, %43 : vector<1x128xf32>
    %45 = arith.mulf %29, %44 : vector<1x128xf32>
    %46 = arith.subf %1, %45 : vector<1x128xf32>
    %47 = vector.broadcast %44 : vector<1x128xf32> to vector<34x128xf32>
    %48 = arith.mulf %21, %47 : vector<34x128xf32>
    %49 = vector.broadcast %46 : vector<1x128xf32> to vector<34x128xf32>
    %50 = arith.addf %48, %49 : vector<34x128xf32>
    %cst_35 = arith.constant 0.000000e+00 : f32
    %51 = vector.broadcast %cst_35 : f32 to vector<34x128xf32>
    %52 = arith.maximumf %50, %51 : vector<34x128xf32>
    %53 = vector.broadcast %4 : vector<34x1xf32> to vector<34x128xf32>
    %54 = arith.mulf %52, %53 : vector<34x128xf32>
    %cst_36 = arith.constant 0.000000e+00 : f32
    %55 = vector.broadcast %cst_36 : f32 to vector<1x128xf32>
    %c0_37 = arith.constant 0 : index
    %c0_38 = arith.constant 0 : index
    %56 = vector.load %arg10[%c0_37, %c0_38] : memref<36x128xf32, #tpu.memory_space<vmem>>, vector<1x128xf32>
    tpu.vector_store %arg10[%c0_37, %c0_38], %55 {strides = array<i32>} : memref<36x128xf32, #tpu.memory_space<vmem>>, vector<1x128xf32>,
    %c35 = arith.constant 35 : index
    %c0_39 = arith.constant 0 : index
    %57 = vector.load %arg10[%c35, %c0_39] : memref<36x128xf32, #tpu.memory_space<vmem>>, vector<1x128xf32>
    tpu.vector_store %arg10[%c35, %c0_39], %55 {strides = array<i32>} : memref<36x128xf32, #tpu.memory_space<vmem>>, vector<1x128xf32>,
    %c1_40 = arith.constant 1 : index
    %c0_41 = arith.constant 0 : index
    %58 = vector.load %arg10[%c1_40, %c0_41] : memref<36x128xf32, #tpu.memory_space<vmem>>, vector<34x128xf32>
    tpu.vector_store %arg10[%c1_40, %c0_41], %54 {strides = array<i32>} : memref<36x128xf32, #tpu.memory_space<vmem>>, vector<34x128xf32>,
    %c0_42 = arith.constant 0 : index
    %c0_43 = arith.constant 0 : index
    %59 = vector.load %arg10[%c0_42, %c0_43] : memref<36x128xf32, #tpu.memory_space<vmem>>, vector<34x128xf32>
    %60 = arith.truncf %59 : vector<34x128xf32> to vector<34x128xbf16>
    %c0_44 = arith.constant 0 : index
    %c0_45 = arith.constant 0 : index
    %c0_46 = arith.constant 0 : index
    %61 = vector.load %arg2[%c0_44, %c0_45, %c0_46] : memref<3x128x128xbf16, #tpu.memory_space<vmem>>, vector<1x128x128xbf16>
    %62 = vector.shape_cast %61 : vector<1x128x128xbf16> to vector<128x128xbf16>
    %cst_47 = arith.constant dense<0.000000e+00> : vector<34x128xf32>
    %63 = tpu.matmul %60, %62, %cst_47 {dimension_numbers = #tpu.dot_dimension_numbers<[1], [0], [0], [1], [0, 0, 1, 1], [], []>} : vector<34x128xbf16>, vector<128x128xbf16>, vector<34x128xf32> -> vector<34x128xf32>
    %c1_48 = arith.constant 1 : index
    %c0_49 = arith.constant 0 : index
    %64 = vector.load %arg10[%c1_48, %c0_49] : memref<36x128xf32, #tpu.memory_space<vmem>>, vector<34x128xf32>
    %65 = arith.truncf %64 : vector<34x128xf32> to vector<34x128xbf16>
    %c1_50 = arith.constant 1 : index
    %c0_51 = arith.constant 0 : index
    %c0_52 = arith.constant 0 : index
    %66 = vector.load %arg2[%c1_50, %c0_51, %c0_52] : memref<3x128x128xbf16, #tpu.memory_space<vmem>>, vector<1x128x128xbf16>
    %67 = vector.shape_cast %66 : vector<1x128x128xbf16> to vector<128x128xbf16>
    %cst_53 = arith.constant dense<0.000000e+00> : vector<34x128xf32>
    %68 = tpu.matmul %65, %67, %cst_53 {dimension_numbers = #tpu.dot_dimension_numbers<[1], [0], [0], [1], [0, 0, 1, 1], [], []>} : vector<34x128xbf16>, vector<128x128xbf16>, vector<34x128xf32> -> vector<34x128xf32>
    %69 = arith.addf %63, %68 : vector<34x128xf32>
    %c2_54 = arith.constant 2 : index
    %c0_55 = arith.constant 0 : index
    %70 = vector.load %arg10[%c2_54, %c0_55] : memref<36x128xf32, #tpu.memory_space<vmem>>, vector<34x128xf32>
    %71 = arith.truncf %70 : vector<34x128xf32> to vector<34x128xbf16>
    %c2_56 = arith.constant 2 : index
    %c0_57 = arith.constant 0 : index
    %c0_58 = arith.constant 0 : index
    %72 = vector.load %arg2[%c2_56, %c0_57, %c0_58] : memref<3x128x128xbf16, #tpu.memory_space<vmem>>, vector<1x128x128xbf16>
    %73 = vector.shape_cast %72 : vector<1x128x128xbf16> to vector<128x128xbf16>
    %cst_59 = arith.constant dense<0.000000e+00> : vector<34x128xf32>
    %74 = tpu.matmul %71, %73, %cst_59 {dimension_numbers = #tpu.dot_dimension_numbers<[1], [0], [0], [1], [0, 0, 1, 1], [], []>} : vector<34x128xbf16>, vector<128x128xbf16>, vector<34x128xf32> -> vector<34x128xf32>
    %75 = arith.addf %69, %74 : vector<34x128xf32>
    %76 = vector.broadcast %4 : vector<34x1xf32> to vector<34x128xf32>
    %77 = arith.mulf %75, %76 : vector<34x128xf32>
    %cst_60 = arith.constant dense<0.000000e+00> : vector<128xf32>
    %78 = vector.multi_reduction <add>, %77, %cst_60 [0] : vector<34x128xf32> to vector<128xf32>
    %79 = vector.shape_cast %78 : vector<128xf32> to vector<1x128xf32>
    %c0_61 = arith.constant 0 : index
    %c0_62 = arith.constant 0 : index
    %80 = vector.load %arg3[%c0_61, %c0_62] : memref<128x128xf32, #tpu.memory_space<vmem>>, vector<128x128xf32>
    %cst_63 = arith.constant dense<0.000000e+00> : vector<1x128xf32>
    %81 = tpu.matmul %79, %80, %cst_63 {dimension_numbers = #tpu.dot_dimension_numbers<[1], [0], [0], [1], [0, 0, 1, 1], [], []>} : vector<1x128xf32>, vector<128x128xf32>, vector<1x128xf32> -> vector<1x128xf32>
    %cst_64 = arith.constant 0.001953125 : f32
    %82 = vector.broadcast %cst_64 : f32 to vector<1x128xf32>
    %83 = arith.mulf %81, %82 : vector<1x128xf32>
    %84 = vector.broadcast %83 : vector<1x128xf32> to vector<34x128xf32>
    %85 = arith.subf %75, %84 : vector<34x128xf32>
    %86 = vector.broadcast %4 : vector<34x1xf32> to vector<34x128xf32>
    %87 = arith.mulf %85, %86 : vector<34x128xf32>
    %88 = arith.mulf %87, %87 : vector<34x128xf32>
    %cst_65 = arith.constant dense<0.000000e+00> : vector<128xf32>
    %89 = vector.multi_reduction <add>, %88, %cst_65 [0] : vector<34x128xf32> to vector<128xf32>
    %90 = vector.shape_cast %89 : vector<128xf32> to vector<1x128xf32>
    %c0_66 = arith.constant 0 : index
    %c0_67 = arith.constant 0 : index
    %91 = vector.load %arg3[%c0_66, %c0_67] : memref<128x128xf32, #tpu.memory_space<vmem>>, vector<128x128xf32>
    %cst_68 = arith.constant dense<0.000000e+00> : vector<1x128xf32>
    %92 = tpu.matmul %90, %91, %cst_68 {dimension_numbers = #tpu.dot_dimension_numbers<[1], [0], [0], [1], [0, 0, 1, 1], [], []>} : vector<1x128xf32>, vector<128x128xf32>, vector<1x128xf32> -> vector<1x128xf32>
    %cst_69 = arith.constant 0.001953125 : f32
    %93 = vector.broadcast %cst_69 : f32 to vector<1x128xf32>
    %94 = arith.mulf %92, %93 : vector<1x128xf32>
    %cst_70 = arith.constant 9.99999974E-6 : f32
    %95 = vector.broadcast %cst_70 : f32 to vector<1x128xf32>
    %96 = arith.addf %94, %95 : vector<1x128xf32>
    %97 = math.rsqrt %96 : vector<1x128xf32>
    %98 = arith.mulf %2, %97 : vector<1x128xf32>
    %99 = arith.mulf %83, %98 : vector<1x128xf32>
    %100 = arith.subf %3, %99 : vector<1x128xf32>
    %101 = vector.broadcast %98 : vector<1x128xf32> to vector<34x128xf32>
    %102 = arith.mulf %75, %101 : vector<34x128xf32>
    %103 = vector.broadcast %100 : vector<1x128xf32> to vector<34x128xf32>
    %104 = arith.addf %102, %103 : vector<34x128xf32>
    %cst_71 = arith.constant 0.000000e+00 : f32
    %105 = vector.broadcast %cst_71 : f32 to vector<34x128xf32>
    %106 = arith.maximumf %104, %105 : vector<34x128xf32>
    %107 = vector.broadcast %4 : vector<34x1xf32> to vector<34x128xf32>
    %108 = arith.mulf %106, %107 : vector<34x128xf32>
    %c0_72 = arith.constant 0 : index
    %c0_73 = arith.constant 0 : index
    %109 = vector.load %arg9[%c0_72, %c0_73] : memref<36x128xf32, #tpu.memory_space<vmem>>, vector<1x128xf32>
    tpu.vector_store %arg9[%c0_72, %c0_73], %55 {strides = array<i32>} : memref<36x128xf32, #tpu.memory_space<vmem>>, vector<1x128xf32>,
    %c35_74 = arith.constant 35 : index
    %c0_75 = arith.constant 0 : index
    %110 = vector.load %arg9[%c35_74, %c0_75] : memref<36x128xf32, #tpu.memory_space<vmem>>, vector<1x128xf32>
    tpu.vector_store %arg9[%c35_74, %c0_75], %55 {strides = array<i32>} : memref<36x128xf32, #tpu.memory_space<vmem>>, vector<1x128xf32>,
    %c1_76 = arith.constant 1 : index
    %c0_77 = arith.constant 0 : index
    %111 = vector.load %arg9[%c1_76, %c0_77] : memref<36x128xf32, #tpu.memory_space<vmem>>, vector<34x128xf32>
    tpu.vector_store %arg9[%c1_76, %c0_77], %108 {strides = array<i32>} : memref<36x128xf32, #tpu.memory_space<vmem>>, vector<34x128xf32>,
    return
  }
}

module attributes {stable_mosaic.version = 11 : i64} {
  func.func @_block_kernel(%arg0: memref<20x64xf32, #tpu.memory_space<vmem>>, %arg1: memref<3x64x128xbf16, #tpu.memory_space<vmem>>, %arg2: memref<3x128x128xbf16, #tpu.memory_space<vmem>>, %arg3: memref<128x128xf32, #tpu.memory_space<vmem>>, %arg4: memref<1x128xf32, #tpu.memory_space<vmem>>, %arg5: memref<1x128xf32, #tpu.memory_space<vmem>>, %arg6: memref<1x128xf32, #tpu.memory_space<vmem>>, %arg7: memref<1x128xf32, #tpu.memory_space<vmem>>, %arg8: memref<18x1xf32, #tpu.memory_space<vmem>>, %arg9: memref<2x128x128xbf16, #tpu.memory_space<vmem>>, %arg10: memref<1x128xf32, #tpu.memory_space<vmem>>, %arg11: memref<18x128xf32, #tpu.memory_space<vmem>>, %arg12: memref<18x128xf32, #tpu.memory_space<vmem>>, %arg13: memref<20x128xf32, #tpu.memory_space<vmem>>) attributes {dimension_semantics = [], scalar_prefetch = 0 : i64, scratch_operands = 1 : i64, tpu.core_type = #tpu.core_type<tc>} {
    %c0 = arith.constant 0 : index
    %c0_0 = arith.constant 0 : index
    %0 = vector.load %arg4[%c0, %c0_0] : memref<1x128xf32, #tpu.memory_space<vmem>>, vector<1x128xf32>
    %c0_1 = arith.constant 0 : index
    %c0_2 = arith.constant 0 : index
    %1 = vector.load %arg5[%c0_1, %c0_2] : memref<1x128xf32, #tpu.memory_space<vmem>>, vector<1x128xf32>
    %c0_3 = arith.constant 0 : index
    %c0_4 = arith.constant 0 : index
    %2 = vector.load %arg6[%c0_3, %c0_4] : memref<1x128xf32, #tpu.memory_space<vmem>>, vector<1x128xf32>
    %c0_5 = arith.constant 0 : index
    %c0_6 = arith.constant 0 : index
    %3 = vector.load %arg7[%c0_5, %c0_6] : memref<1x128xf32, #tpu.memory_space<vmem>>, vector<1x128xf32>
    %c0_7 = arith.constant 0 : index
    %c0_8 = arith.constant 0 : index
    %4 = vector.load %arg8[%c0_7, %c0_8] : memref<18x1xf32, #tpu.memory_space<vmem>>, vector<18x1xf32>
    %c0_9 = arith.constant 0 : index
    %c0_10 = arith.constant 0 : index
    %5 = vector.load %arg0[%c0_9, %c0_10] : memref<20x64xf32, #tpu.memory_space<vmem>>, vector<18x64xf32>
    %6 = arith.truncf %5 : vector<18x64xf32> to vector<18x64xbf16>
    %c0_11 = arith.constant 0 : index
    %c0_12 = arith.constant 0 : index
    %c0_13 = arith.constant 0 : index
    %7 = vector.load %arg1[%c0_11, %c0_12, %c0_13] : memref<3x64x128xbf16, #tpu.memory_space<vmem>>, vector<1x64x128xbf16>
    %8 = vector.shape_cast %7 : vector<1x64x128xbf16> to vector<64x128xbf16>
    %cst = arith.constant dense<0.000000e+00> : vector<18x128xf32>
    %9 = tpu.matmul %6, %8, %cst {dimension_numbers = #tpu.dot_dimension_numbers<[1], [0], [0], [1], [0, 0, 1, 1], [], []>} : vector<18x64xbf16>, vector<64x128xbf16>, vector<18x128xf32> -> vector<18x128xf32>
    %c1 = arith.constant 1 : index
    %c0_14 = arith.constant 0 : index
    %10 = vector.load %arg0[%c1, %c0_14] : memref<20x64xf32, #tpu.memory_space<vmem>>, vector<18x64xf32>
    %11 = arith.truncf %10 : vector<18x64xf32> to vector<18x64xbf16>
    %c1_15 = arith.constant 1 : index
    %c0_16 = arith.constant 0 : index
    %c0_17 = arith.constant 0 : index
    %12 = vector.load %arg1[%c1_15, %c0_16, %c0_17] : memref<3x64x128xbf16, #tpu.memory_space<vmem>>, vector<1x64x128xbf16>
    %13 = vector.shape_cast %12 : vector<1x64x128xbf16> to vector<64x128xbf16>
    %cst_18 = arith.constant dense<0.000000e+00> : vector<18x128xf32>
    %14 = tpu.matmul %11, %13, %cst_18 {dimension_numbers = #tpu.dot_dimension_numbers<[1], [0], [0], [1], [0, 0, 1, 1], [], []>} : vector<18x64xbf16>, vector<64x128xbf16>, vector<18x128xf32> -> vector<18x128xf32>
    %15 = arith.addf %9, %14 : vector<18x128xf32>
    %c2 = arith.constant 2 : index
    %c0_19 = arith.constant 0 : index
    %16 = vector.load %arg0[%c2, %c0_19] : memref<20x64xf32, #tpu.memory_space<vmem>>, vector<18x64xf32>
    %17 = arith.truncf %16 : vector<18x64xf32> to vector<18x64xbf16>
    %c2_20 = arith.constant 2 : index
    %c0_21 = arith.constant 0 : index
    %c0_22 = arith.constant 0 : index
    %18 = vector.load %arg1[%c2_20, %c0_21, %c0_22] : memref<3x64x128xbf16, #tpu.memory_space<vmem>>, vector<1x64x128xbf16>
    %19 = vector.shape_cast %18 : vector<1x64x128xbf16> to vector<64x128xbf16>
    %cst_23 = arith.constant dense<0.000000e+00> : vector<18x128xf32>
    %20 = tpu.matmul %17, %19, %cst_23 {dimension_numbers = #tpu.dot_dimension_numbers<[1], [0], [0], [1], [0, 0, 1, 1], [], []>} : vector<18x64xbf16>, vector<64x128xbf16>, vector<18x128xf32> -> vector<18x128xf32>
    %21 = arith.addf %15, %20 : vector<18x128xf32>
    %22 = vector.broadcast %4 : vector<18x1xf32> to vector<18x128xf32>
    %23 = arith.mulf %21, %22 : vector<18x128xf32>
    %cst_24 = arith.constant dense<0.000000e+00> : vector<128xf32>
    %24 = vector.multi_reduction <add>, %23, %cst_24 [0] : vector<18x128xf32> to vector<128xf32>
    %25 = vector.shape_cast %24 : vector<128xf32> to vector<1x128xf32>
    %c0_25 = arith.constant 0 : index
    %c0_26 = arith.constant 0 : index
    %26 = vector.load %arg3[%c0_25, %c0_26] : memref<128x128xf32, #tpu.memory_space<vmem>>, vector<128x128xf32>
    %cst_27 = arith.constant dense<0.000000e+00> : vector<1x128xf32>
    %27 = tpu.matmul %25, %26, %cst_27 {dimension_numbers = #tpu.dot_dimension_numbers<[1], [0], [0], [1], [0, 0, 1, 1], [], []>} : vector<1x128xf32>, vector<128x128xf32>, vector<1x128xf32> -> vector<1x128xf32>
    %cst_28 = arith.constant 7.812500e-03 : f32
    %28 = vector.broadcast %cst_28 : f32 to vector<1x128xf32>
    %29 = arith.mulf %27, %28 : vector<1x128xf32>
    %30 = vector.broadcast %29 : vector<1x128xf32> to vector<18x128xf32>
    %31 = arith.subf %21, %30 : vector<18x128xf32>
    %32 = vector.broadcast %4 : vector<18x1xf32> to vector<18x128xf32>
    %33 = arith.mulf %31, %32 : vector<18x128xf32>
    %34 = arith.mulf %33, %33 : vector<18x128xf32>
    %cst_29 = arith.constant dense<0.000000e+00> : vector<128xf32>
    %35 = vector.multi_reduction <add>, %34, %cst_29 [0] : vector<18x128xf32> to vector<128xf32>
    %36 = vector.shape_cast %35 : vector<128xf32> to vector<1x128xf32>
    %c0_30 = arith.constant 0 : index
    %c0_31 = arith.constant 0 : index
    %37 = vector.load %arg3[%c0_30, %c0_31] : memref<128x128xf32, #tpu.memory_space<vmem>>, vector<128x128xf32>
    %cst_32 = arith.constant dense<0.000000e+00> : vector<1x128xf32>
    %38 = tpu.matmul %36, %37, %cst_32 {dimension_numbers = #tpu.dot_dimension_numbers<[1], [0], [0], [1], [0, 0, 1, 1], [], []>} : vector<1x128xf32>, vector<128x128xf32>, vector<1x128xf32> -> vector<1x128xf32>
    %cst_33 = arith.constant 7.812500e-03 : f32
    %39 = vector.broadcast %cst_33 : f32 to vector<1x128xf32>
    %40 = arith.mulf %38, %39 : vector<1x128xf32>
    %cst_34 = arith.constant 9.99999974E-6 : f32
    %41 = vector.broadcast %cst_34 : f32 to vector<1x128xf32>
    %42 = arith.addf %40, %41 : vector<1x128xf32>
    %43 = math.rsqrt %42 : vector<1x128xf32>
    %44 = arith.mulf %0, %43 : vector<1x128xf32>
    %45 = arith.mulf %29, %44 : vector<1x128xf32>
    %46 = arith.subf %1, %45 : vector<1x128xf32>
    %47 = vector.broadcast %44 : vector<1x128xf32> to vector<18x128xf32>
    %48 = arith.mulf %21, %47 : vector<18x128xf32>
    %49 = vector.broadcast %46 : vector<1x128xf32> to vector<18x128xf32>
    %50 = arith.addf %48, %49 : vector<18x128xf32>
    %cst_35 = arith.constant 0.000000e+00 : f32
    %51 = vector.broadcast %cst_35 : f32 to vector<18x128xf32>
    %52 = arith.maximumf %50, %51 : vector<18x128xf32>
    %53 = vector.broadcast %4 : vector<18x1xf32> to vector<18x128xf32>
    %54 = arith.mulf %52, %53 : vector<18x128xf32>
    %cst_36 = arith.constant 0.000000e+00 : f32
    %55 = vector.broadcast %cst_36 : f32 to vector<1x128xf32>
    %c0_37 = arith.constant 0 : index
    %c0_38 = arith.constant 0 : index
    %56 = vector.load %arg13[%c0_37, %c0_38] : memref<20x128xf32, #tpu.memory_space<vmem>>, vector<1x128xf32>
    tpu.vector_store %arg13[%c0_37, %c0_38], %55 {strides = array<i32>} : memref<20x128xf32, #tpu.memory_space<vmem>>, vector<1x128xf32>,
    %c19 = arith.constant 19 : index
    %c0_39 = arith.constant 0 : index
    %57 = vector.load %arg13[%c19, %c0_39] : memref<20x128xf32, #tpu.memory_space<vmem>>, vector<1x128xf32>
    tpu.vector_store %arg13[%c19, %c0_39], %55 {strides = array<i32>} : memref<20x128xf32, #tpu.memory_space<vmem>>, vector<1x128xf32>,
    %c1_40 = arith.constant 1 : index
    %c0_41 = arith.constant 0 : index
    %58 = vector.load %arg13[%c1_40, %c0_41] : memref<20x128xf32, #tpu.memory_space<vmem>>, vector<18x128xf32>
    tpu.vector_store %arg13[%c1_40, %c0_41], %54 {strides = array<i32>} : memref<20x128xf32, #tpu.memory_space<vmem>>, vector<18x128xf32>,
    %c0_42 = arith.constant 0 : index
    %c0_43 = arith.constant 0 : index
    %59 = vector.load %arg13[%c0_42, %c0_43] : memref<20x128xf32, #tpu.memory_space<vmem>>, vector<18x128xf32>
    %60 = arith.truncf %59 : vector<18x128xf32> to vector<18x128xbf16>
    %c0_44 = arith.constant 0 : index
    %c0_45 = arith.constant 0 : index
    %c0_46 = arith.constant 0 : index
    %61 = vector.load %arg2[%c0_44, %c0_45, %c0_46] : memref<3x128x128xbf16, #tpu.memory_space<vmem>>, vector<1x128x128xbf16>
    %62 = vector.shape_cast %61 : vector<1x128x128xbf16> to vector<128x128xbf16>
    %cst_47 = arith.constant dense<0.000000e+00> : vector<18x128xf32>
    %63 = tpu.matmul %60, %62, %cst_47 {dimension_numbers = #tpu.dot_dimension_numbers<[1], [0], [0], [1], [0, 0, 1, 1], [], []>} : vector<18x128xbf16>, vector<128x128xbf16>, vector<18x128xf32> -> vector<18x128xf32>
    %c1_48 = arith.constant 1 : index
    %c0_49 = arith.constant 0 : index
    %64 = vector.load %arg13[%c1_48, %c0_49] : memref<20x128xf32, #tpu.memory_space<vmem>>, vector<18x128xf32>
    %65 = arith.truncf %64 : vector<18x128xf32> to vector<18x128xbf16>
    %c1_50 = arith.constant 1 : index
    %c0_51 = arith.constant 0 : index
    %c0_52 = arith.constant 0 : index
    %66 = vector.load %arg2[%c1_50, %c0_51, %c0_52] : memref<3x128x128xbf16, #tpu.memory_space<vmem>>, vector<1x128x128xbf16>
    %67 = vector.shape_cast %66 : vector<1x128x128xbf16> to vector<128x128xbf16>
    %cst_53 = arith.constant dense<0.000000e+00> : vector<18x128xf32>
    %68 = tpu.matmul %65, %67, %cst_53 {dimension_numbers = #tpu.dot_dimension_numbers<[1], [0], [0], [1], [0, 0, 1, 1], [], []>} : vector<18x128xbf16>, vector<128x128xbf16>, vector<18x128xf32> -> vector<18x128xf32>
    %69 = arith.addf %63, %68 : vector<18x128xf32>
    %c2_54 = arith.constant 2 : index
    %c0_55 = arith.constant 0 : index
    %70 = vector.load %arg13[%c2_54, %c0_55] : memref<20x128xf32, #tpu.memory_space<vmem>>, vector<18x128xf32>
    %71 = arith.truncf %70 : vector<18x128xf32> to vector<18x128xbf16>
    %c2_56 = arith.constant 2 : index
    %c0_57 = arith.constant 0 : index
    %c0_58 = arith.constant 0 : index
    %72 = vector.load %arg2[%c2_56, %c0_57, %c0_58] : memref<3x128x128xbf16, #tpu.memory_space<vmem>>, vector<1x128x128xbf16>
    %73 = vector.shape_cast %72 : vector<1x128x128xbf16> to vector<128x128xbf16>
    %cst_59 = arith.constant dense<0.000000e+00> : vector<18x128xf32>
    %74 = tpu.matmul %71, %73, %cst_59 {dimension_numbers = #tpu.dot_dimension_numbers<[1], [0], [0], [1], [0, 0, 1, 1], [], []>} : vector<18x128xbf16>, vector<128x128xbf16>, vector<18x128xf32> -> vector<18x128xf32>
    %75 = arith.addf %69, %74 : vector<18x128xf32>
    %76 = vector.broadcast %4 : vector<18x1xf32> to vector<18x128xf32>
    %77 = arith.mulf %75, %76 : vector<18x128xf32>
    %cst_60 = arith.constant dense<0.000000e+00> : vector<128xf32>
    %78 = vector.multi_reduction <add>, %77, %cst_60 [0] : vector<18x128xf32> to vector<128xf32>
    %79 = vector.shape_cast %78 : vector<128xf32> to vector<1x128xf32>
    %c0_61 = arith.constant 0 : index
    %c0_62 = arith.constant 0 : index
    %80 = vector.load %arg3[%c0_61, %c0_62] : memref<128x128xf32, #tpu.memory_space<vmem>>, vector<128x128xf32>
    %cst_63 = arith.constant dense<0.000000e+00> : vector<1x128xf32>
    %81 = tpu.matmul %79, %80, %cst_63 {dimension_numbers = #tpu.dot_dimension_numbers<[1], [0], [0], [1], [0, 0, 1, 1], [], []>} : vector<1x128xf32>, vector<128x128xf32>, vector<1x128xf32> -> vector<1x128xf32>
    %cst_64 = arith.constant 7.812500e-03 : f32
    %82 = vector.broadcast %cst_64 : f32 to vector<1x128xf32>
    %83 = arith.mulf %81, %82 : vector<1x128xf32>
    %84 = vector.broadcast %83 : vector<1x128xf32> to vector<18x128xf32>
    %85 = arith.subf %75, %84 : vector<18x128xf32>
    %86 = vector.broadcast %4 : vector<18x1xf32> to vector<18x128xf32>
    %87 = arith.mulf %85, %86 : vector<18x128xf32>
    %88 = arith.mulf %87, %87 : vector<18x128xf32>
    %cst_65 = arith.constant dense<0.000000e+00> : vector<128xf32>
    %89 = vector.multi_reduction <add>, %88, %cst_65 [0] : vector<18x128xf32> to vector<128xf32>
    %90 = vector.shape_cast %89 : vector<128xf32> to vector<1x128xf32>
    %c0_66 = arith.constant 0 : index
    %c0_67 = arith.constant 0 : index
    %91 = vector.load %arg3[%c0_66, %c0_67] : memref<128x128xf32, #tpu.memory_space<vmem>>, vector<128x128xf32>
    %cst_68 = arith.constant dense<0.000000e+00> : vector<1x128xf32>
    %92 = tpu.matmul %90, %91, %cst_68 {dimension_numbers = #tpu.dot_dimension_numbers<[1], [0], [0], [1], [0, 0, 1, 1], [], []>} : vector<1x128xf32>, vector<128x128xf32>, vector<1x128xf32> -> vector<1x128xf32>
    %cst_69 = arith.constant 7.812500e-03 : f32
    %93 = vector.broadcast %cst_69 : f32 to vector<1x128xf32>
    %94 = arith.mulf %92, %93 : vector<1x128xf32>
    %cst_70 = arith.constant 9.99999974E-6 : f32
    %95 = vector.broadcast %cst_70 : f32 to vector<1x128xf32>
    %96 = arith.addf %94, %95 : vector<1x128xf32>
    %97 = math.rsqrt %96 : vector<1x128xf32>
    %98 = arith.mulf %2, %97 : vector<1x128xf32>
    %99 = arith.mulf %83, %98 : vector<1x128xf32>
    %100 = arith.subf %3, %99 : vector<1x128xf32>
    %101 = vector.broadcast %98 : vector<1x128xf32> to vector<18x128xf32>
    %102 = arith.mulf %75, %101 : vector<18x128xf32>
    %103 = vector.broadcast %100 : vector<1x128xf32> to vector<18x128xf32>
    %104 = arith.addf %102, %103 : vector<18x128xf32>
    %cst_71 = arith.constant 0.000000e+00 : f32
    %105 = vector.broadcast %cst_71 : f32 to vector<18x128xf32>
    %106 = arith.maximumf %104, %105 : vector<18x128xf32>
    %107 = vector.broadcast %4 : vector<18x1xf32> to vector<18x128xf32>
    %108 = arith.mulf %106, %107 : vector<18x128xf32>
    %c0_72 = arith.constant 0 : index
    %c0_73 = arith.constant 0 : index
    %109 = vector.load %arg10[%c0_72, %c0_73] : memref<1x128xf32, #tpu.memory_space<vmem>>, vector<1x128xf32>
    %110 = arith.truncf %108 : vector<18x128xf32> to vector<18x128xbf16>
    %c0_74 = arith.constant 0 : index
    %c0_75 = arith.constant 0 : index
    %c0_76 = arith.constant 0 : index
    %111 = vector.load %arg9[%c0_74, %c0_75, %c0_76] : memref<2x128x128xbf16, #tpu.memory_space<vmem>>, vector<1x128x128xbf16>
    %112 = vector.shape_cast %111 : vector<1x128x128xbf16> to vector<128x128xbf16>
    %cst_77 = arith.constant dense<0.000000e+00> : vector<18x128xf32>
    %113 = tpu.matmul %110, %112, %cst_77 {dimension_numbers = #tpu.dot_dimension_numbers<[1], [0], [0], [1], [0, 0, 1, 1], [], []>} : vector<18x128xbf16>, vector<128x128xbf16>, vector<18x128xf32> -> vector<18x128xf32>
    %114 = vector.broadcast %109 : vector<1x128xf32> to vector<18x128xf32>
    %115 = arith.addf %113, %114 : vector<18x128xf32>
    %c0_78 = arith.constant 0 : index
    %c0_79 = arith.constant 0 : index
    %116 = vector.load %arg11[%c0_78, %c0_79] : memref<18x128xf32, #tpu.memory_space<vmem>>, vector<18x128xf32>
    tpu.vector_store %arg11[%c0_78, %c0_79], %115 {strides = array<i32>} : memref<18x128xf32, #tpu.memory_space<vmem>>, vector<18x128xf32>,
    %c1_80 = arith.constant 1 : index
    %c0_81 = arith.constant 0 : index
    %c0_82 = arith.constant 0 : index
    %117 = vector.load %arg9[%c1_80, %c0_81, %c0_82] : memref<2x128x128xbf16, #tpu.memory_space<vmem>>, vector<1x128x128xbf16>
    %118 = vector.shape_cast %117 : vector<1x128x128xbf16> to vector<128x128xbf16>
    %cst_83 = arith.constant dense<0.000000e+00> : vector<18x128xf32>
    %119 = tpu.matmul %110, %118, %cst_83 {dimension_numbers = #tpu.dot_dimension_numbers<[1], [0], [0], [1], [0, 0, 1, 1], [], []>} : vector<18x128xbf16>, vector<128x128xbf16>, vector<18x128xf32> -> vector<18x128xf32>
    %120 = vector.broadcast %109 : vector<1x128xf32> to vector<18x128xf32>
    %121 = arith.addf %119, %120 : vector<18x128xf32>
    %c0_84 = arith.constant 0 : index
    %c0_85 = arith.constant 0 : index
    %122 = vector.load %arg12[%c0_84, %c0_85] : memref<18x128xf32, #tpu.memory_space<vmem>>, vector<18x128xf32>
    tpu.vector_store %arg12[%c0_84, %c0_85], %121 {strides = array<i32>} : memref<18x128xf32, #tpu.memory_space<vmem>>, vector<18x128xf32>,
    return
  }
}

module attributes {stable_mosaic.version = 11 : i64} {
  func.func @_block_kernel(%arg0: memref<36x128xf32, #tpu.memory_space<vmem>>, %arg1: memref<36x128xf32, #tpu.memory_space<vmem>>, %arg2: memref<3x128x128xbf16, #tpu.memory_space<vmem>>, %arg3: memref<3x128x128xbf16, #tpu.memory_space<vmem>>, %arg4: memref<3x128x128xbf16, #tpu.memory_space<vmem>>, %arg5: memref<128x128xf32, #tpu.memory_space<vmem>>, %arg6: memref<1x128xf32, #tpu.memory_space<vmem>>, %arg7: memref<1x128xf32, #tpu.memory_space<vmem>>, %arg8: memref<1x128xf32, #tpu.memory_space<vmem>>, %arg9: memref<1x128xf32, #tpu.memory_space<vmem>>, %arg10: memref<34x1xf32, #tpu.memory_space<vmem>>, %arg11: memref<128x16xf32, #tpu.memory_space<vmem>>, %arg12: memref<128x16xf32, #tpu.memory_space<vmem>>, %arg13: memref<1x16xf32, #tpu.memory_space<vmem>>, %arg14: memref<1x16xf32, #tpu.memory_space<vmem>>, %arg15: memref<34x16xf32, #tpu.memory_space<vmem>>, %arg16: memref<34x16xf32, #tpu.memory_space<vmem>>, %arg17: memref<34x16xf32, #tpu.memory_space<vmem>>, %arg18: memref<36x128xf32, #tpu.memory_space<vmem>>) attributes {dimension_semantics = [], scalar_prefetch = 0 : i64, scratch_operands = 1 : i64, tpu.core_type = #tpu.core_type<tc>} {
    %c0 = arith.constant 0 : index
    %c0_0 = arith.constant 0 : index
    %0 = vector.load %arg6[%c0, %c0_0] : memref<1x128xf32, #tpu.memory_space<vmem>>, vector<1x128xf32>
    %c0_1 = arith.constant 0 : index
    %c0_2 = arith.constant 0 : index
    %1 = vector.load %arg7[%c0_1, %c0_2] : memref<1x128xf32, #tpu.memory_space<vmem>>, vector<1x128xf32>
    %c0_3 = arith.constant 0 : index
    %c0_4 = arith.constant 0 : index
    %2 = vector.load %arg8[%c0_3, %c0_4] : memref<1x128xf32, #tpu.memory_space<vmem>>, vector<1x128xf32>
    %c0_5 = arith.constant 0 : index
    %c0_6 = arith.constant 0 : index
    %3 = vector.load %arg9[%c0_5, %c0_6] : memref<1x128xf32, #tpu.memory_space<vmem>>, vector<1x128xf32>
    %c0_7 = arith.constant 0 : index
    %c0_8 = arith.constant 0 : index
    %4 = vector.load %arg10[%c0_7, %c0_8] : memref<34x1xf32, #tpu.memory_space<vmem>>, vector<34x1xf32>
    %c0_9 = arith.constant 0 : index
    %c0_10 = arith.constant 0 : index
    %5 = vector.load %arg0[%c0_9, %c0_10] : memref<36x128xf32, #tpu.memory_space<vmem>>, vector<34x128xf32>
    %6 = arith.truncf %5 : vector<34x128xf32> to vector<34x128xbf16>
    %c0_11 = arith.constant 0 : index
    %c0_12 = arith.constant 0 : index
    %c0_13 = arith.constant 0 : index
    %7 = vector.load %arg2[%c0_11, %c0_12, %c0_13] : memref<3x128x128xbf16, #tpu.memory_space<vmem>>, vector<1x128x128xbf16>
    %8 = vector.shape_cast %7 : vector<1x128x128xbf16> to vector<128x128xbf16>
    %cst = arith.constant dense<0.000000e+00> : vector<34x128xf32>
    %9 = tpu.matmul %6, %8, %cst {dimension_numbers = #tpu.dot_dimension_numbers<[1], [0], [0], [1], [0, 0, 1, 1], [], []>} : vector<34x128xbf16>, vector<128x128xbf16>, vector<34x128xf32> -> vector<34x128xf32>
    %c1 = arith.constant 1 : index
    %c0_14 = arith.constant 0 : index
    %10 = vector.load %arg0[%c1, %c0_14] : memref<36x128xf32, #tpu.memory_space<vmem>>, vector<34x128xf32>
    %11 = arith.truncf %10 : vector<34x128xf32> to vector<34x128xbf16>
    %c1_15 = arith.constant 1 : index
    %c0_16 = arith.constant 0 : index
    %c0_17 = arith.constant 0 : index
    %12 = vector.load %arg2[%c1_15, %c0_16, %c0_17] : memref<3x128x128xbf16, #tpu.memory_space<vmem>>, vector<1x128x128xbf16>
    %13 = vector.shape_cast %12 : vector<1x128x128xbf16> to vector<128x128xbf16>
    %cst_18 = arith.constant dense<0.000000e+00> : vector<34x128xf32>
    %14 = tpu.matmul %11, %13, %cst_18 {dimension_numbers = #tpu.dot_dimension_numbers<[1], [0], [0], [1], [0, 0, 1, 1], [], []>} : vector<34x128xbf16>, vector<128x128xbf16>, vector<34x128xf32> -> vector<34x128xf32>
    %15 = arith.addf %9, %14 : vector<34x128xf32>
    %c2 = arith.constant 2 : index
    %c0_19 = arith.constant 0 : index
    %16 = vector.load %arg0[%c2, %c0_19] : memref<36x128xf32, #tpu.memory_space<vmem>>, vector<34x128xf32>
    %17 = arith.truncf %16 : vector<34x128xf32> to vector<34x128xbf16>
    %c2_20 = arith.constant 2 : index
    %c0_21 = arith.constant 0 : index
    %c0_22 = arith.constant 0 : index
    %18 = vector.load %arg2[%c2_20, %c0_21, %c0_22] : memref<3x128x128xbf16, #tpu.memory_space<vmem>>, vector<1x128x128xbf16>
    %19 = vector.shape_cast %18 : vector<1x128x128xbf16> to vector<128x128xbf16>
    %cst_23 = arith.constant dense<0.000000e+00> : vector<34x128xf32>
    %20 = tpu.matmul %17, %19, %cst_23 {dimension_numbers = #tpu.dot_dimension_numbers<[1], [0], [0], [1], [0, 0, 1, 1], [], []>} : vector<34x128xbf16>, vector<128x128xbf16>, vector<34x128xf32> -> vector<34x128xf32>
    %21 = arith.addf %15, %20 : vector<34x128xf32>
    %c0_24 = arith.constant 0 : index
    %c0_25 = arith.constant 0 : index
    %22 = vector.load %arg1[%c0_24, %c0_25] : memref<36x128xf32, #tpu.memory_space<vmem>>, vector<34x128xf32>
    %23 = arith.truncf %22 : vector<34x128xf32> to vector<34x128xbf16>
    %c0_26 = arith.constant 0 : index
    %c0_27 = arith.constant 0 : index
    %c0_28 = arith.constant 0 : index
    %24 = vector.load %arg3[%c0_26, %c0_27, %c0_28] : memref<3x128x128xbf16, #tpu.memory_space<vmem>>, vector<1x128x128xbf16>
    %25 = vector.shape_cast %24 : vector<1x128x128xbf16> to vector<128x128xbf16>
    %cst_29 = arith.constant dense<0.000000e+00> : vector<34x128xf32>
    %26 = tpu.matmul %23, %25, %cst_29 {dimension_numbers = #tpu.dot_dimension_numbers<[1], [0], [0], [1], [0, 0, 1, 1], [], []>} : vector<34x128xbf16>, vector<128x128xbf16>, vector<34x128xf32> -> vector<34x128xf32>
    %c1_30 = arith.constant 1 : index
    %c0_31 = arith.constant 0 : index
    %27 = vector.load %arg1[%c1_30, %c0_31] : memref<36x128xf32, #tpu.memory_space<vmem>>, vector<34x128xf32>
    %28 = arith.truncf %27 : vector<34x128xf32> to vector<34x128xbf16>
    %c1_32 = arith.constant 1 : index
    %c0_33 = arith.constant 0 : index
    %c0_34 = arith.constant 0 : index
    %29 = vector.load %arg3[%c1_32, %c0_33, %c0_34] : memref<3x128x128xbf16, #tpu.memory_space<vmem>>, vector<1x128x128xbf16>
    %30 = vector.shape_cast %29 : vector<1x128x128xbf16> to vector<128x128xbf16>
    %cst_35 = arith.constant dense<0.000000e+00> : vector<34x128xf32>
    %31 = tpu.matmul %28, %30, %cst_35 {dimension_numbers = #tpu.dot_dimension_numbers<[1], [0], [0], [1], [0, 0, 1, 1], [], []>} : vector<34x128xbf16>, vector<128x128xbf16>, vector<34x128xf32> -> vector<34x128xf32>
    %32 = arith.addf %26, %31 : vector<34x128xf32>
    %c2_36 = arith.constant 2 : index
    %c0_37 = arith.constant 0 : index
    %33 = vector.load %arg1[%c2_36, %c0_37] : memref<36x128xf32, #tpu.memory_space<vmem>>, vector<34x128xf32>
    %34 = arith.truncf %33 : vector<34x128xf32> to vector<34x128xbf16>
    %c2_38 = arith.constant 2 : index
    %c0_39 = arith.constant 0 : index
    %c0_40 = arith.constant 0 : index
    %35 = vector.load %arg3[%c2_38, %c0_39, %c0_40] : memref<3x128x128xbf16, #tpu.memory_space<vmem>>, vector<1x128x128xbf16>
    %36 = vector.shape_cast %35 : vector<1x128x128xbf16> to vector<128x128xbf16>
    %cst_41 = arith.constant dense<0.000000e+00> : vector<34x128xf32>
    %37 = tpu.matmul %34, %36, %cst_41 {dimension_numbers = #tpu.dot_dimension_numbers<[1], [0], [0], [1], [0, 0, 1, 1], [], []>} : vector<34x128xbf16>, vector<128x128xbf16>, vector<34x128xf32> -> vector<34x128xf32>
    %38 = arith.addf %32, %37 : vector<34x128xf32>
    %39 = arith.addf %21, %38 : vector<34x128xf32>
    %40 = vector.broadcast %4 : vector<34x1xf32> to vector<34x128xf32>
    %41 = arith.mulf %39, %40 : vector<34x128xf32>
    %cst_42 = arith.constant dense<0.000000e+00> : vector<128xf32>
    %42 = vector.multi_reduction <add>, %41, %cst_42 [0] : vector<34x128xf32> to vector<128xf32>
    %43 = vector.shape_cast %42 : vector<128xf32> to vector<1x128xf32>
    %c0_43 = arith.constant 0 : index
    %c0_44 = arith.constant 0 : index
    %44 = vector.load %arg5[%c0_43, %c0_44] : memref<128x128xf32, #tpu.memory_space<vmem>>, vector<128x128xf32>
    %cst_45 = arith.constant dense<0.000000e+00> : vector<1x128xf32>
    %45 = tpu.matmul %43, %44, %cst_45 {dimension_numbers = #tpu.dot_dimension_numbers<[1], [0], [0], [1], [0, 0, 1, 1], [], []>} : vector<1x128xf32>, vector<128x128xf32>, vector<1x128xf32> -> vector<1x128xf32>
    %cst_46 = arith.constant 0.001953125 : f32
    %46 = vector.broadcast %cst_46 : f32 to vector<1x128xf32>
    %47 = arith.mulf %45, %46 : vector<1x128xf32>
    %48 = vector.broadcast %47 : vector<1x128xf32> to vector<34x128xf32>
    %49 = arith.subf %39, %48 : vector<34x128xf32>
    %50 = vector.broadcast %4 : vector<34x1xf32> to vector<34x128xf32>
    %51 = arith.mulf %49, %50 : vector<34x128xf32>
    %52 = arith.mulf %51, %51 : vector<34x128xf32>
    %cst_47 = arith.constant dense<0.000000e+00> : vector<128xf32>
    %53 = vector.multi_reduction <add>, %52, %cst_47 [0] : vector<34x128xf32> to vector<128xf32>
    %54 = vector.shape_cast %53 : vector<128xf32> to vector<1x128xf32>
    %c0_48 = arith.constant 0 : index
    %c0_49 = arith.constant 0 : index
    %55 = vector.load %arg5[%c0_48, %c0_49] : memref<128x128xf32, #tpu.memory_space<vmem>>, vector<128x128xf32>
    %cst_50 = arith.constant dense<0.000000e+00> : vector<1x128xf32>
    %56 = tpu.matmul %54, %55, %cst_50 {dimension_numbers = #tpu.dot_dimension_numbers<[1], [0], [0], [1], [0, 0, 1, 1], [], []>} : vector<1x128xf32>, vector<128x128xf32>, vector<1x128xf32> -> vector<1x128xf32>
    %cst_51 = arith.constant 0.001953125 : f32
    %57 = vector.broadcast %cst_51 : f32 to vector<1x128xf32>
    %58 = arith.mulf %56, %57 : vector<1x128xf32>
    %cst_52 = arith.constant 9.99999974E-6 : f32
    %59 = vector.broadcast %cst_52 : f32 to vector<1x128xf32>
    %60 = arith.addf %58, %59 : vector<1x128xf32>
    %61 = math.rsqrt %60 : vector<1x128xf32>
    %62 = arith.mulf %0, %61 : vector<1x128xf32>
    %63 = arith.mulf %47, %62 : vector<1x128xf32>
    %64 = arith.subf %1, %63 : vector<1x128xf32>
    %65 = vector.broadcast %62 : vector<1x128xf32> to vector<34x128xf32>
    %66 = arith.mulf %39, %65 : vector<34x128xf32>
    %67 = vector.broadcast %64 : vector<1x128xf32> to vector<34x128xf32>
    %68 = arith.addf %66, %67 : vector<34x128xf32>
    %cst_53 = arith.constant 0.000000e+00 : f32
    %69 = vector.broadcast %cst_53 : f32 to vector<34x128xf32>
    %70 = arith.maximumf %68, %69 : vector<34x128xf32>
    %71 = vector.broadcast %4 : vector<34x1xf32> to vector<34x128xf32>
    %72 = arith.mulf %70, %71 : vector<34x128xf32>
    %cst_54 = arith.constant 0.000000e+00 : f32
    %73 = vector.broadcast %cst_54 : f32 to vector<1x128xf32>
    %c0_55 = arith.constant 0 : index
    %c0_56 = arith.constant 0 : index
    %74 = vector.load %arg18[%c0_55, %c0_56] : memref<36x128xf32, #tpu.memory_space<vmem>>, vector<1x128xf32>
    tpu.vector_store %arg18[%c0_55, %c0_56], %73 {strides = array<i32>} : memref<36x128xf32, #tpu.memory_space<vmem>>, vector<1x128xf32>,
    %c35 = arith.constant 35 : index
    %c0_57 = arith.constant 0 : index
    %75 = vector.load %arg18[%c35, %c0_57] : memref<36x128xf32, #tpu.memory_space<vmem>>, vector<1x128xf32>
    tpu.vector_store %arg18[%c35, %c0_57], %73 {strides = array<i32>} : memref<36x128xf32, #tpu.memory_space<vmem>>, vector<1x128xf32>,
    %c1_58 = arith.constant 1 : index
    %c0_59 = arith.constant 0 : index
    %76 = vector.load %arg18[%c1_58, %c0_59] : memref<36x128xf32, #tpu.memory_space<vmem>>, vector<34x128xf32>
    tpu.vector_store %arg18[%c1_58, %c0_59], %72 {strides = array<i32>} : memref<36x128xf32, #tpu.memory_space<vmem>>, vector<34x128xf32>,
    %c0_60 = arith.constant 0 : index
    %c0_61 = arith.constant 0 : index
    %77 = vector.load %arg18[%c0_60, %c0_61] : memref<36x128xf32, #tpu.memory_space<vmem>>, vector<34x128xf32>
    %78 = arith.truncf %77 : vector<34x128xf32> to vector<34x128xbf16>
    %c0_62 = arith.constant 0 : index
    %c0_63 = arith.constant 0 : index
    %c0_64 = arith.constant 0 : index
    %79 = vector.load %arg4[%c0_62, %c0_63, %c0_64] : memref<3x128x128xbf16, #tpu.memory_space<vmem>>, vector<1x128x128xbf16>
    %80 = vector.shape_cast %79 : vector<1x128x128xbf16> to vector<128x128xbf16>
    %cst_65 = arith.constant dense<0.000000e+00> : vector<34x128xf32>
    %81 = tpu.matmul %78, %80, %cst_65 {dimension_numbers = #tpu.dot_dimension_numbers<[1], [0], [0], [1], [0, 0, 1, 1], [], []>} : vector<34x128xbf16>, vector<128x128xbf16>, vector<34x128xf32> -> vector<34x128xf32>
    %c1_66 = arith.constant 1 : index
    %c0_67 = arith.constant 0 : index
    %82 = vector.load %arg18[%c1_66, %c0_67] : memref<36x128xf32, #tpu.memory_space<vmem>>, vector<34x128xf32>
    %83 = arith.truncf %82 : vector<34x128xf32> to vector<34x128xbf16>
    %c1_68 = arith.constant 1 : index
    %c0_69 = arith.constant 0 : index
    %c0_70 = arith.constant 0 : index
    %84 = vector.load %arg4[%c1_68, %c0_69, %c0_70] : memref<3x128x128xbf16, #tpu.memory_space<vmem>>, vector<1x128x128xbf16>
    %85 = vector.shape_cast %84 : vector<1x128x128xbf16> to vector<128x128xbf16>
    %cst_71 = arith.constant dense<0.000000e+00> : vector<34x128xf32>
    %86 = tpu.matmul %83, %85, %cst_71 {dimension_numbers = #tpu.dot_dimension_numbers<[1], [0], [0], [1], [0, 0, 1, 1], [], []>} : vector<34x128xbf16>, vector<128x128xbf16>, vector<34x128xf32> -> vector<34x128xf32>
    %87 = arith.addf %81, %86 : vector<34x128xf32>
    %c2_72 = arith.constant 2 : index
    %c0_73 = arith.constant 0 : index
    %88 = vector.load %arg18[%c2_72, %c0_73] : memref<36x128xf32, #tpu.memory_space<vmem>>, vector<34x128xf32>
    %89 = arith.truncf %88 : vector<34x128xf32> to vector<34x128xbf16>
    %c2_74 = arith.constant 2 : index
    %c0_75 = arith.constant 0 : index
    %c0_76 = arith.constant 0 : index
    %90 = vector.load %arg4[%c2_74, %c0_75, %c0_76] : memref<3x128x128xbf16, #tpu.memory_space<vmem>>, vector<1x128x128xbf16>
    %91 = vector.shape_cast %90 : vector<1x128x128xbf16> to vector<128x128xbf16>
    %cst_77 = arith.constant dense<0.000000e+00> : vector<34x128xf32>
    %92 = tpu.matmul %89, %91, %cst_77 {dimension_numbers = #tpu.dot_dimension_numbers<[1], [0], [0], [1], [0, 0, 1, 1], [], []>} : vector<34x128xbf16>, vector<128x128xbf16>, vector<34x128xf32> -> vector<34x128xf32>
    %93 = arith.addf %87, %92 : vector<34x128xf32>
    %94 = vector.broadcast %4 : vector<34x1xf32> to vector<34x128xf32>
    %95 = arith.mulf %93, %94 : vector<34x128xf32>
    %cst_78 = arith.constant dense<0.000000e+00> : vector<128xf32>
    %96 = vector.multi_reduction <add>, %95, %cst_78 [0] : vector<34x128xf32> to vector<128xf32>
    %97 = vector.shape_cast %96 : vector<128xf32> to vector<1x128xf32>
    %c0_79 = arith.constant 0 : index
    %c0_80 = arith.constant 0 : index
    %98 = vector.load %arg5[%c0_79, %c0_80] : memref<128x128xf32, #tpu.memory_space<vmem>>, vector<128x128xf32>
    %cst_81 = arith.constant dense<0.000000e+00> : vector<1x128xf32>
    %99 = tpu.matmul %97, %98, %cst_81 {dimension_numbers = #tpu.dot_dimension_numbers<[1], [0], [0], [1], [0, 0, 1, 1], [], []>} : vector<1x128xf32>, vector<128x128xf32>, vector<1x128xf32> -> vector<1x128xf32>
    %cst_82 = arith.constant 0.001953125 : f32
    %100 = vector.broadcast %cst_82 : f32 to vector<1x128xf32>
    %101 = arith.mulf %99, %100 : vector<1x128xf32>
    %102 = vector.broadcast %101 : vector<1x128xf32> to vector<34x128xf32>
    %103 = arith.subf %93, %102 : vector<34x128xf32>
    %104 = vector.broadcast %4 : vector<34x1xf32> to vector<34x128xf32>
    %105 = arith.mulf %103, %104 : vector<34x128xf32>
    %106 = arith.mulf %105, %105 : vector<34x128xf32>
    %cst_83 = arith.constant dense<0.000000e+00> : vector<128xf32>
    %107 = vector.multi_reduction <add>, %106, %cst_83 [0] : vector<34x128xf32> to vector<128xf32>
    %108 = vector.shape_cast %107 : vector<128xf32> to vector<1x128xf32>
    %c0_84 = arith.constant 0 : index
    %c0_85 = arith.constant 0 : index
    %109 = vector.load %arg5[%c0_84, %c0_85] : memref<128x128xf32, #tpu.memory_space<vmem>>, vector<128x128xf32>
    %cst_86 = arith.constant dense<0.000000e+00> : vector<1x128xf32>
    %110 = tpu.matmul %108, %109, %cst_86 {dimension_numbers = #tpu.dot_dimension_numbers<[1], [0], [0], [1], [0, 0, 1, 1], [], []>} : vector<1x128xf32>, vector<128x128xf32>, vector<1x128xf32> -> vector<1x128xf32>
    %cst_87 = arith.constant 0.001953125 : f32
    %111 = vector.broadcast %cst_87 : f32 to vector<1x128xf32>
    %112 = arith.mulf %110, %111 : vector<1x128xf32>
    %cst_88 = arith.constant 9.99999974E-6 : f32
    %113 = vector.broadcast %cst_88 : f32 to vector<1x128xf32>
    %114 = arith.addf %112, %113 : vector<1x128xf32>
    %115 = math.rsqrt %114 : vector<1x128xf32>
    %116 = arith.mulf %2, %115 : vector<1x128xf32>
    %117 = arith.mulf %101, %116 : vector<1x128xf32>
    %118 = arith.subf %3, %117 : vector<1x128xf32>
    %119 = vector.broadcast %116 : vector<1x128xf32> to vector<34x128xf32>
    %120 = arith.mulf %93, %119 : vector<34x128xf32>
    %121 = vector.broadcast %118 : vector<1x128xf32> to vector<34x128xf32>
    %122 = arith.addf %120, %121 : vector<34x128xf32>
    %cst_89 = arith.constant 0.000000e+00 : f32
    %123 = vector.broadcast %cst_89 : f32 to vector<34x128xf32>
    %124 = arith.maximumf %122, %123 : vector<34x128xf32>
    %125 = vector.broadcast %4 : vector<34x1xf32> to vector<34x128xf32>
    %126 = arith.mulf %124, %125 : vector<34x128xf32>
    %c0_90 = arith.constant 0 : index
    %c0_91 = arith.constant 0 : index
    %127 = vector.load %arg11[%c0_90, %c0_91] : memref<128x16xf32, #tpu.memory_space<vmem>>, vector<128x16xf32>
    %c0_92 = arith.constant 0 : index
    %c0_93 = arith.constant 0 : index
    %128 = vector.load %arg12[%c0_92, %c0_93] : memref<128x16xf32, #tpu.memory_space<vmem>>, vector<128x16xf32>
    %c0_94 = arith.constant 0 : index
    %c0_95 = arith.constant 0 : index
    %129 = vector.load %arg13[%c0_94, %c0_95] : memref<1x16xf32, #tpu.memory_space<vmem>>, vector<1x16xf32>
    %c0_96 = arith.constant 0 : index
    %c0_97 = arith.constant 0 : index
    %130 = vector.load %arg14[%c0_96, %c0_97] : memref<1x16xf32, #tpu.memory_space<vmem>>, vector<1x16xf32>
    %c0_98 = arith.constant 0 : index
    %c0_99 = arith.constant 0 : index
    %131 = vector.load %arg15[%c0_98, %c0_99] : memref<34x16xf32, #tpu.memory_space<vmem>>, vector<34x16xf32>
    %cst_100 = arith.constant dense<0.000000e+00> : vector<34x16xf32>
    %132 = tpu.matmul %126, %127, %cst_100 {dimension_numbers = #tpu.dot_dimension_numbers<[1], [0], [0], [1], [0, 0, 1, 1], [], []>} : vector<34x128xf32>, vector<128x16xf32>, vector<34x16xf32> -> vector<34x16xf32>
    %133 = vector.broadcast %129 : vector<1x16xf32> to vector<34x16xf32>
    %134 = arith.addf %132, %133 : vector<34x16xf32>
    %cst_101 = arith.constant dense<0.000000e+00> : vector<34x16xf32>
    %135 = tpu.matmul %126, %128, %cst_101 {dimension_numbers = #tpu.dot_dimension_numbers<[1], [0], [0], [1], [0, 0, 1, 1], [], []>} : vector<34x128xf32>, vector<128x16xf32>, vector<34x16xf32> -> vector<34x16xf32>
    %136 = vector.broadcast %130 : vector<1x16xf32> to vector<34x16xf32>
    %137 = arith.addf %135, %136 : vector<34x16xf32>
    %138 = arith.maximumf %134, %137 : vector<34x16xf32>
    %139 = arith.subf %134, %138 : vector<34x16xf32>
    %140 = math.exp %139 : vector<34x16xf32>
    %141 = arith.subf %137, %138 : vector<34x16xf32>
    %142 = math.exp %141 : vector<34x16xf32>
    %143 = arith.addf %140, %142 : vector<34x16xf32>
    %144 = math.log %143 : vector<34x16xf32>
    %145 = arith.addf %138, %144 : vector<34x16xf32>
    %146 = arith.subf %134, %145 : vector<34x16xf32>
    %147 = arith.addf %131, %146 : vector<34x16xf32>
    %c0_102 = arith.constant 0 : index
    %c0_103 = arith.constant 0 : index
    %148 = vector.load %arg16[%c0_102, %c0_103] : memref<34x16xf32, #tpu.memory_space<vmem>>, vector<34x16xf32>
    tpu.vector_store %arg16[%c0_102, %c0_103], %147 {strides = array<i32>} : memref<34x16xf32, #tpu.memory_space<vmem>>, vector<34x16xf32>,
    %149 = arith.subf %137, %145 : vector<34x16xf32>
    %150 = arith.addf %131, %149 : vector<34x16xf32>
    %c0_104 = arith.constant 0 : index
    %c0_105 = arith.constant 0 : index
    %151 = vector.load %arg17[%c0_104, %c0_105] : memref<34x16xf32, #tpu.memory_space<vmem>>, vector<34x16xf32>
    tpu.vector_store %arg17[%c0_104, %c0_105], %150 {strides = array<i32>} : memref<34x16xf32, #tpu.memory_space<vmem>>, vector<34x16xf32>,
    return
  }
}

</mosaic_0001>

<bundles_post_ra>
// kernel: attention_net_forward.3
= control target key start
LH: loop header
LB: loop body
LE: loop exit
PB: predicated region body
PF: predicated region fallthrough
CT: control target
= control target key end

     0   :  { %v1964_v0 = vmov 0.0   ;;  %vm1965_vm0 = vmmov 0   ;;  %v1966_v3 = vmov 0   ;;  %vm99_vm1 = vcmask 523264   ;;  %s2546_s1 = inlined_call_operand.vmem [shape: bf16[3,64,128], index: 1, kind: input, shape index: {}]   ;;  %s2547_s0 = inlined_call_operand.vmem [shape: f32[36,64], index: 0, kind: input, shape index: {}]   ;;  %s2548_s8 = inlined_call_operand.vmem [shape: f32[34,1], index: 8, kind: input, shape index: {}]   ;;  %s2549_s3 = inlined_call_operand.vmem [shape: f32[128,128], index: 3, kind: input, shape index: {}]   ;;  %s2550_s2 = inlined_call_operand.vmem [shape: bf16[3,128,128], index: 2, kind: input, shape index: {}]   ;;  %s2551_s4 = inlined_call_operand.vmem [shape: f32[1,128], index: 4, kind: input, shape index: {}]   ;;  %s2552_s5 = inlined_call_operand.vmem [shape: f32[1,128], index: 5, kind: input, shape index: {}]   ;;  %s2553_s9 = inlined_call_operand.vmem [shape: f32[36,128], index: 9, kind: output, shape index: {}]   ;;  %s2554_s6 = inlined_call_operand.vmem [shape: f32[1,128], index: 6, kind: input, shape index: {}]   ;;  %s2555_s7 = inlined_call_operand.vmem [shape: f32[1,128], index: 7, kind: input, shape index: {}]  }
   0x1   :  { %1517 = vmatprep.subr.bf16.mxu0 %v1964_v0  ;;  %632 = vst [vmem:[#allocation2] sm:$0x1] %v1964_v0  ;;  %633 = vst [vmem:[#allocation2 + $0x23] sm:$0x1] %v1964_v0  ;;  %v1924_v1 = vld [vmem:[%s2546_s1] sm:$0xff]   ;;  %1525 = vmatprep.mubr.msk.bf16.mxu0 %vm1965_vm0, %v1964_v0  ;;  %v1925_v2 = vld [vmem:[%s2546_s1 + $0x8] sm:$0xff]  }
   0x2   :  { %1497 = vmatprep.subr.bf16.mxu1 %v1964_v0  ;;  %1505 = vmatprep.mubr.msk.bf16.mxu1 %vm1965_vm0, %v1964_v0  ;;  %v1926_v4 = vld [vmem:[%s2546_s1 + $0x10] sm:$0xff]   ;;  %v1929_v5 = vld [vmem:[%s2546_s1 + $0x20] sm:$0xff]   ;;  %v1927_v6 = vld [vmem:[%s2546_s1 + $0x18] sm:$0xff]   ;;  %v1967_v46 = vmov 0.0|0.0   ;;  %vm398_vm2 = vcmask 1041408   ;;  %1271 = vst [vmem:[%s2553_s9] sm:$0x1] %v1964_v0 }
   0x3   :  { %1518 = vmatpush3.bf16.msra.mxu0 %v1924_v1  ;;  %1922 = vset.pattern.permute.xlu0 %v1966_v3  ;;  %v42_v7 = vld [vmem:[%s2547_s0] sm:$0xff]  ;;  %v1931_v8 = vld [vmem:[%s2546_s1 + $0x28] sm:$0xff]   ;;  %v1933_v10 = vld [vmem:[%s2546_s1 + $0x30] sm:$0xff]   ;;  %1272 = vst [vmem:[%s2553_s9 + $0x23] sm:$0x1] %v1964_v0 }
   0x4   :  { %1519 = vmatprep.subr.bf16.mxu0 %v1964_v0  ;;  %1923 = vset.pattern.permute.xlu1 %v1966_v3  ;;  %v43_v9 = vld [vmem:[%s2547_s0 + $0x8] sm:$0xff]  ;;  %v1928_v12 = vld [vmem:[%s2546_s1 + $0x40] sm:$0xff]   ;;  %v1934_v13 = vld [vmem:[%s2546_s1 + $0x38] sm:$0xff]  }
   0x5   :  { %1498 = vmatpush3.bf16.msra.mxu1 %v1929_v5  ;;  %v47_v11 = vpack.c.bf16 %v43_v9, %v42_v7  ;;  %v58_v14 = vld [vmem:[%s2547_s0 + $0x1] sm:$0xff]  ;;  %v59_v15 = vld [vmem:[%s2547_s0 + $0x9] sm:$0xff]  ;;  %v45_v20 = vld [vmem:[%s2547_s0 + $0x18] sm:$0xff] }
   0x6   :  { %1499 = vmatprep.subr.bf16.mxu1 %v1964_v0  ;;  %v37_v16 = vld [vmem:[%s2548_s8] sm:$0xff]  ;;  %v39_v17 = vld [vmem:[%s2548_s8 + $0x10] sm:$0xff]  ;;  %v1930_v18 = vld [vmem:[%s2546_s1 + $0x48] sm:$0xff]   ;;  %v63_v21 = vpack.c.bf16 %v59_v15, %v58_v14 }
   0x7   :  { %1520 = vmatpush3.bf16.msra.mxu0 %v1925_v2  ;;  %v44_v19 = vld [vmem:[%s2547_s0 + $0x10] sm:$0xff]  ;;  %367 = vperm.xlu0 %1922, %v37_v16   ;;  %v38_v23 = vld [vmem:[%s2548_s8 + $0x8] sm:$0xff]  ;;  %v40_v25 = vld [vmem:[%s2548_s8 + $0x18] sm:$0xff] }
   0x8   :  { %1521 = vmatprep.subr.bf16.mxu0 %v1964_v0  ;;  %377 = vperm.xlu1 %1923, %v39_v17   ;;  %v48_v22 = vpack.c.bf16 %v45_v20, %v44_v19  ;;  %v1932_v24 = vld [vmem:[%s2546_s1 + $0x50] sm:$0xff]   ;;  %v61_v27 = vld [vmem:[%s2547_s0 + $0x19] sm:$0xff]  ;;  %v62_v33 = vld [vmem:[%s2547_s0 + $0x21] sm:$0x3] }
   0x9   :  { %1500 = vmatpush3.bf16.msra.mxu1 %v1931_v8  ;;  %v60_v26 = vld [vmem:[%s2547_s0 + $0x11] sm:$0xff]  ;;  %v41_v28 = vld [vmem:[%s2548_s8 + $0x20] sm:$0x3]  ;;  %v254_v34 = vld [vmem:[%s2547_s0 + $0x2] sm:$0xff]  ;;  %v65_v36 = vpack.c.bf16 %v62_v33, %v62_v33 }
   0xa   :  { %1501 = vmatprep.subr.bf16.mxu1 %v1964_v0  ;;  %v46_v29 = vld [vmem:[%s2547_s0 + $0x20] sm:$0x3]  ;;  %v1935_v30 = vld [vmem:[%s2546_s1 + $0x58] sm:$0xff]   ;;  %v64_v31 = vpack.c.bf16 %v61_v27, %v60_v26  ;;  %v255_v35 = vld [vmem:[%s2547_s0 + $0xa] sm:$0xff] }
   0xb   :  { %1522 = vmatpush3.bf16.msra.mxu0 %v1926_v4  ;;  %372 = vperm.xlu0 %1922, %v38_v23   ;;  %v49_v32 = vpack.c.bf16 %v46_v29, %v46_v29  ;;  %v259_v37 = vpack.c.bf16 %v255_v35, %v254_v34  ;;  %v256_v38 = vld [vmem:[%s2547_s0 + $0x12] sm:$0xff]  ;;  %v257_v39 = vld [vmem:[%s2547_s0 + $0x1a] sm:$0xff]  ;;  %v258_v41 = vld [vmem:[%s2547_s0 + $0x22] sm:$0x3] }
   0xc   :  { %1523 = vmatprep.subr.bf16.mxu0 %v1964_v0  ;;  %382 = vperm.xlu1 %1923, %v40_v25   ;;  %v260_v40 = vpack.c.bf16 %v257_v39, %v256_v38  ;;  %v261_v42 = vpack.c.bf16 %v258_v41, %v258_v41  ;;  %v407_v43 = vld [vmem:[%s2549_s3] sm:$0xff]  ;;  %v408_v44 = vld [vmem:[%s2549_s3 + $0x8] sm:$0xff]  ;;  %v409_v47 = vld [vmem:[%s2549_s3 + $0x10] sm:$0xff] }
   0xd   :  { %1502 = vmatpush3.bf16.msra.mxu1 %v1933_v10  ;;  %v2166_v45 = vpack.c.bf16 %v408_v44, %v407_v43  ;;  %v410_v48 = vld [vmem:[%s2549_s3 + $0x18] sm:$0xff]  ;;  %v411_v50 = vld [vmem:[%s2549_s3 + $0x20] sm:$0xff]  ;;  %v412_v51 = vld [vmem:[%s2549_s3 + $0x28] sm:$0xff] }
   0xe   :  { %1503 = vmatprep.subr.bf16.mxu1 %v1964_v0  ;;  %v2177_v49 = vpack.c.bf16 %v410_v48, %v409_v47  ;;  %v2187_v52 = vpack.c.bf16 %v412_v51, %v411_v50  ;;  %v413_v53 = vld [vmem:[%s2549_s3 + $0x30] sm:$0xff]  ;;  %v414_v54 = vld [vmem:[%s2549_s3 + $0x38] sm:$0xff]  ;;  %v415_v56 = vld [vmem:[%s2549_s3 + $0x40] sm:$0xff] }
   0xf   :  { %1524 = vmatpush3.bf16.msra.mxu0 %v1927_v6  ;;  %387 = vperm.xlu0 %1922, %v41_v28   ;;  %v2197_v55 = vpack.c.bf16 %v414_v54, %v413_v53  ;;  %v416_v57 = vld [vmem:[%s2549_s3 + $0x48] sm:$0xff]  ;;  %v417_v59 = vld [vmem:[%s2549_s3 + $0x50] sm:$0xff]  ;;  %v418_v60 = vld [vmem:[%s2549_s3 + $0x58] sm:$0xff] }
  0x10   :  { %1537 = vmatprep.subr.bf16.mxu0 %v1964_v0  ;;  %v2207_v58 = vpack.c.bf16 %v416_v57, %v415_v56  ;;  %v2217_v61 = vpack.c.bf16 %v418_v60, %v417_v59  ;;  %v419_v62 = vld [vmem:[%s2549_s3 + $0x60] sm:$0xff]  ;;  %v420_v63 = vld [vmem:[%s2549_s3 + $0x68] sm:$0xff]  ;;  %v421_v2 = vld [vmem:[%s2549_s3 + $0x70] sm:$0xff] }
  0x11   :  { %1504 = vmatpush3.bf16.msra.mxu1 %v1934_v13  ;;  %v2227_v1 = vpack.c.bf16 %v420_v63, %v419_v62  ;;  %v422_v3 = vld [vmem:[%s2549_s3 + $0x78] sm:$0xff]  ;;  %v494_v62 = vlaneseq }
  0x12   :  { %1526 = vmatmul.mubr.msk.bf16.vlgmr.msra.gmra.mrb[0].mxu0 %vm99_vm1, %v47_v11  ;;  %1781 = vmatprep.subr.bf16.mxu1 %v1967_v46  ;;  %v2237_v4 = vpack.c.bf16 %v422_v3, %v421_v2 }
  0x13   :  { %1538 = vmatpush3.bf16.msra.mxu0 %v1928_v12  ;;  %1529 = vmatprep.mubr.msk.bf16.mxu0 %vm1965_vm0, %v1964_v0  ;;  %v495_v63 = vshrl.u32 %v494_v62, 7 }
  0x14   :  { %1539 = vmatprep.subr.bf16.mxu0 %v1964_v0  ;;  %1506 = vmatmul.mubr.msk.bf16.vlgmr.msra.gmra.mrb[0].mxu1 %vm99_vm1, %v63_v21 }
  0x15   :  { %1509 = vmatprep.mubr.msk.bf16.mxu1 %vm1965_vm0, %v1964_v0  ;;  %1783 = vmatpush3.bf16.msra.mxu1 %v2166_v45  ;;  %v2290_v2 = vsub.s32 0, %v495_v63  ;;  %v33_v63 = vld [vmem:[%s2551_s4] sm:$0x1] }
  0x16   :  { %1784 = vmatprep.subr.bf16.mxu1 %v1967_v46 }
  0x17   :  { %1540 = vmatpush3.bf16.msra.mxu0 %v1930_v18 }
  0x18   :  { %1541 = vmatprep.subr.bf16.mxu0 %v1964_v0 }
  0x19   :  { %1786 = vmatpush3.bf16.msra.mxu1 %v2177_v49 }
  0x1a   :  { %1530 = vmatmul.mubr.msk.bf16.gmra.mrb[4].mxu0 %vm99_vm1, %v48_v22  ;;  %1787 = vmatprep.subr.bf16.mxu1 %v1967_v46 }
  0x1b   :  { %1542 = vmatpush3.bf16.msra.mxu0 %v1932_v24  ;;  %1533 = vmatprep.mubr.msk.bf16.mxu0 %vm1965_vm0, %v1964_v0 }
  0x1c   :  { %1543 = vmatprep.subr.bf16.mxu0 %v1964_v0  ;;  %1510 = vmatmul.mubr.msk.bf16.gmra.mrb[4].mxu1 %vm99_vm1, %v64_v31 }
  0x1d   :  { %1513 = vmatprep.mubr.msk.bf16.mxu1 %vm1965_vm0, %v1964_v0  ;;  %1789 = vmatpush3.bf16.msra.mxu1 %v2187_v52 }
  0x1e   :  { %1790 = vmatprep.subr.bf16.mxu1 %v1967_v46 }
  0x1f   :  { %1544 = vmatpush3.bf16.msra.mxu0 %v1935_v30 }
  0x20   :  { %1627 = vmatprep.subr.bf16.mxu0 %v1964_v0 }
  0x21   :  { %1792 = vmatpush3.bf16.msra.mxu1 %v2197_v55 }
  0x22   :  { %1534 = vmatmul.mubr.msk.bf16.gmra.mrb[8].mxu0 %vm99_vm1, %v49_v32  ;;  %1793 = vmatprep.subr.bf16.mxu1 %v1967_v46 }
  0x23   :  { %1545 = vmatprep.mubr.msk.bf16.mxu0 %vm1965_vm0, %v1964_v0 }
  0x24   :  { %1514 = vmatmul.mubr.msk.bf16.gmra.mrb[8].mxu1 %vm99_vm1, %v65_v36 }
  0x25   :  { %1589 = vmatprep.mubr.msk.f32.mxu1 %vm1965_vm0, %v1964_v0  ;;  %1795 = vmatpush3.bf16.msra.mxu1 %v2207_v58 }
  0x26   :  { %1796 = vmatprep.subr.bf16.mxu1 %v1967_v46 }
  0x29   :  { %1798 = vmatpush3.bf16.msra.mxu1 %v2217_v61 }
  0x2a   :  { %1546 = vmatmul.mubr.msk.bf16.vlgmr.msra.gmra.mrb[0].mxu0 %vm99_vm1, %v259_v37  ;;  %1799 = vmatprep.subr.bf16.mxu1 %v1967_v46 }
  0x2b   :  { %1549 = vmatprep.mubr.msk.bf16.mxu0 %vm1965_vm0, %v1964_v0 }
  0x2d   :  { %1801 = vmatpush3.bf16.msra.mxu1 %v2227_v1 }
  0x2e   :  { %1802 = vmatprep.subr.bf16.mxu1 %v1967_v46 }
  0x31   :  { %1804 = vmatpush3.bf16.msra.mxu1 %v2237_v4 }
  0x32   :  { %1550 = vmatmul.mubr.msk.bf16.gmra.mrb[4].mxu0 %vm99_vm1, %v260_v40  ;;  %1805 = vmatprep.subr.bf16.mxu1 %v1967_v46 }
  0x33   :  { %1553 = vmatprep.mubr.msk.bf16.mxu0 %vm1965_vm0, %v1964_v0 }
  0x3a   :  { %1554 = vmatmul.mubr.msk.bf16.gmra.mrb[8].mxu0 %vm99_vm1, %v261_v42 }
  0x3b   :  { %1643 = vmatprep.mubr.msk.bf16.mxu0 %vm1965_vm0, %v1964_v0 }
  0x86   :  { %v2241_v14 = vpop.permute.xlu0 %367 }
  0x87   :  { %v2249_v25 = vpop.permute.xlu1 %377 }
  0x8a   :  { %v2247_v24 = vpop.permute.xlu0 %372 }
  0x8b   :  { %v2261_v35 = vpop.permute.xlu1 %382 }
  0x8e   :  { %v2267_v42 = vpop.permute.xlu0 %387 }
  0xe7   :  { %v143_v5 = vpop.f32.mrb[0].mxu1 }
  0xe8   :  { %v1507_v6 = vpop.f32.mrb[1].mxu1 }
  0xe9   :  { %v146_v7 = vpop.f32.mrb[2].mxu1 }
  0xea   :  { %v1508_v8 = vpop.f32.mrb[3].mxu1 }
  0xef   :  { %v151_v9 = vpop.f32.mrb[4].mxu1 }
  0xf0   :  { %v1511_v10 = vpop.f32.mrb[5].mxu1 }
  0xf1   :  { %v154_v11 = vpop.f32.mrb[6].mxu1 }
  0xf2   :  { %v1512_v12 = vpop.f32.mrb[7].mxu1 }
  0xf7   :  { %v159_v13 = vpop.f32.mrb[8].mxu1 }
  0xf8   :  { %v1515_v15 = vpop.f32.mrb[9].mxu1 }
  0xf9   :  { %v162_v17 = vpop.f32.mrb[10].mxu1 }
  0xfa   :  { %v1516_v20 = vpop.f32.mrb[11].mxu1 }
  0xfd   :  { %v338_v16 = vpop.f32.mrb[0].mxu0 }
  0xfe   :  { %v2243_v18 = vadd.f32 %v338_v16, %v143_v5  ;;  %v1547_v19 = vpop.f32.mrb[1].mxu0 }
  0xff   :  { %v341_v21 = vpop.f32.mrb[2].mxu0 }
 0x100   :  { %v2245_v22 = vadd.f32 %v341_v21, %v146_v7  ;;  %v1548_v23 = vpop.f32.mrb[3].mxu0  ;;  %v390_v33 = vmul.f32 %v2243_v18, %v2241_v14 }
 0x102   :  { %v391_v29 = vmul.f32 %v2245_v22, %v2247_v24 }
 0x104   :  { %v395_v36 = vadd.f32 %v391_v29, %v390_v33 }
 0x105   :  { %v346_v26 = vpop.f32.mrb[4].mxu0 }
 0x106   :  { %v2251_v27 = vadd.f32 %v346_v26, %v151_v9  ;;  %v1551_v28 = vpop.f32.mrb[5].mxu0 }
 0x107   :  { %v349_v30 = vpop.f32.mrb[6].mxu0 }
 0x108   :  { %v2255_v31 = vadd.f32 %v349_v30, %v154_v11  ;;  %v1552_v32 = vpop.f32.mrb[7].mxu0  ;;  %v392_v34 = vmul.f32 %v2251_v27, %v2249_v25 }
 0x10a   :  { %v396_v37 = vadd.f32 %v395_v36, %v392_v34  ;;  %v393_v38 = vmul.f32 %v2255_v31, %v2261_v35 }
 0x10c   :  { %v397_v48 = vadd.f32 %v396_v37, %v393_v38 }
 0x10d   :  { %v354_v39 = vpop.f32.mrb[8].mxu0 }
 0x10e   :  { %v2265_v40 = vadd.f32 %v354_v39, %v159_v13  ;;  %v1555_v41 = vpop.f32.mrb[9].mxu0 }
 0x10f   :  { %v357_v43 = vpop.f32.mrb[10].mxu0 }
 0x110   :  { %v394_v44 = vmul.f32 %v2265_v40, %v2267_v42  ;;  %v1556_v47 = vpop.f32.mrb[11].mxu0 }
 0x111   :  { %v1937_v47 = vld [vmem:[%s2550_s2 + $0x48] sm:$0xff]  }
 0x112   :  { %v399_v50 = vsel %vm398_vm2, %v394_v44, 0.0  ;;  %v1936_v44 = vld [vmem:[%s2550_s2 + $0x40] sm:$0xff]  }
 0x113   :  { %v400_v51 = vadd.f32 %v399_v50, %v397_v48  ;;  %1628 = vmatpush3.bf16.msra.mxu0 %v1936_v44  ;;  %v1938_v48 = vld [vmem:[%s2550_s2 + $0x50] sm:$0xff]   ;;  %v1939_v50 = vld [vmem:[%s2550_s2 + $0x58] sm:$0xff]  }
 0x114   :  { %1629 = vmatprep.subr.bf16.mxu0 %v1964_v0 }
 0x115   :  { %v401_v53 = vrot.slane %v400_v51, 4 }
 0x117   :  { %v402_v54 = vadd.f32 %v401_v53, %v400_v51  ;;  %1630 = vmatpush3.bf16.msra.mxu0 %v1937_v47  ;;  %v1940_v51 = vld [vmem:[%s2550_s2 + $0x60] sm:$0xff]   ;;  %v1941_v53 = vld [vmem:[%s2550_s2 + $0x68] sm:$0xff]  }
 0x118   :  { %1631 = vmatprep.subr.bf16.mxu0 %v1964_v0  ;;  %v1949_v47 = vld [vmem:[%s2550_s2 + $0x28] sm:$0xff]  }
 0x119   :  { %v403_v56 = vrot.slane %v402_v54, 2 }
 0x11b   :  { %v404_v57 = vadd.f32 %v403_v56, %v402_v54  ;;  %1632 = vmatpush3.bf16.msra.mxu0 %v1938_v48  ;;  %v1942_v54 = vld [vmem:[%s2550_s2 + $0x70] sm:$0xff]   ;;  %v1943_v56 = vld [vmem:[%s2550_s2 + $0x78] sm:$0xff]  }
 0x11c   :  { %1633 = vmatprep.subr.bf16.mxu0 %v1964_v0  ;;  %v1950_v48 = vld [vmem:[%s2550_s2 + $0x30] sm:$0xff]  }
 0x11d   :  { %v405_v59 = vrot.slane %v404_v57, 1 }
 0x11f   :  { %v406_v60 = vadd.f32 %v405_v59, %v404_v57  ;;  %1634 = vmatpush3.bf16.msra.mxu0 %v1939_v50  ;;  %v1951_v50 = vld [vmem:[%s2550_s2 + $0x38] sm:$0xff]  }
 0x120   :  { %1635 = vmatprep.subr.bf16.mxu0 %v1964_v0 }
 0x121   :  { %1590 = vmatmul.mubr.f32.vlgmr.msra.gmra.mrb[12].mxu1 %v406_v60 }
 0x122   :  { %1807 = vmatpush3.bf16.msra.mxu1 %v2166_v45  ;;  %1624 = vmatprep.mubr.msk.f32.mxu1 %vm1965_vm0, %v1964_v0 }
 0x123   :  { %1808 = vmatprep.subr.bf16.mxu1 %v1967_v46  ;;  %1636 = vmatpush3.bf16.msra.mxu0 %v1940_v51 }
 0x124   :  { %1637 = vmatprep.subr.bf16.mxu0 %v1964_v0 }
 0x126   :  { %1810 = vmatpush3.bf16.msra.mxu1 %v2177_v49 }
 0x127   :  { %1811 = vmatprep.subr.bf16.mxu1 %v1967_v46  ;;  %1638 = vmatpush3.bf16.msra.mxu0 %v1941_v53 }
 0x128   :  { %1639 = vmatprep.subr.bf16.mxu0 %v1964_v0 }
 0x12a   :  { %1813 = vmatpush3.bf16.msra.mxu1 %v2187_v52 }
 0x12b   :  { %1814 = vmatprep.subr.bf16.mxu1 %v1967_v46  ;;  %1640 = vmatpush3.bf16.msra.mxu0 %v1942_v54  ;;  %v1952_v54 = vld [vmem:[%s2550_s2 + $0x80] sm:$0xff]  }
 0x12c   :  { %1641 = vmatprep.subr.bf16.mxu0 %v1964_v0 }
 0x12e   :  { %1816 = vmatpush3.bf16.msra.mxu1 %v2197_v55 }
 0x12f   :  { %1817 = vmatprep.subr.bf16.mxu1 %v1967_v46  ;;  %1642 = vmatpush3.bf16.msra.mxu0 %v1943_v56 }
 0x130   :  { %1655 = vmatprep.subr.bf16.mxu0 %v1964_v0 }
 0x132   :  { %1819 = vmatpush3.bf16.msra.mxu1 %v2207_v58 }
 0x133   :  { %1820 = vmatprep.subr.bf16.mxu1 %v1967_v46 }
 0x136   :  { %1822 = vmatpush3.bf16.msra.mxu1 %v2217_v61 }
 0x137   :  { %1823 = vmatprep.subr.bf16.mxu1 %v1967_v46 }
 0x13a   :  { %1825 = vmatpush3.bf16.msra.mxu1 %v2227_v1 }
 0x13b   :  { %1826 = vmatprep.subr.bf16.mxu1 %v1967_v46 }
 0x13e   :  { %1828 = vmatpush3.bf16.msra.mxu1 %v2237_v4 }
 0x13f   :  { %1829 = vmatprep.subr.bf16.mxu1 %v1967_v46 }
 0x1f4   :  { %v489_v3 = vpop.f32.mrb[12].mxu1 }
 0x1f5   :  { %v2292_v5 = vmul.f32 0.001953125, %v489_v3  ;;  %v1591_v6 = vpop.f32.mrb[13].mxu1 }
 0x1f7   :  { %v497_v7 = vrot.slane %v2292_v5, %v2290_v2 }
 0x1f9   :  { %v498_v8 = vsub.f32 %v2243_v18, %v497_v7  ;;  %v499_v9 = vsub.f32 %v2245_v22, %v497_v7  ;;  %v500_v10 = vsub.f32 %v2251_v27, %v497_v7  ;;  %v501_v11 = vsub.f32 %v2255_v31, %v497_v7 }
 0x1fa   :  { %v502_v12 = vsub.f32 %v2265_v40, %v497_v7  ;;  %v34_v7 = vld [vmem:[%s2552_s5] sm:$0x1] }
 0x1fb   :  { %v503_v13 = vmul.f32 %v498_v8, %v2241_v14  ;;  %v504_v15 = vmul.f32 %v499_v9, %v2247_v24  ;;  %v505_v16 = vmul.f32 %v500_v10, %v2249_v25  ;;  %v506_v19 = vmul.f32 %v501_v11, %v2261_v35 }
 0x1fc   :  { %v507_v17 = vmul.f32 %v502_v12, %v2267_v42 }
 0x1fd   :  { %v508_v20 = vmul.f32 %v503_v13, %v503_v13  ;;  %v509_v21 = vmul.f32 %v504_v15, %v504_v15  ;;  %v510_v23 = vmul.f32 %v505_v16, %v505_v16  ;;  %v511_v29 = vmul.f32 %v506_v19, %v506_v19 }
 0x1fe   :  { %v512_v28 = vmul.f32 %v507_v17, %v507_v17 }
 0x1ff   :  { %v513_v26 = vadd.f32 %v509_v21, %v508_v20 }
 0x200   :  { %v516_v33 = vsel %vm398_vm2, %v512_v28, 0.0 }
 0x201   :  { %v514_v30 = vadd.f32 %v513_v26, %v510_v23 }
 0x203   :  { %v515_v32 = vadd.f32 %v514_v30, %v511_v29 }
 0x205   :  { %v517_v34 = vadd.f32 %v516_v33, %v515_v32  ;;  %v1944_v33 = vld [vmem:[%s2550_s2] sm:$0xff]  }
 0x207   :  { %v518_v36 = vrot.slane %v517_v34, 4 }
 0x209   :  { %v519_v37 = vadd.f32 %v518_v36, %v517_v34  ;;  %v1945_v36 = vld [vmem:[%s2550_s2 + $0x8] sm:$0xff]  }
 0x20b   :  { %v520_v38 = vrot.slane %v519_v37, 2 }
 0x20d   :  { %v521_v39 = vadd.f32 %v520_v38, %v519_v37  ;;  %v1946_v37 = vld [vmem:[%s2550_s2 + $0x10] sm:$0xff]  }
 0x20f   :  { %v522_v41 = vrot.slane %v521_v39, 1 }
 0x211   :  { %v523_v43 = vadd.f32 %v522_v41, %v521_v39  ;;  %v1947_v39 = vld [vmem:[%s2550_s2 + $0x18] sm:$0xff]  }
 0x213   :  { %1625 = vmatmul.mubr.f32.vlgmr.msra.gmra.mrb[14].mxu1 %v523_v43  ;;  %v1948_v43 = vld [vmem:[%s2550_s2 + $0x20] sm:$0xff]  }
 0x214   :  { %1831 = vmatpush3.bf16.msra.mxu1 %v2166_v45  ;;  %1743 = vmatprep.mubr.msk.f32.mxu1 %vm1965_vm0, %v1964_v0 }
 0x215   :  { %1832 = vmatprep.subr.bf16.mxu1 %v1967_v46 }
 0x218   :  { %1834 = vmatpush3.bf16.msra.mxu1 %v2177_v49 }
 0x219   :  { %1835 = vmatprep.subr.bf16.mxu1 %v1967_v46 }
 0x21c   :  { %1837 = vmatpush3.bf16.msra.mxu1 %v2187_v52 }
 0x21d   :  { %1838 = vmatprep.subr.bf16.mxu1 %v1967_v46 }
 0x220   :  { %1840 = vmatpush3.bf16.msra.mxu1 %v2197_v55 }
 0x221   :  { %1841 = vmatprep.subr.bf16.mxu1 %v1967_v46 }
 0x224   :  { %1843 = vmatpush3.bf16.msra.mxu1 %v2207_v58 }
 0x225   :  { %1844 = vmatprep.subr.bf16.mxu1 %v1967_v46 }
 0x228   :  { %1846 = vmatpush3.bf16.msra.mxu1 %v2217_v61 }
 0x229   :  { %1847 = vmatprep.subr.bf16.mxu1 %v1967_v46 }
 0x22c   :  { %1849 = vmatpush3.bf16.msra.mxu1 %v2227_v1 }
 0x22d   :  { %1850 = vmatprep.subr.bf16.mxu1 %v1967_v46 }
 0x230   :  { %1852 = vmatpush3.bf16.msra.mxu1 %v2237_v4 }
 0x231   :  { %1853 = vmatprep.subr.bf16.mxu1 %v1967_v46 }
 0x2e6   :  { %v590_v57 = vpop.f32.mrb[14].mxu1 }
 0x2e7   :  { %v594_v59 = vmul.f32 0.001953125, %v590_v57  ;;  %v1626_v60 = vpop.f32.mrb[15].mxu1  ;;  %v1953_v57 = vld [vmem:[%s2550_s2 + $0x88] sm:$0xff]  }
 0x2e9   :  { %v595_v62 = vadd.f32 1e-05, %v594_v59 }
 0x2eb   :  { %1960 = vrsqrt.f32 %v595_v62  ;;  %v1954_v62 = vld [vmem:[%s2550_s2 + $0x90] sm:$0xff]  }
 0x2f5   :  { %v1961_v3 = vpop.eup %1960 }
 0x2f6   :  { %v597_v6 = vmul.f32 %v1961_v3, %v33_v63  ;;  %v1955_v3 = vld [vmem:[%s2550_s2 + $0x98] sm:$0xff]  }
 0x2f8   :  { %v598_v8 = vmul.f32 %v597_v6, %v2292_v5  ;;  %v604_v9 = vrot.slane %v597_v6, %v2290_v2 }
 0x2fa   :  { %v599_v10 = vsub.f32 %v34_v7, %v598_v8  ;;  %v606_v11 = vmul.f32 %v2243_v18, %v604_v9  ;;  %v607_v12 = vmul.f32 %v2245_v22, %v604_v9  ;;  %v608_v13 = vmul.f32 %v2251_v27, %v604_v9  ;;  %v1956_v7 = vld [vmem:[%s2550_s2 + $0xa0] sm:$0xff]  }
 0x2fb   :  { %v609_v15 = vmul.f32 %v2255_v31, %v604_v9  ;;  %v610_v17 = vmul.f32 %v2265_v40, %v604_v9  ;;  %v1957_v9 = vld [vmem:[%s2550_s2 + $0xa8] sm:$0xff]  }
 0x2fc   :  { %v615_v16 = vrot.slane %v599_v10, %v2290_v2  ;;  %v1958_v10 = vld [vmem:[%s2550_s2 + $0xb0] sm:$0xff]  }
 0x2fe   :  { %v617_v19 = vadd.f32 %v615_v16, %v606_v11  ;;  %v618_v20 = vadd.f32 %v615_v16, %v607_v12  ;;  %v619_v21 = vadd.f32 %v615_v16, %v608_v13  ;;  %v620_v23 = vadd.f32 %v615_v16, %v609_v15  ;;  %v1959_v11 = vld [vmem:[%s2550_s2 + $0xb8] sm:$0xff]  }
 0x2ff   :  { %v621_v5 = vadd.f32 %v615_v16, %v610_v17 }
 0x300   :  { %v622_v26 = vmax.f32 %v617_v19, 0.0  ;;  %v623_v28 = vmax.f32 %v618_v20, 0.0  ;;  %v624_v29 = vmax.f32 %v619_v21, 0.0  ;;  %v625_v30 = vmax.f32 %v620_v23, 0.0 }
 0x301   :  { %v626_v18 = vmax.f32 %v621_v5, 0.0 }
 0x302   :  { %v627_v22 = vmul.f32 %v622_v26, %v2241_v14  ;;  %v628_v27 = vmul.f32 %v623_v28, %v2247_v24  ;;  %v629_v31 = vmul.f32 %v624_v29, %v2249_v25  ;;  %v630_v32 = vmul.f32 %v625_v30, %v2261_v35 }
 0x303   :  { %v631_v40 = vmul.f32 %v626_v18, %v2267_v42 }
 0x304   :  { %634 = vst [vmem:[#allocation2 + $0x1] sm:$0xff] %v627_v22  ;;  %635 = vst [vmem:[#allocation2 + $0x9] sm:$0xff] %v628_v27  ;;  %v668_v34 = vpack.c.bf16 %v628_v27, %v627_v22  ;;  %v669_v38 = vpack.c.bf16 %v630_v32, %v629_v31 }
 0x305   :  { %636 = vst [vmem:[#allocation2 + $0x11] sm:$0xff] %v629_v31  ;;  %637 = vst [vmem:[#allocation2 + $0x19] sm:$0xff] %v630_v32 }
 0x306   :  { %638 = vst [vmem:[#allocation2 + $0x21] sm:$0x3] %v631_v40  ;;  %1644 = vmatmul.mubr.bf16.vlgmr.msra.gmra.mrb[12].mxu0 %v668_v34 }
 0x307   :  { %1656 = vmatpush3.bf16.msra.mxu0 %v1944_v33  ;;  %1647 = vmatprep.mubr.msk.bf16.mxu0 %vm1965_vm0, %v1964_v0 }
 0x308   :  { %1657 = vmatprep.subr.bf16.mxu0 %v1964_v0 }
 0x30b   :  { %1658 = vmatpush3.bf16.msra.mxu0 %v1945_v36  ;;  %v639_v51 = vld [vmem:[#allocation2] sm:$0xff]  ;;  %v640_v53 = vld [vmem:[#allocation2 + $0x8] sm:$0xff] }
 0x30c   :  { %1659 = vmatprep.subr.bf16.mxu0 %v1964_v0  ;;  %v644_v56 = vpack.c.bf16 %v640_v53, %v639_v51  ;;  %v641_v59 = vld [vmem:[#allocation2 + $0x10] sm:$0xff]  ;;  %v642_v60 = vld [vmem:[#allocation2 + $0x18] sm:$0xff]  ;;  %v896_v12 = vld [vmem:[#allocation2 + $0x2] sm:$0xff] }
 0x30d   :  { %v667_v41 = vld [vmem:[#allocation2 + $0x21] sm:$0x3]  ;;  %v645_v63 = vpack.c.bf16 %v642_v60, %v641_v59  ;;  %v897_v13 = vld [vmem:[#allocation2 + $0xa] sm:$0xff]  ;;  %v898_v16 = vld [vmem:[#allocation2 + $0x12] sm:$0xff] }
 0x30e   :  { %1648 = vmatmul.mubr.bf16.gmra.mrb[16].mxu0 %v669_v38  ;;  %v670_v44 = vpack.c.bf16 %v667_v41, %v667_v41  ;;  %v643_v6 = vld [vmem:[#allocation2 + $0x20] sm:$0x3]  ;;  %v901_v15 = vpack.c.bf16 %v897_v13, %v896_v12  ;;  %v900_v20 = vld [vmem:[#allocation2 + $0x22] sm:$0x3] }
 0x30f   :  { %1660 = vmatpush3.bf16.msra.mxu0 %v1946_v37  ;;  %1651 = vmatprep.mubr.msk.bf16.mxu0 %vm1965_vm0, %v1964_v0  ;;  %v646_v8 = vpack.c.bf16 %v643_v6, %v643_v6  ;;  %v899_v17 = vld [vmem:[#allocation2 + $0x1a] sm:$0xff]  ;;  %v903_v21 = vpack.c.bf16 %v900_v20, %v900_v20 }
 0x310   :  { %1661 = vmatprep.subr.bf16.mxu0 %v1964_v0  ;;  %v902_v19 = vpack.c.bf16 %v899_v17, %v898_v16 }
 0x313   :  { %1662 = vmatpush3.bf16.msra.mxu0 %v1947_v39 }
 0x314   :  { %1663 = vmatprep.subr.bf16.mxu0 %v1964_v0 }
 0x316   :  { %1652 = vmatmul.mubr.bf16.gmra.mrb[20].mxu0 %v670_v44 }
 0x317   :  { %1664 = vmatpush3.bf16.msra.mxu0 %v1948_v43  ;;  %1671 = vmatprep.mubr.msk.bf16.mxu0 %vm1965_vm0, %v1964_v0 }
 0x318   :  { %1665 = vmatprep.subr.bf16.mxu0 %v1964_v0 }
 0x31b   :  { %1666 = vmatpush3.bf16.msra.mxu0 %v1949_v47 }
 0x31c   :  { %1667 = vmatprep.subr.bf16.mxu0 %v1964_v0 }
 0x31f   :  { %1668 = vmatpush3.bf16.msra.mxu0 %v1950_v48 }
 0x320   :  { %1669 = vmatprep.subr.bf16.mxu0 %v1964_v0 }
 0x323   :  { %1670 = vmatpush3.bf16.msra.mxu0 %v1951_v50 }
 0x324   :  { %1683 = vmatprep.subr.bf16.mxu0 %v1964_v0 }
 0x326   :  { %1672 = vmatmul.mubr.bf16.vlgmr.msra.gmra.mrb[12].mxu0 %v644_v56 }
 0x327   :  { %1684 = vmatpush3.bf16.msra.mxu0 %v1952_v54  ;;  %1675 = vmatprep.mubr.msk.bf16.mxu0 %vm1965_vm0, %v1964_v0 }
 0x328   :  { %1685 = vmatprep.subr.bf16.mxu0 %v1964_v0 }
 0x32b   :  { %1686 = vmatpush3.bf16.msra.mxu0 %v1953_v57 }
 0x32c   :  { %1687 = vmatprep.subr.bf16.mxu0 %v1964_v0 }
 0x32e   :  { %1676 = vmatmul.mubr.bf16.gmra.mrb[16].mxu0 %v645_v63 }
 0x32f   :  { %1688 = vmatpush3.bf16.msra.mxu0 %v1954_v62  ;;  %1679 = vmatprep.mubr.msk.bf16.mxu0 %vm1965_vm0, %v1964_v0 }
 0x330   :  { %1689 = vmatprep.subr.bf16.mxu0 %v1964_v0 }
 0x333   :  { %1690 = vmatpush3.bf16.msra.mxu0 %v1955_v3 }
 0x334   :  { %1691 = vmatprep.subr.bf16.mxu0 %v1964_v0 }
 0x336   :  { %1680 = vmatmul.mubr.bf16.gmra.mrb[20].mxu0 %v646_v8 }
 0x337   :  { %1692 = vmatpush3.bf16.msra.mxu0 %v1956_v7  ;;  %1699 = vmatprep.mubr.msk.bf16.mxu0 %vm1965_vm0, %v1964_v0 }
 0x338   :  { %1693 = vmatprep.subr.bf16.mxu0 %v1964_v0 }
 0x33b   :  { %1694 = vmatpush3.bf16.msra.mxu0 %v1957_v9 }
 0x33c   :  { %1695 = vmatprep.subr.bf16.mxu0 %v1964_v0 }
 0x33f   :  { %1696 = vmatpush3.bf16.msra.mxu0 %v1958_v10 }
 0x340   :  { %1697 = vmatprep.subr.bf16.mxu0 %v1964_v0 }
 0x343   :  { %1698 = vmatpush3.bf16.msra.mxu0 %v1959_v11 }
 0x346   :  { %1700 = vmatmul.mubr.bf16.vlgmr.msra.gmra.mrb[12].mxu0 %v901_v15 }
 0x347   :  { %1703 = vmatprep.mubr.msk.bf16.mxu0 %vm1965_vm0, %v1964_v0 }
 0x34e   :  { %1704 = vmatmul.mubr.bf16.gmra.mrb[16].mxu0 %v902_v19 }
 0x34f   :  { %1707 = vmatprep.mubr.msk.bf16.mxu0 %vm1965_vm0, %v1964_v0 }
 0x356   :  { %1708 = vmatmul.mubr.bf16.gmra.mrb[20].mxu0 %v903_v21 }
 0x419   :  { %v2455_v23 = vpop.f32.mrb[12].mxu0 }
 0x41a   :  { %v1701_v5 = vpop.f32.mrb[13].mxu0  ;;  %v1030_v28 = vmul.f32 %v2455_v23, %v2241_v14 }
 0x41b   :  { %v2457_v26 = vpop.f32.mrb[14].mxu0 }
 0x41c   :  { %v1031_v29 = vmul.f32 %v2457_v26, %v2247_v24  ;;  %v1702_v30 = vpop.f32.mrb[15].mxu0 }
 0x41e   :  { %v1035_v18 = vadd.f32 %v1031_v29, %v1030_v28 }
 0x421   :  { %v2463_v22 = vpop.f32.mrb[16].mxu0 }
 0x422   :  { %v1032_v27 = vmul.f32 %v2463_v22, %v2249_v25  ;;  %v1705_v31 = vpop.f32.mrb[17].mxu0 }
 0x423   :  { %v2467_v32 = vpop.f32.mrb[18].mxu0 }
 0x424   :  { %v1036_v40 = vadd.f32 %v1035_v18, %v1032_v27  ;;  %v1033_v33 = vmul.f32 %v2467_v32, %v2261_v35  ;;  %v1706_v34 = vpop.f32.mrb[19].mxu0  ;;  %v35_v18 = vld [vmem:[%s2554_s6] sm:$0x1] }
 0x426   :  { %v1037_v36 = vadd.f32 %v1036_v40, %v1033_v33  ;;  %v36_v40 = vld [vmem:[%s2555_s7] sm:$0x1] }
 0x429   :  { %v2471_v37 = vpop.f32.mrb[20].mxu0 }
 0x42a   :  { %v1034_v38 = vmul.f32 %v2471_v37, %v2267_v42  ;;  %v1709_v39 = vpop.f32.mrb[21].mxu0 }
 0x42b   :  { %v1022_v41 = vpop.f32.mrb[22].mxu0 }
 0x42c   :  { %v1038_v43 = vsel %vm398_vm2, %v1034_v38, 0.0  ;;  %v1710_v44 = vpop.f32.mrb[23].mxu0 }
 0x42d   :  { %v1039_v47 = vadd.f32 %v1038_v43, %v1037_v36 }
 0x42f   :  { %v1040_v48 = vrot.slane %v1039_v47, 4 }
 0x431   :  { %v1041_v50 = vadd.f32 %v1040_v48, %v1039_v47 }
 0x433   :  { %v1042_v51 = vrot.slane %v1041_v50, 2 }
 0x435   :  { %v1043_v53 = vadd.f32 %v1042_v51, %v1041_v50 }
 0x437   :  { %v1044_v54 = vrot.slane %v1043_v53, 1 }
 0x439   :  { %v1045_v56 = vadd.f32 %v1044_v54, %v1043_v53 }
 0x43b   :  { %1744 = vmatmul.mubr.f32.vlgmr.msra.gmra.mrb[16].mxu1 %v1045_v56 }
 0x43c   :  { %1855 = vmatpush3.bf16.msra.mxu1 %v2166_v45  ;;  %1778 = vmatprep.mubr.msk.f32.mxu1 %vm1965_vm0, %v1964_v0 }
 0x43d   :  { %1856 = vmatprep.subr.bf16.mxu1 %v1967_v46 }
 0x440   :  { %1858 = vmatpush3.bf16.msra.mxu1 %v2177_v49 }
 0x441   :  { %1859 = vmatprep.subr.bf16.mxu1 %v1967_v46 }
 0x444   :  { %1861 = vmatpush3.bf16.msra.mxu1 %v2187_v52 }
 0x445   :  { %1862 = vmatprep.subr.bf16.mxu1 %v1967_v46 }
 0x448   :  { %1864 = vmatpush3.bf16.msra.mxu1 %v2197_v55 }
 0x449   :  { %1865 = vmatprep.subr.bf16.mxu1 %v1967_v46 }
 0x44c   :  { %1867 = vmatpush3.bf16.msra.mxu1 %v2207_v58 }
 0x44d   :  { %1868 = vmatprep.subr.bf16.mxu1 %v1967_v46 }
 0x450   :  { %1870 = vmatpush3.bf16.msra.mxu1 %v2217_v61 }
 0x451   :  { %1871 = vmatprep.subr.bf16.mxu1 %v1967_v46 }
 0x454   :  { %1873 = vmatpush3.bf16.msra.mxu1 %v2227_v1 }
 0x455   :  { %1874 = vmatprep.subr.bf16.mxu1 %v1967_v46 }
 0x458   :  { %1876 = vmatpush3.bf16.msra.mxu1 %v2237_v4 }
 0x50e   :  { %v1128_v45 = vpop.f32.mrb[16].mxu1 }
 0x50f   :  { %v1132_v49 = vmul.f32 0.001953125, %v1128_v45  ;;  %v1745_v52 = vpop.f32.mrb[17].mxu1 }
 0x511   :  { %v1136_v55 = vrot.slane %v1132_v49, %v2290_v2 }
 0x513   :  { %v1137_v58 = vsub.f32 %v2455_v23, %v1136_v55  ;;  %v1138_v46 = vsub.f32 %v2457_v26, %v1136_v55  ;;  %v1139_v61 = vsub.f32 %v2463_v22, %v1136_v55  ;;  %v1140_v1 = vsub.f32 %v2467_v32, %v1136_v55 }
 0x514   :  { %v1141_v4 = vsub.f32 %v2471_v37, %v1136_v55 }
 0x515   :  { %v1142_v57 = vmul.f32 %v1137_v58, %v2241_v14  ;;  %v1143_v59 = vmul.f32 %v1138_v46, %v2247_v24  ;;  %v1144_v0 = vmul.f32 %v1139_v61, %v2249_v25  ;;  %v1145_v62 = vmul.f32 %v1140_v1, %v2261_v35 }
 0x516   :  { %v1146_v60 = vmul.f32 %v1141_v4, %v2267_v42 }
 0x517   :  { %v1147_v63 = vmul.f32 %v1142_v57, %v1142_v57  ;;  %v1148_v3 = vmul.f32 %v1143_v59, %v1143_v59  ;;  %v1149_v6 = vmul.f32 %v1144_v0, %v1144_v0  ;;  %v1150_v9 = vmul.f32 %v1145_v62, %v1145_v62 }
 0x518   :  { %v1151_v8 = vmul.f32 %v1146_v60, %v1146_v60 }
 0x519   :  { %v1152_v7 = vadd.f32 %v1148_v3, %v1147_v63 }
 0x51a   :  { %v1155_v12 = vsel %vm398_vm2, %v1151_v8, 0.0 }
 0x51b   :  { %v1153_v10 = vadd.f32 %v1152_v7, %v1149_v6 }
 0x51d   :  { %v1154_v11 = vadd.f32 %v1153_v10, %v1150_v9 }
 0x51f   :  { %v1156_v13 = vadd.f32 %v1155_v12, %v1154_v11 }
 0x521   :  { %v1157_v15 = vrot.slane %v1156_v13, 4 }
 0x523   :  { %v1158_v16 = vadd.f32 %v1157_v15, %v1156_v13 }
 0x525   :  { %v1159_v17 = vrot.slane %v1158_v16, 2 }
 0x527   :  { %v1160_v19 = vadd.f32 %v1159_v17, %v1158_v16 }
 0x529   :  { %v1161_v20 = vrot.slane %v1160_v19, 1 }
 0x52b   :  { %v1162_v21 = vadd.f32 %v1161_v20, %v1160_v19 }
 0x52d   :  { %1779 = vmatmul.mubr.f32.vlgmr.msra.gmra.mrb[18].mxu1 %v1162_v21 }
 0x600   :  { %v1229_v5 = vpop.f32.mrb[18].mxu1 }
 0x601   :  { %v1233_v28 = vmul.f32 0.001953125, %v1229_v5  ;;  %v1780_v29 = vpop.f32.mrb[19].mxu1 }
 0x603   :  { %v1234_v30 = vadd.f32 1e-05, %v1233_v28 }
 0x605   :  { %1962 = vrsqrt.f32 %v1234_v30 }
 0x60f   :  { %v1963_v27 = vpop.eup %1962 }
 0x610   :  { %v1236_v31 = vmul.f32 %v1963_v27, %v35_v18 }
 0x612   :  { %v1237_v33 = vmul.f32 %v1236_v31, %v1132_v49  ;;  %v1243_v34 = vrot.slane %v1236_v31, %v2290_v2 }
 0x614   :  { %v1238_v36 = vsub.f32 %v36_v40, %v1237_v33  ;;  %v1245_v38 = vmul.f32 %v1243_v34, %v2455_v23  ;;  %v1246_v39 = vmul.f32 %v1243_v34, %v2457_v26  ;;  %v1247_v41 = vmul.f32 %v1243_v34, %v2463_v22 }
 0x615   :  { %v1248_v43 = vmul.f32 %v1243_v34, %v2467_v32  ;;  %v1249_v44 = vmul.f32 %v1243_v34, %v2471_v37 }
 0x616   :  { %v1254_v47 = vrot.slane %v1238_v36, %v2290_v2 }
 0x618   :  { %v1256_v48 = vadd.f32 %v1254_v47, %v1245_v38  ;;  %v1257_v50 = vadd.f32 %v1254_v47, %v1246_v39  ;;  %v1258_v51 = vadd.f32 %v1254_v47, %v1247_v41  ;;  %v1259_v53 = vadd.f32 %v1254_v47, %v1248_v43 }
 0x619   :  { %v1260_v54 = vadd.f32 %v1254_v47, %v1249_v44 }
 0x61a   :  { %v1261_v56 = vmax.f32 %v1256_v48, 0.0  ;;  %v1262_v45 = vmax.f32 %v1257_v50, 0.0  ;;  %v1263_v49 = vmax.f32 %v1258_v51, 0.0  ;;  %v1264_v52 = vmax.f32 %v1259_v53, 0.0 }
 0x61b   :  { %v1265_v23 = vmax.f32 %v1260_v54, 0.0 }
 0x61c   :  { %v1266_v26 = vmul.f32 %v1261_v56, %v2241_v14  ;;  %v1267_v22 = vmul.f32 %v1262_v45, %v2247_v24  ;;  %v1268_v32 = vmul.f32 %v1263_v49, %v2249_v25  ;;  %v1269_v37 = vmul.f32 %v1264_v52, %v2261_v35 }
 0x61d   :  { %v1270_v2 = vmul.f32 %v1265_v23, %v2267_v42 }
 0x61e   :  { %1273 = vst [vmem:[%s2553_s9 + $0x1] sm:$0xff] %v1266_v26  ;;  %1274 = vst [vmem:[%s2553_s9 + $0x9] sm:$0xff] %v1267_v22 }
 0x61f   :  { %1275 = vst [vmem:[%s2553_s9 + $0x11] sm:$0xff] %v1268_v32  ;;  %1276 = vst [vmem:[%s2553_s9 + $0x19] sm:$0xff] %v1269_v37 }
 0x620   :  { %1277 = vst [vmem:[%s2553_s9 + $0x21] sm:$0x3] %v1270_v2 }

// kernel: attention_net_forward.4
= control target key start
LH: loop header
LB: loop body
LE: loop exit
PB: predicated region body
PF: predicated region fallthrough
CT: control target
= control target key end

     0   :  { %v2103_v1 = vmov 0   ;;  %v2104_v3 = vmov 0.0|0.0   ;;  %vm99_vm0 = vcmask 523264   ;;  %vm2105_vm1 = vmmov 0   ;;  %s2615_s1 = inlined_call_operand.vmem [shape: bf16[3,64,128], index: 1, kind: input, shape index: {}]   ;;  %s2616_s0 = inlined_call_operand.vmem [shape: f32[20,64], index: 0, kind: input, shape index: {}]   ;;  %s2617_s8 = inlined_call_operand.vmem [shape: f32[18,1], index: 8, kind: input, shape index: {}]   ;;  %s2618_s3 = inlined_call_operand.vmem [shape: f32[128,128], index: 3, kind: input, shape index: {}]   ;;  %s2619_s2 = inlined_call_operand.vmem [shape: bf16[3,128,128], index: 2, kind: input, shape index: {}]   ;;  %s2620_s4 = inlined_call_operand.vmem [shape: f32[1,128], index: 4, kind: input, shape index: {}]   ;;  %s2621_s5 = inlined_call_operand.vmem [shape: f32[1,128], index: 5, kind: input, shape index: {}]   ;;  %s2622_s9 = inlined_call_operand.vmem [shape: bf16[2,128,128], index: 9, kind: input, shape index: {}]   ;;  %s2623_s6 = inlined_call_operand.vmem [shape: f32[1,128], index: 6, kind: input, shape index: {}]   ;;  %s2624_s7 = inlined_call_operand.vmem [shape: f32[1,128], index: 7, kind: input, shape index: {}]   ;;  %s2625_s10 = inlined_call_operand.vmem [shape: f32[1,128], index: 10, kind: input, shape index: {}]   ;;  %s2626_s11 = inlined_call_operand.vmem [shape: f32[18,128], index: 11, kind: output, shape index: {0}]   ;;  %s2627_s12 = inlined_call_operand.vmem [shape: f32[18,128], index: 12, kind: output, shape index: {1}]  }
   0x1   :  { %v2047_v0 = vld [vmem:[%s2615_s1 + $0x20] sm:$0xff]   ;;  %2045 = vset.pattern.permute.xlu0 %v2103_v1  ;;  %2046 = vset.pattern.permute.xlu1 %v2103_v1  ;;  %v2048_v2 = vld [vmem:[%s2615_s1 + $0x28] sm:$0xff]   ;;  %v2049_v4 = vld [vmem:[%s2615_s1 + $0x30] sm:$0xff]   ;;  %v2106_v53 = vmov 0.0   ;;  %vm346_vm2 = vcmask 1041408  }
   0x2   :  { %1929 = vmatprep.subr.bf16.mxu1 %v2104_v3  ;;  %1653 = vmatprep.subr.bf16.mxu0 %v2047_v0  ;;  %v61_v5 = vld [vmem:[%s2616_s0 + $0x1] sm:$0xff]  ;;  %v62_v6 = vld [vmem:[%s2616_s0 + $0x9] sm:$0xff]  ;;  %v2050_v8 = vld [vmem:[%s2615_s1 + $0x38] sm:$0xff]   ;;  %564 = vst [vmem:[#allocation2] sm:$0x1] %v2106_v53 }
   0x3   :  { %1654 = vmatpush3.bf16.msra.mxu0 %v2047_v0  ;;  %v64_v7 = vpack.c.bf16 %v62_v6, %v61_v5  ;;  %v2051_v9 = vld [vmem:[%s2615_s1] sm:$0xff]   ;;  %v63_v10 = vld [vmem:[%s2616_s0 + $0x11] sm:$0x3]  ;;  %v49_v12 = vld [vmem:[%s2616_s0 + $0x8] sm:$0xff]  ;;  %1721 = vmatprep.mubr.msk.f32.mxu1 %vm2105_vm1, %v2106_v53  ;;  %565 = vst [vmem:[#allocation2 + $0x13] sm:$0x1] %v2106_v53 }
   0x4   :  { %1655 = vmatprep.subr.bf16.mxu0 %v2048_v2  ;;  %v48_v11 = vld [vmem:[%s2616_s0] sm:$0xff]  ;;  %v65_v13 = vpack.c.bf16 %v63_v10, %v63_v10  ;;  %v47_v16 = vld [vmem:[%s2617_s8 + $0x10] sm:$0x3]  ;;  %v2052_v17 = vld [vmem:[%s2615_s1 + $0x8] sm:$0xff]  }
   0x5   :  { %1661 = vmatprep.mubr.msk.bf16.mxu0 %vm99_vm0, %v64_v7  ;;  %v51_v14 = vpack.c.bf16 %v49_v12, %v48_v11  ;;  %v45_v15 = vld [vmem:[%s2617_s8] sm:$0xff]  ;;  %v356_v19 = vld [vmem:[%s2618_s3 + $0x8] sm:$0xff]  ;;  %339 = vperm.xlu1 %2046, %v47_v16   ;;  %v357_v22 = vld [vmem:[%s2618_s3 + $0x10] sm:$0xff] }
   0x6   :  { %329 = vperm.xlu0 %2045, %v45_v15   ;;  %v355_v18 = vld [vmem:[%s2618_s3] sm:$0xff]  ;;  %v46_v20 = vld [vmem:[%s2617_s8 + $0x8] sm:$0xff]  ;;  %v358_v23 = vld [vmem:[%s2618_s3 + $0x18] sm:$0xff] }
   0x7   :  { %1656 = vmatpush3.bf16.msra.mxu0 %v2048_v2  ;;  %v2222_v21 = vpack.c.bf16 %v356_v19, %v355_v18  ;;  %v2053_v24 = vld [vmem:[%s2615_s1 + $0x10] sm:$0xff]   ;;  %v2236_v25 = vpack.c.bf16 %v358_v23, %v357_v22  ;;  %v359_v26 = vld [vmem:[%s2618_s3 + $0x20] sm:$0xff]  ;;  %v360_v27 = vld [vmem:[%s2618_s3 + $0x28] sm:$0xff] }
   0x8   :  { %1657 = vmatprep.subr.bf16.mxu0 %v2049_v4  ;;  %v2054_v28 = vld [vmem:[%s2615_s1 + $0x18] sm:$0xff]   ;;  %v2249_v29 = vpack.c.bf16 %v360_v27, %v359_v26  ;;  %v50_v30 = vld [vmem:[%s2616_s0 + $0x10] sm:$0x3]  ;;  %v2055_v31 = vld [vmem:[%s2615_s1 + $0x40] sm:$0xff]  }
   0x9   :  { %1931 = vmatpush3.bf16.msra.mxu1 %v2222_v21  ;;  %v232_v32 = vld [vmem:[%s2616_s0 + $0x2] sm:$0xff]  ;;  %v233_v33 = vld [vmem:[%s2616_s0 + $0xa] sm:$0xff]  ;;  %v52_v34 = vpack.c.bf16 %v50_v30, %v50_v30  ;;  %v2058_v38 = vld [vmem:[%s2615_s1 + $0x58] sm:$0xff]  }
   0xa   :  { %334 = vperm.xlu0 %2045, %v46_v20   ;;  %1932 = vmatprep.subr.bf16.mxu1 %v2104_v3  ;;  %v235_v35 = vpack.c.bf16 %v233_v33, %v232_v32  ;;  %v2056_v36 = vld [vmem:[%s2615_s1 + $0x48] sm:$0xff]   ;;  %v2057_v37 = vld [vmem:[%s2615_s1 + $0x50] sm:$0xff]   ;;  %v362_v42 = vld [vmem:[%s2618_s3 + $0x38] sm:$0xff] }
   0xb   :  { %1658 = vmatpush3.bf16.msra.mxu0 %v2049_v4  ;;  %v234_v39 = vld [vmem:[%s2616_s0 + $0x12] sm:$0x3]  ;;  %v363_v44 = vld [vmem:[%s2618_s3 + $0x40] sm:$0xff]  ;;  %v364_v45 = vld [vmem:[%s2618_s3 + $0x48] sm:$0xff] }
   0xc   :  { %1659 = vmatprep.subr.bf16.mxu0 %v2050_v8  ;;  %v236_v40 = vpack.c.bf16 %v234_v39, %v234_v39  ;;  %v361_v41 = vld [vmem:[%s2618_s3 + $0x30] sm:$0xff]  ;;  %v2297_v46 = vpack.c.bf16 %v364_v45, %v363_v44  ;;  %v366_v48 = vld [vmem:[%s2618_s3 + $0x58] sm:$0xff]  ;;  %v367_v50 = vld [vmem:[%s2618_s3 + $0x60] sm:$0xff] }
   0xd   :  { %1934 = vmatpush3.bf16.msra.mxu1 %v2236_v25  ;;  %v2287_v43 = vpack.c.bf16 %v362_v42, %v361_v41  ;;  %v365_v47 = vld [vmem:[%s2618_s3 + $0x50] sm:$0xff]  ;;  %v368_v51 = vld [vmem:[%s2618_s3 + $0x68] sm:$0xff]  ;;  %v370_v55 = vld [vmem:[%s2618_s3 + $0x78] sm:$0xff] }
   0xe   :  { %1935 = vmatprep.subr.bf16.mxu1 %v2104_v3  ;;  %v2307_v49 = vpack.c.bf16 %v366_v48, %v365_v47  ;;  %v2316_v52 = vpack.c.bf16 %v368_v51, %v367_v50  ;;  %v369_v54 = vld [vmem:[%s2618_s3 + $0x70] sm:$0xff]  ;;  %v2059_v41 = vld [vmem:[%s2619_s2 + $0x40] sm:$0xff]   ;;  %v2060_v42 = vld [vmem:[%s2619_s2 + $0x48] sm:$0xff]  }
   0xf   :  { %1660 = vmatpush3.bf16.msra.mxu0 %v2050_v8  ;;  %v2330_v56 = vpack.c.bf16 %v370_v55, %v369_v54  ;;  %v2061_v44 = vld [vmem:[%s2619_s2 + $0x50] sm:$0xff]   ;;  %v2062_v45 = vld [vmem:[%s2619_s2 + $0x58] sm:$0xff]   ;;  %v2063_v47 = vld [vmem:[%s2619_s2 + $0x60] sm:$0xff]  }
  0x10   :  { %1665 = vmatprep.subr.bf16.mxu0 %v2051_v9  ;;  %v2064_v48 = vld [vmem:[%s2619_s2 + $0x68] sm:$0xff]   ;;  %v2065_v50 = vld [vmem:[%s2619_s2 + $0x70] sm:$0xff]   ;;  %v2066_v51 = vld [vmem:[%s2619_s2 + $0x78] sm:$0xff]  }
  0x11   :  { %1937 = vmatpush3.bf16.msra.mxu1 %v2249_v29  ;;  %v2067_v54 = vld [vmem:[%s2619_s2] sm:$0xff]  }
  0x12   :  { %1662 = vmatmul.mubr.msk.bf16.vlgmr.msra.gmra.mrb[0].mxu0 %vm99_vm0, %v65_v13  ;;  %1938 = vmatprep.subr.bf16.mxu1 %v2104_v3  ;;  %v442_v13 = vlaneseq }
  0x13   :  { %1666 = vmatpush3.bf16.msra.mxu0 %v2051_v9  ;;  %1673 = vmatprep.mubr.msk.bf16.mxu0 %vm99_vm0, %v51_v14 }
  0x14   :  { %1667 = vmatprep.subr.bf16.mxu0 %v2052_v17  ;;  %v443_v14 = vshrl.u32 %v442_v13, 7 }
  0x15   :  { %1940 = vmatpush3.bf16.msra.mxu1 %v2287_v43 }
  0x16   :  { %1941 = vmatprep.subr.bf16.mxu1 %v2104_v3  ;;  %v2372_v15 = vsub.s32 0, %v443_v14 }
  0x17   :  { %1668 = vmatpush3.bf16.msra.mxu0 %v2052_v17 }
  0x18   :  { %1669 = vmatprep.subr.bf16.mxu0 %v2053_v24 }
  0x19   :  { %1943 = vmatpush3.bf16.msra.mxu1 %v2297_v46 }
  0x1a   :  { %1944 = vmatprep.subr.bf16.mxu1 %v2104_v3 }
  0x1b   :  { %1670 = vmatpush3.bf16.msra.mxu0 %v2053_v24 }
  0x1c   :  { %1671 = vmatprep.subr.bf16.mxu0 %v2054_v28 }
  0x1d   :  { %1946 = vmatpush3.bf16.msra.mxu1 %v2307_v49 }
  0x1e   :  { %1947 = vmatprep.subr.bf16.mxu1 %v2104_v3 }
  0x1f   :  { %1672 = vmatpush3.bf16.msra.mxu0 %v2054_v28 }
  0x20   :  { %1677 = vmatprep.subr.bf16.mxu0 %v2055_v31 }
  0x21   :  { %1949 = vmatpush3.bf16.msra.mxu1 %v2316_v52 }
  0x22   :  { %1674 = vmatmul.mubr.msk.bf16.vlgmr.msra.gmra.mrb[0].mxu0 %vm99_vm0, %v52_v34  ;;  %1950 = vmatprep.subr.bf16.mxu1 %v2104_v3 }
  0x23   :  { %1678 = vmatpush3.bf16.msra.mxu0 %v2055_v31  ;;  %1685 = vmatprep.mubr.msk.bf16.mxu0 %vm99_vm0, %v235_v35 }
  0x24   :  { %1679 = vmatprep.subr.bf16.mxu0 %v2056_v36 }
  0x25   :  { %1952 = vmatpush3.bf16.msra.mxu1 %v2330_v56 }
  0x26   :  { %1953 = vmatprep.subr.bf16.mxu1 %v2104_v3 }
  0x27   :  { %1680 = vmatpush3.bf16.msra.mxu0 %v2056_v36 }
  0x28   :  { %1681 = vmatprep.subr.bf16.mxu0 %v2057_v37 }
  0x2b   :  { %1682 = vmatpush3.bf16.msra.mxu0 %v2057_v37 }
  0x2c   :  { %1683 = vmatprep.subr.bf16.mxu0 %v2058_v38 }
  0x2f   :  { %1684 = vmatpush3.bf16.msra.mxu0 %v2058_v38 }
  0x30   :  { %1759 = vmatprep.subr.bf16.mxu0 %v2059_v41 }
  0x32   :  { %1686 = vmatmul.mubr.msk.bf16.vlgmr.msra.gmra.mrb[0].mxu0 %vm99_vm0, %v236_v40 }
  0x33   :  { %1760 = vmatpush3.bf16.msra.mxu0 %v2059_v41 }
  0x34   :  { %1761 = vmatprep.subr.bf16.mxu0 %v2060_v42 }
  0x37   :  { %1762 = vmatpush3.bf16.msra.mxu0 %v2060_v42  ;;  %v2076_v42 = vld [vmem:[%s2619_s2 + $0x88] sm:$0xff]  }
  0x38   :  { %1763 = vmatprep.subr.bf16.mxu0 %v2061_v44 }
  0x3b   :  { %1764 = vmatpush3.bf16.msra.mxu0 %v2061_v44 }
  0x3c   :  { %1765 = vmatprep.subr.bf16.mxu0 %v2062_v45 }
  0x3f   :  { %1766 = vmatpush3.bf16.msra.mxu0 %v2062_v45  ;;  %v2077_v45 = vld [vmem:[%s2619_s2 + $0x90] sm:$0xff]  }
  0x40   :  { %1767 = vmatprep.subr.bf16.mxu0 %v2063_v47 }
  0x43   :  { %1768 = vmatpush3.bf16.msra.mxu0 %v2063_v47  ;;  %v2078_v47 = vld [vmem:[%s2619_s2 + $0x98] sm:$0xff]  }
  0x44   :  { %1769 = vmatprep.subr.bf16.mxu0 %v2064_v48 }
  0x47   :  { %1770 = vmatpush3.bf16.msra.mxu0 %v2064_v48  ;;  %v2079_v48 = vld [vmem:[%s2619_s2 + $0xa0] sm:$0xff]  }
  0x48   :  { %1771 = vmatprep.subr.bf16.mxu0 %v2065_v50 }
  0x4b   :  { %1772 = vmatpush3.bf16.msra.mxu0 %v2065_v50  ;;  %v2080_v50 = vld [vmem:[%s2619_s2 + $0xa8] sm:$0xff]  }
  0x4c   :  { %1773 = vmatprep.subr.bf16.mxu0 %v2066_v51 }
  0x4f   :  { %1774 = vmatpush3.bf16.msra.mxu0 %v2066_v51  ;;  %v2081_v51 = vld [vmem:[%s2619_s2 + $0xb0] sm:$0xff]  }
  0x50   :  { %1779 = vmatprep.subr.bf16.mxu0 %v2067_v54 }
  0x84   :  { %v2337_v58 = vpop.permute.xlu1 %339 }
  0x85   :  { %v2335_v57 = vpop.permute.xlu0 %329 }
  0x89   :  { %v2343_v62 = vpop.permute.xlu0 %334 }
 0x105   :  { %v2339_v59 = vpop.f32.mrb[0].mxu0 }
 0x106   :  { %v2341_v60 = vpop.f32.mrb[1].mxu0  ;;  %v344_v63 = vmul.f32 %v2339_v59, %v2337_v58 }
 0x107   :  { %v1688_v61 = vpop.f32.mrb[2].mxu0  ;;  %v342_v1 = vmul.f32 %v2335_v57, %v2341_v60 }
 0x108   :  { %v2347_v0 = vpop.f32.mrb[3].mxu0  ;;  %v347_v5 = vsel %vm346_vm2, %v344_v63, 0.0 }
 0x109   :  { %v343_v2 = vmul.f32 %v2343_v62, %v2347_v0 }
 0x10b   :  { %v345_v4 = vadd.f32 %v343_v2, %v342_v1  ;;  %v41_v2 = vld [vmem:[%s2620_s4] sm:$0x1] }
 0x10d   :  { %v348_v6 = vadd.f32 %v347_v5, %v345_v4 }
 0x10f   :  { %v349_v7 = vrot.slane %v348_v6, 4 }
 0x111   :  { %v350_v8 = vadd.f32 %v349_v7, %v348_v6  ;;  %v42_v6 = vld [vmem:[%s2621_s5] sm:$0x1] }
 0x113   :  { %v351_v9 = vrot.slane %v350_v8, 2 }
 0x115   :  { %v352_v10 = vadd.f32 %v351_v9, %v350_v8 }
 0x117   :  { %v353_v11 = vrot.slane %v352_v10, 1 }
 0x119   :  { %v354_v12 = vadd.f32 %v353_v11, %v352_v10 }
 0x11b   :  { %1722 = vmatmul.mubr.f32.vlgmr.msra.gmra.mrb[0].mxu1 %v354_v12 }
 0x11c   :  { %1955 = vmatpush3.bf16.msra.mxu1 %v2222_v21  ;;  %1756 = vmatprep.mubr.msk.f32.mxu1 %vm2105_vm1, %v2106_v53 }
 0x11d   :  { %1956 = vmatprep.subr.bf16.mxu1 %v2104_v3 }
 0x120   :  { %1958 = vmatpush3.bf16.msra.mxu1 %v2236_v25 }
 0x121   :  { %1959 = vmatprep.subr.bf16.mxu1 %v2104_v3 }
 0x124   :  { %1961 = vmatpush3.bf16.msra.mxu1 %v2249_v29 }
 0x125   :  { %1962 = vmatprep.subr.bf16.mxu1 %v2104_v3 }
 0x128   :  { %1964 = vmatpush3.bf16.msra.mxu1 %v2287_v43 }
 0x129   :  { %1965 = vmatprep.subr.bf16.mxu1 %v2104_v3 }
 0x12c   :  { %1967 = vmatpush3.bf16.msra.mxu1 %v2297_v46 }
 0x12d   :  { %1968 = vmatprep.subr.bf16.mxu1 %v2104_v3 }
 0x130   :  { %1970 = vmatpush3.bf16.msra.mxu1 %v2307_v49 }
 0x131   :  { %1971 = vmatprep.subr.bf16.mxu1 %v2104_v3 }
 0x134   :  { %1973 = vmatpush3.bf16.msra.mxu1 %v2316_v52 }
 0x135   :  { %1974 = vmatprep.subr.bf16.mxu1 %v2104_v3 }
 0x138   :  { %1976 = vmatpush3.bf16.msra.mxu1 %v2330_v56 }
 0x139   :  { %1977 = vmatprep.subr.bf16.mxu1 %v2104_v3 }
 0x1ee   :  { %v437_v16 = vpop.f32.mrb[0].mxu1 }
 0x1ef   :  { %v2374_v17 = vmul.f32 0.0078125, %v437_v16  ;;  %v1723_v18 = vpop.f32.mrb[1].mxu1 }
 0x1f1   :  { %v445_v19 = vrot.slane %v2374_v17, %v2372_v15 }
 0x1f3   :  { %v446_v20 = vsub.f32 %v2341_v60, %v445_v19  ;;  %v447_v22 = vsub.f32 %v2347_v0, %v445_v19  ;;  %v448_v23 = vsub.f32 %v2339_v59, %v445_v19 }
 0x1f5   :  { %v449_v24 = vmul.f32 %v446_v20, %v2335_v57  ;;  %v450_v26 = vmul.f32 %v447_v22, %v2343_v62  ;;  %v451_v27 = vmul.f32 %v448_v23, %v2337_v58 }
 0x1f7   :  { %v452_v28 = vmul.f32 %v449_v24, %v449_v24  ;;  %v453_v30 = vmul.f32 %v450_v26, %v450_v26  ;;  %v454_v31 = vmul.f32 %v451_v27, %v451_v27 }
 0x1f9   :  { %v455_v32 = vadd.f32 %v453_v30, %v452_v28  ;;  %v456_v33 = vsel %vm346_vm2, %v454_v31, 0.0  ;;  %v2068_v30 = vld [vmem:[%s2619_s2 + $0x8] sm:$0xff]   ;;  %v2069_v31 = vld [vmem:[%s2619_s2 + $0x10] sm:$0xff]  }
 0x1fb   :  { %v457_v34 = vadd.f32 %v456_v33, %v455_v32  ;;  %v2070_v32 = vld [vmem:[%s2619_s2 + $0x18] sm:$0xff]   ;;  %v2071_v33 = vld [vmem:[%s2619_s2 + $0x20] sm:$0xff]  }
 0x1fd   :  { %v458_v35 = vrot.slane %v457_v34, 4 }
 0x1ff   :  { %v459_v36 = vadd.f32 %v458_v35, %v457_v34  ;;  %v2072_v34 = vld [vmem:[%s2619_s2 + $0x28] sm:$0xff]   ;;  %v2073_v35 = vld [vmem:[%s2619_s2 + $0x30] sm:$0xff]  }
 0x201   :  { %v460_v37 = vrot.slane %v459_v36, 2 }
 0x203   :  { %v461_v38 = vadd.f32 %v460_v37, %v459_v36  ;;  %v2074_v36 = vld [vmem:[%s2619_s2 + $0x38] sm:$0xff]   ;;  %v2075_v37 = vld [vmem:[%s2619_s2 + $0x80] sm:$0xff]  }
 0x205   :  { %v462_v39 = vrot.slane %v461_v38, 1 }
 0x207   :  { %v463_v40 = vadd.f32 %v462_v39, %v461_v38 }
 0x209   :  { %1757 = vmatmul.mubr.f32.vlgmr.msra.gmra.mrb[2].mxu1 %v463_v40 }
 0x20a   :  { %1979 = vmatpush3.bf16.msra.mxu1 %v2222_v21  ;;  %1851 = vmatprep.mubr.msk.f32.mxu1 %vm2105_vm1, %v2106_v53 }
 0x20b   :  { %1980 = vmatprep.subr.bf16.mxu1 %v2104_v3 }
 0x20e   :  { %1982 = vmatpush3.bf16.msra.mxu1 %v2236_v25 }
 0x20f   :  { %1983 = vmatprep.subr.bf16.mxu1 %v2104_v3 }
 0x212   :  { %1985 = vmatpush3.bf16.msra.mxu1 %v2249_v29 }
 0x213   :  { %1986 = vmatprep.subr.bf16.mxu1 %v2104_v3 }
 0x216   :  { %1988 = vmatpush3.bf16.msra.mxu1 %v2287_v43 }
 0x217   :  { %1989 = vmatprep.subr.bf16.mxu1 %v2104_v3 }
 0x21a   :  { %1991 = vmatpush3.bf16.msra.mxu1 %v2297_v46 }
 0x21b   :  { %1992 = vmatprep.subr.bf16.mxu1 %v2104_v3 }
 0x21e   :  { %1994 = vmatpush3.bf16.msra.mxu1 %v2307_v49 }
 0x21f   :  { %1995 = vmatprep.subr.bf16.mxu1 %v2104_v3 }
 0x222   :  { %1997 = vmatpush3.bf16.msra.mxu1 %v2316_v52 }
 0x223   :  { %1998 = vmatprep.subr.bf16.mxu1 %v2104_v3 }
 0x226   :  { %2000 = vmatpush3.bf16.msra.mxu1 %v2330_v56 }
 0x227   :  { %2001 = vmatprep.subr.bf16.mxu1 %v2104_v3 }
 0x2dc   :  { %v530_v55 = vpop.f32.mrb[2].mxu1 }
 0x2dd   :  { %v534_v61 = vmul.f32 0.0078125, %v530_v55  ;;  %v1758_v63 = vpop.f32.mrb[3].mxu1 }
 0x2df   :  { %v535_v1 = vadd.f32 1e-05, %v534_v61 }
 0x2e1   :  { %2099 = vrsqrt.f32 %v535_v1 }
 0x2eb   :  { %v2100_v4 = vpop.eup %2099 }
 0x2ec   :  { %v537_v5 = vmul.f32 %v2100_v4, %v41_v2 }
 0x2ee   :  { %v538_v7 = vmul.f32 %v537_v5, %v2374_v17  ;;  %v544_v8 = vrot.slane %v537_v5, %v2372_v15 }
 0x2f0   :  { %v539_v9 = vsub.f32 %v42_v6, %v538_v7  ;;  %v546_v10 = vmul.f32 %v544_v8, %v2341_v60  ;;  %v547_v11 = vmul.f32 %v544_v8, %v2347_v0  ;;  %v548_v12 = vmul.f32 %v2339_v59, %v544_v8 }
 0x2f2   :  { %v553_v13 = vrot.slane %v539_v9, %v2372_v15 }
 0x2f4   :  { %v555_v14 = vadd.f32 %v553_v13, %v546_v10  ;;  %v556_v16 = vadd.f32 %v553_v13, %v547_v11  ;;  %v557_v18 = vadd.f32 %v553_v13, %v548_v12 }
 0x2f6   :  { %v558_v19 = vmax.f32 %v555_v14, 0.0  ;;  %v559_v20 = vmax.f32 %v556_v16, 0.0  ;;  %v560_v22 = vmax.f32 %v557_v18, 0.0 }
 0x2f8   :  { %v561_v23 = vmul.f32 %v558_v19, %v2335_v57  ;;  %v562_v17 = vmul.f32 %v559_v20, %v2343_v62  ;;  %v563_v24 = vmul.f32 %v560_v22, %v2337_v58 }
 0x2fa   :  { %566 = vst [vmem:[#allocation2 + $0x1] sm:$0xff] %v561_v23  ;;  %567 = vst [vmem:[#allocation2 + $0x9] sm:$0xff] %v562_v17  ;;  %v593_v60 = vpack.c.bf16 %v562_v17, %v561_v23 }
 0x2fb   :  { %568 = vst [vmem:[#allocation2 + $0x11] sm:$0x3] %v563_v24 }
 0x2fc   :  { %1775 = vmatprep.mubr.bf16.mxu0 %v593_v60 }
 0x301   :  { %v569_v0 = vld [vmem:[#allocation2] sm:$0xff]  ;;  %v570_v26 = vld [vmem:[#allocation2 + $0x8] sm:$0xff] }
 0x302   :  { %v592_v59 = vld [vmem:[#allocation2 + $0x11] sm:$0x3]  ;;  %v572_v28 = vpack.c.bf16 %v570_v26, %v569_v0  ;;  %v804_v39 = vld [vmem:[#allocation2 + $0x2] sm:$0xff] }
 0x303   :  { %v594_v27 = vpack.c.bf16 %v592_v59, %v592_v59  ;;  %v571_v38 = vld [vmem:[#allocation2 + $0x10] sm:$0x3]  ;;  %v806_v55 = vld [vmem:[#allocation2 + $0x12] sm:$0x3] }
 0x304   :  { %v805_v40 = vld [vmem:[#allocation2 + $0xa] sm:$0xff]  ;;  %v573_v41 = vpack.c.bf16 %v571_v38, %v571_v38  ;;  %v808_v61 = vpack.c.bf16 %v806_v55, %v806_v55  ;;  %v2091_v38 = vld [vmem:[%s2622_s9 + $0x20] sm:$0xff]  }
 0x305   :  { %1776 = vmatmul.mubr.bf16.vlgmr.msra.gmra.mrb[4].mxu0 %v594_v27  ;;  %v807_v44 = vpack.c.bf16 %v805_v40, %v804_v39  ;;  %v2092_v39 = vld [vmem:[%s2622_s9 + $0x60] sm:$0xff]   ;;  %v2093_v40 = vld [vmem:[%s2622_s9 + $0x28] sm:$0xff]  }
 0x306   :  { %1780 = vmatpush3.bf16.msra.mxu0 %v2067_v54  ;;  %1795 = vmatprep.mubr.bf16.mxu0 %v572_v28  ;;  %v2082_v54 = vld [vmem:[%s2619_s2 + $0xb8] sm:$0xff]   ;;  %v43_v55 = vld [vmem:[%s2623_s6] sm:$0x1] }
 0x307   :  { %1781 = vmatprep.subr.bf16.mxu0 %v2068_v30 }
 0x30a   :  { %1782 = vmatpush3.bf16.msra.mxu0 %v2068_v30  ;;  %v2083_v30 = vld [vmem:[%s2622_s9] sm:$0xff]  }
 0x30b   :  { %1783 = vmatprep.subr.bf16.mxu0 %v2069_v31 }
 0x30e   :  { %1784 = vmatpush3.bf16.msra.mxu0 %v2069_v31  ;;  %v2084_v31 = vld [vmem:[%s2622_s9 + $0x40] sm:$0xff]  }
 0x30f   :  { %1785 = vmatprep.subr.bf16.mxu0 %v2070_v32 }
 0x312   :  { %1786 = vmatpush3.bf16.msra.mxu0 %v2070_v32  ;;  %v2085_v32 = vld [vmem:[%s2622_s9 + $0x8] sm:$0xff]  }
 0x313   :  { %1787 = vmatprep.subr.bf16.mxu0 %v2071_v33 }
 0x316   :  { %1788 = vmatpush3.bf16.msra.mxu0 %v2071_v33  ;;  %v2086_v33 = vld [vmem:[%s2622_s9 + $0x48] sm:$0xff]  }
 0x317   :  { %1789 = vmatprep.subr.bf16.mxu0 %v2072_v34 }
 0x31a   :  { %1790 = vmatpush3.bf16.msra.mxu0 %v2072_v34  ;;  %v2087_v34 = vld [vmem:[%s2622_s9 + $0x10] sm:$0xff]  }
 0x31b   :  { %1791 = vmatprep.subr.bf16.mxu0 %v2073_v35 }
 0x31e   :  { %1792 = vmatpush3.bf16.msra.mxu0 %v2073_v35  ;;  %v2088_v35 = vld [vmem:[%s2622_s9 + $0x50] sm:$0xff]  }
 0x31f   :  { %1793 = vmatprep.subr.bf16.mxu0 %v2074_v36 }
 0x322   :  { %1794 = vmatpush3.bf16.msra.mxu0 %v2074_v36  ;;  %v2089_v36 = vld [vmem:[%s2622_s9 + $0x18] sm:$0xff]  }
 0x323   :  { %1799 = vmatprep.subr.bf16.mxu0 %v2075_v37 }
 0x325   :  { %1796 = vmatmul.mubr.bf16.vlgmr.msra.gmra.mrb[4].mxu0 %v573_v41  ;;  %v2094_v41 = vld [vmem:[%s2622_s9 + $0x68] sm:$0xff]  }
 0x326   :  { %1800 = vmatpush3.bf16.msra.mxu0 %v2075_v37  ;;  %1815 = vmatprep.mubr.bf16.mxu0 %v807_v44  ;;  %v2090_v37 = vld [vmem:[%s2622_s9 + $0x58] sm:$0xff]   ;;  %v2096_v44 = vld [vmem:[%s2622_s9 + $0x70] sm:$0xff]  }
 0x327   :  { %1801 = vmatprep.subr.bf16.mxu0 %v2076_v42 }
 0x32a   :  { %1802 = vmatpush3.bf16.msra.mxu0 %v2076_v42  ;;  %v2095_v42 = vld [vmem:[%s2622_s9 + $0x30] sm:$0xff]  }
 0x32b   :  { %1803 = vmatprep.subr.bf16.mxu0 %v2077_v45 }
 0x32e   :  { %1804 = vmatpush3.bf16.msra.mxu0 %v2077_v45  ;;  %v2097_v45 = vld [vmem:[%s2622_s9 + $0x38] sm:$0xff]  }
 0x32f   :  { %1805 = vmatprep.subr.bf16.mxu0 %v2078_v47 }
 0x332   :  { %1806 = vmatpush3.bf16.msra.mxu0 %v2078_v47  ;;  %v2098_v47 = vld [vmem:[%s2622_s9 + $0x78] sm:$0xff]  }
 0x333   :  { %1807 = vmatprep.subr.bf16.mxu0 %v2079_v48 }
 0x336   :  { %1808 = vmatpush3.bf16.msra.mxu0 %v2079_v48 }
 0x337   :  { %1809 = vmatprep.subr.bf16.mxu0 %v2080_v50 }
 0x33a   :  { %1810 = vmatpush3.bf16.msra.mxu0 %v2080_v50 }
 0x33b   :  { %1811 = vmatprep.subr.bf16.mxu0 %v2081_v51 }
 0x33e   :  { %1812 = vmatpush3.bf16.msra.mxu0 %v2081_v51 }
 0x33f   :  { %1813 = vmatprep.subr.bf16.mxu0 %v2082_v54 }
 0x342   :  { %1814 = vmatpush3.bf16.msra.mxu0 %v2082_v54 }
 0x343   :  { %1909 = vmatprep.subr.bf16.mxu0 %v2084_v31 }
 0x345   :  { %1816 = vmatmul.mubr.bf16.vlgmr.msra.gmra.mrb[4].mxu0 %v808_v61 }
 0x346   :  { %1910 = vmatpush3.bf16.msra.mxu0 %v2084_v31 }
 0x347   :  { %1911 = vmatprep.subr.bf16.mxu0 %v2086_v33 }
 0x34a   :  { %1912 = vmatpush3.bf16.msra.mxu0 %v2086_v33 }
 0x34b   :  { %1913 = vmatprep.subr.bf16.mxu0 %v2088_v35 }
 0x34e   :  { %1914 = vmatpush3.bf16.msra.mxu0 %v2088_v35 }
 0x34f   :  { %1915 = vmatprep.subr.bf16.mxu0 %v2090_v37 }
 0x352   :  { %1916 = vmatpush3.bf16.msra.mxu0 %v2090_v37 }
 0x353   :  { %1917 = vmatprep.subr.bf16.mxu0 %v2092_v39 }
 0x356   :  { %1918 = vmatpush3.bf16.msra.mxu0 %v2092_v39 }
 0x357   :  { %1919 = vmatprep.subr.bf16.mxu0 %v2094_v41 }
 0x35a   :  { %1920 = vmatpush3.bf16.msra.mxu0 %v2094_v41 }
 0x35b   :  { %1921 = vmatprep.subr.bf16.mxu0 %v2096_v44 }
 0x35e   :  { %1922 = vmatpush3.bf16.msra.mxu0 %v2096_v44 }
 0x35f   :  { %1923 = vmatprep.subr.bf16.mxu0 %v2098_v47 }
 0x362   :  { %1924 = vmatpush3.bf16.msra.mxu0 %v2098_v47 }
 0x418   :  { %v2490_v63 = vpop.f32.mrb[4].mxu0 }
 0x419   :  { %v2492_v1 = vpop.f32.mrb[5].mxu0  ;;  %v927_v4 = vmul.f32 %v2490_v63, %v2337_v58 }
 0x41a   :  { %v1818_v2 = vpop.f32.mrb[6].mxu0  ;;  %v925_v6 = vmul.f32 %v2492_v1, %v2335_v57 }
 0x41b   :  { %v2496_v5 = vpop.f32.mrb[7].mxu0  ;;  %v929_v9 = vsel %vm346_vm2, %v927_v4, 0.0  ;;  %v44_v4 = vld [vmem:[%s2624_s7] sm:$0x1] }
 0x41c   :  { %v926_v7 = vmul.f32 %v2496_v5, %v2343_v62 }
 0x41e   :  { %v928_v8 = vadd.f32 %v926_v7, %v925_v6 }
 0x420   :  { %v930_v10 = vadd.f32 %v929_v9, %v928_v8 }
 0x422   :  { %v931_v11 = vrot.slane %v930_v10, 4 }
 0x424   :  { %v932_v12 = vadd.f32 %v931_v11, %v930_v10 }
 0x426   :  { %v933_v13 = vrot.slane %v932_v12, 2 }
 0x428   :  { %v934_v14 = vadd.f32 %v933_v13, %v932_v12 }
 0x42a   :  { %v935_v16 = vrot.slane %v934_v14, 1 }
 0x42c   :  { %v936_v18 = vadd.f32 %v935_v16, %v934_v14 }
 0x42e   :  { %1852 = vmatmul.mubr.f32.vlgmr.msra.gmra.mrb[4].mxu1 %v936_v18 }
 0x42f   :  { %2003 = vmatpush3.bf16.msra.mxu1 %v2222_v21  ;;  %1886 = vmatprep.mubr.msk.f32.mxu1 %vm2105_vm1, %v2106_v53 }
 0x430   :  { %2004 = vmatprep.subr.bf16.mxu1 %v2104_v3 }
 0x433   :  { %2006 = vmatpush3.bf16.msra.mxu1 %v2236_v25 }
 0x434   :  { %2007 = vmatprep.subr.bf16.mxu1 %v2104_v3 }
 0x437   :  { %2009 = vmatpush3.bf16.msra.mxu1 %v2249_v29 }
 0x438   :  { %2010 = vmatprep.subr.bf16.mxu1 %v2104_v3 }
 0x43b   :  { %2012 = vmatpush3.bf16.msra.mxu1 %v2287_v43 }
 0x43c   :  { %2013 = vmatprep.subr.bf16.mxu1 %v2104_v3 }
 0x43f   :  { %2015 = vmatpush3.bf16.msra.mxu1 %v2297_v46 }
 0x440   :  { %2016 = vmatprep.subr.bf16.mxu1 %v2104_v3 }
 0x443   :  { %2018 = vmatpush3.bf16.msra.mxu1 %v2307_v49 }
 0x444   :  { %2019 = vmatprep.subr.bf16.mxu1 %v2104_v3 }
 0x447   :  { %2021 = vmatpush3.bf16.msra.mxu1 %v2316_v52 }
 0x448   :  { %2022 = vmatprep.subr.bf16.mxu1 %v2104_v3 }
 0x44b   :  { %2024 = vmatpush3.bf16.msra.mxu1 %v2330_v56 }
 0x44c   :  { %1889 = vmatprep.subr.bf16.mxu1 %v2083_v30 }
 0x501   :  { %v1019_v21 = vpop.f32.mrb[4].mxu1 }
 0x502   :  { %v2520_v25 = vmul.f32 0.0078125, %v1019_v21  ;;  %v1853_v29 = vpop.f32.mrb[5].mxu1 }
 0x504   :  { %v1027_v43 = vrot.slane %v2520_v25, %v2372_v15 }
 0x506   :  { %v1028_v46 = vsub.f32 %v2492_v1, %v1027_v43  ;;  %v1029_v53 = vsub.f32 %v2496_v5, %v1027_v43  ;;  %v1030_v49 = vsub.f32 %v2490_v63, %v1027_v43 }
 0x508   :  { %v1031_v19 = vmul.f32 %v1028_v46, %v2335_v57  ;;  %v1032_v52 = vmul.f32 %v1029_v53, %v2343_v62  ;;  %v1033_v3 = vmul.f32 %v1030_v49, %v2337_v58 }
 0x50a   :  { %v1034_v56 = vmul.f32 %v1031_v19, %v1031_v19  ;;  %v1035_v20 = vmul.f32 %v1032_v52, %v1032_v52  ;;  %v1036_v22 = vmul.f32 %v1033_v3, %v1033_v3 }
 0x50c   :  { %v1037_v23 = vadd.f32 %v1035_v20, %v1034_v56  ;;  %v1038_v17 = vsel %vm346_vm2, %v1036_v22, 0.0 }
 0x50e   :  { %v1039_v24 = vadd.f32 %v1038_v17, %v1037_v23 }
 0x510   :  { %v1040_v60 = vrot.slane %v1039_v24, 4 }
 0x512   :  { %v1041_v59 = vadd.f32 %v1040_v60, %v1039_v24 }
 0x514   :  { %v1042_v0 = vrot.slane %v1041_v59, 2 }
 0x516   :  { %v1043_v26 = vadd.f32 %v1042_v0, %v1041_v59 }
 0x518   :  { %v1044_v27 = vrot.slane %v1043_v26, 1 }
 0x51a   :  { %v1045_v28 = vadd.f32 %v1044_v27, %v1043_v26 }
 0x51c   :  { %1887 = vmatmul.mubr.f32.vlgmr.msra.gmra.mrb[6].mxu1 %v1045_v28 }
 0x51d   :  { %1890 = vmatpush3.bf16.msra.mxu1 %v2083_v30 }
 0x51e   :  { %1891 = vmatprep.subr.bf16.mxu1 %v2085_v32 }
 0x521   :  { %1892 = vmatpush3.bf16.msra.mxu1 %v2085_v32 }
 0x522   :  { %1893 = vmatprep.subr.bf16.mxu1 %v2087_v34 }
 0x525   :  { %1894 = vmatpush3.bf16.msra.mxu1 %v2087_v34 }
 0x526   :  { %1895 = vmatprep.subr.bf16.mxu1 %v2089_v36 }
 0x529   :  { %1896 = vmatpush3.bf16.msra.mxu1 %v2089_v36 }
 0x52a   :  { %1897 = vmatprep.subr.bf16.mxu1 %v2091_v38 }
 0x52d   :  { %1898 = vmatpush3.bf16.msra.mxu1 %v2091_v38 }
 0x52e   :  { %1899 = vmatprep.subr.bf16.mxu1 %v2093_v40 }
 0x531   :  { %1900 = vmatpush3.bf16.msra.mxu1 %v2093_v40 }
 0x532   :  { %1901 = vmatprep.subr.bf16.mxu1 %v2095_v42 }
 0x535   :  { %1902 = vmatpush3.bf16.msra.mxu1 %v2095_v42 }
 0x536   :  { %1903 = vmatprep.subr.bf16.mxu1 %v2097_v45 }
 0x539   :  { %1904 = vmatpush3.bf16.msra.mxu1 %v2097_v45 }
 0x5ef   :  { %v1112_v48 = vpop.f32.mrb[6].mxu1 }
 0x5f0   :  { %v1116_v50 = vmul.f32 0.0078125, %v1112_v48  ;;  %v1888_v51 = vpop.f32.mrb[7].mxu1 }
 0x5f2   :  { %v1117_v54 = vadd.f32 1e-05, %v1116_v50 }
 0x5f4   :  { %2101 = vrsqrt.f32 %v1117_v54 }
 0x5fe   :  { %v2102_v61 = vpop.eup %2101 }
 0x5ff   :  { %v1119_v2 = vmul.f32 %v2102_v61, %v43_v55 }
 0x601   :  { %v1120_v6 = vmul.f32 %v1119_v2, %v2520_v25  ;;  %v1126_v7 = vrot.slane %v1119_v2, %v2372_v15 }
 0x603   :  { %v1121_v8 = vsub.f32 %v44_v4, %v1120_v6  ;;  %v1128_v9 = vmul.f32 %v1126_v7, %v2492_v1  ;;  %v1129_v10 = vmul.f32 %v1126_v7, %v2496_v5  ;;  %v1130_v11 = vmul.f32 %v2490_v63, %v1126_v7 }
 0x605   :  { %v1135_v12 = vrot.slane %v1121_v8, %v2372_v15  ;;  %v1484_v15 = vld [vmem:[%s2625_s10] ss:$0 sm:$0xff] }
 0x607   :  { %v1137_v13 = vadd.f32 %v1135_v12, %v1128_v9  ;;  %v1138_v14 = vadd.f32 %v1135_v12, %v1129_v10  ;;  %v1139_v16 = vadd.f32 %v1135_v12, %v1130_v11 }
 0x609   :  { %v1140_v18 = vmax.f32 %v1137_v13, 0.0  ;;  %v1141_v21 = vmax.f32 %v1138_v14, 0.0  ;;  %v1142_v29 = vmax.f32 %v1139_v16, 0.0 }
 0x60b   :  { %v1143_v43 = vmul.f32 %v1140_v18, %v2335_v57  ;;  %v1144_v25 = vmul.f32 %v1141_v21, %v2343_v62  ;;  %v1145_v46 = vmul.f32 %v1142_v29, %v2337_v58 }
 0x60d   :  { %v1147_v53 = vpack.c.bf16 %v1144_v25, %v1143_v43  ;;  %v1148_v1 = vpack.c.bf16 %v1145_v46, %v1145_v46 }
 0x60f   :  { %1905 = vmatprep.mubr.bf16.mxu1 %v1147_v53  ;;  %1925 = vmatprep.mubr.bf16.mxu0 %v1147_v53 }
 0x610   :  { %1906 = vmatmul.mubr.bf16.vlgmr.msra.gmra.mrb[8].mxu1 %v1148_v1  ;;  %1926 = vmatmul.mubr.bf16.vlgmr.msra.gmra.mrb[8].mxu0 %v1148_v1 }
 0x6e3   :  { %v1907_v63 = vpop.f32.mrb[8].mxu1  ;;  %v1927_v5 = vpop.f32.mrb[8].mxu0 }
 0x6e4   :  { %v1262_v49 = vadd.f32 %v1907_v63, %v1484_v15  ;;  %v1378_v19 = vadd.f32 %v1927_v5, %v1484_v15  ;;  %v1253_v52 = vpop.f32.mrb[9].mxu1  ;;  %v1369_v57 = vpop.f32.mrb[9].mxu0 }
 0x6e5   :  { %v1254_v3 = vadd.f32 %v1484_v15, %v1253_v52  ;;  %v1370_v62 = vadd.f32 %v1484_v15, %v1369_v57  ;;  %v1908_v56 = vpop.f32.mrb[10].mxu1  ;;  %v1928_v58 = vpop.f32.mrb[10].mxu0 }
 0x6e6   :  { %1269 = vst [vmem:[%s2626_s11 + $0x10] sm:$0x3] %v1262_v49  ;;  %1385 = vst [vmem:[%s2627_s12 + $0x10] sm:$0x3] %v1378_v19  ;;  %v1256_v20 = vpop.f32.mrb[11].mxu1  ;;  %v1372_v22 = vpop.f32.mrb[11].mxu0 }
 0x6e7   :  { %1267 = vst [vmem:[%s2626_s11] sm:$0xff] %v1254_v3  ;;  %1383 = vst [vmem:[%s2627_s12] sm:$0xff] %v1370_v62  ;;  %v1257_v23 = vadd.f32 %v1484_v15, %v1256_v20  ;;  %v1373_v17 = vadd.f32 %v1484_v15, %v1372_v22 }
 0x6e9   :  { %1268 = vst [vmem:[%s2626_s11 + $0x8] sm:$0xff] %v1257_v23  ;;  %1384 = vst [vmem:[%s2627_s12 + $0x8] sm:$0xff] %v1373_v17 }

// kernel: attention_net_forward.5
= control target key start
LH: loop header
LB: loop body
LE: loop exit
PB: predicated region body
PF: predicated region fallthrough
CT: control target
= control target key end

     0   :  { %v3305_v0 = vmov 0.0   ;;  %vm3306_vm0 = vmmov 0   ;;  %v3307_v41 = vmov 0   ;;  %vm885_vm1 = vcmask 1041408   ;;  %s4411_s2 = inlined_call_operand.vmem [shape: bf16[3,128,128], index: 2, kind: input, shape index: {}]   ;;  %s4412_s0 = inlined_call_operand.vmem [shape: f32[36,128], index: 0, kind: input, shape index: {}]   ;;  %s4413_s3 = inlined_call_operand.vmem [shape: bf16[3,128,128], index: 3, kind: input, shape index: {}]   ;;  %s4414_s10 = inlined_call_operand.vmem [shape: f32[34,1], index: 10, kind: input, shape index: {}]   ;;  %s4415_s1 = inlined_call_operand.vmem [shape: f32[36,128], index: 1, kind: input, shape index: {}]   ;;  %s4416_s5 = inlined_call_operand.vmem [shape: f32[128,128], index: 5, kind: input, shape index: {}]   ;;  %s4417_s4 = inlined_call_operand.vmem [shape: bf16[3,128,128], index: 4, kind: input, shape index: {}]   ;;  %s4418_s6 = inlined_call_operand.vmem [shape: f32[1,128], index: 6, kind: input, shape index: {}]   ;;  %s4419_s7 = inlined_call_operand.vmem [shape: f32[1,128], index: 7, kind: input, shape index: {}]   ;;  %s4420_s11 = inlined_call_operand.vmem [shape: f32[128,16], index: 11, kind: input, shape index: {}]   ;;  %s4421_s12 = inlined_call_operand.vmem [shape: f32[128,16], index: 12, kind: input, shape index: {}]   ;;  %s4422_s8 = inlined_call_operand.vmem [shape: f32[1,128], index: 8, kind: input, shape index: {}]   ;;  %s4423_s9 = inlined_call_operand.vmem [shape: f32[1,128], index: 9, kind: input, shape index: {}]   ;;  %s4424_s13 = inlined_call_operand.vmem [shape: f32[1,16], index: 13, kind: input, shape index: {}]   ;;  %s4425_s14 = inlined_call_operand.vmem [shape: f32[1,16], index: 14, kind: input, shape index: {}]   ;;  %s4426_s15 = inlined_call_operand.vmem [shape: f32[34,16], index: 15, kind: input, shape index: {}]   ;;  %s4427_s16 = inlined_call_operand.vmem [shape: f32[34,16], index: 16, kind: output, shape index: {0}]   ;;  %s4428_s17 = inlined_call_operand.vmem [shape: f32[34,16], index: 17, kind: output, shape index: {1}]  }
   0x1   :  { %4431 = sst [smem:[#allocation3_spill]] %s4411_s2  ;;  %2463 = vmatprep.subr.bf16.mxu0 %v3305_v0  ;;  %1119 = vst [vmem:[#allocation2] sm:$0x1] %v3305_v0  ;;  %1120 = vst [vmem:[#allocation2 + $0x23] sm:$0x1] %v3305_v0  ;;  %2479 = vmatprep.mubr.msk.bf16.mxu0 %vm3306_vm0, %v3305_v0  ;;  %v60_v39 = vld [vmem:[%s4414_s10] sm:$0xff] }
   0x2   :  { %4432 = sst [smem:[#allocation4_spill]] %s4412_s0  ;;  %s4433_s26 = sld [smem:[#allocation3_spill]]  ;;  %2663 = vmatprep.mubr.msk.f32.mxu1 %vm3306_vm0, %v3305_v0  ;;  %v62_v40 = vld [vmem:[%s4414_s10 + $0x10] sm:$0xff]  ;;  %3197 = vset.pattern.permute.xlu0 %v3307_v41  ;;  %v61_v42 = vld [vmem:[%s4414_s10 + $0x8] sm:$0xff]  ;;  %v63_v44 = vld [vmem:[%s4414_s10 + $0x18] sm:$0xff]  ;;  %vm2054_vm2 = vcmask 130048  }
   0x3   :  { %s4434_s29 = sld [smem:[#allocation4_spill]]  ;;  %854 = vperm.xlu0 %3197, %v60_v39   ;;  %3198 = vset.pattern.permute.xlu1 %v3307_v41  ;;  %v64_v45 = vld [vmem:[%s4414_s10 + $0x20] sm:$0x3]  ;;  %v3224_v51 = vld [vmem:[%s4413_s3 + $0x48] sm:$0xff]   ;;  %v3225_v55 = vld [vmem:[%s4413_s3 + $0x50] sm:$0xff]   ;;  %vm2059_vm3 = vcmask 123904  }
   0x4   :  { %864 = vperm.xlu1 %3198, %v62_v40   ;;  %v3223_v50 = vld [vmem:[%s4413_s3 + $0x40] sm:$0xff]   ;;  %v3226_v56 = vld [vmem:[%s4413_s3 + $0x58] sm:$0xff]   ;;  %v3228_v60 = vld [vmem:[%s4413_s3 + $0x68] sm:$0xff]  }
   0x5   :  { %v3227_v59 = vld [vmem:[%s4413_s3 + $0x60] sm:$0xff]   ;;  %v3229_v61 = vld [vmem:[%s4413_s3 + $0x70] sm:$0xff]   ;;  %v3230_v62 = vld [vmem:[%s4413_s3 + $0x78] sm:$0xff]  }
   0x6   :  { %v480_v63 = vld [vmem:[%s4415_s1 + $0x1] sm:$0xff] }
   0x7   :  { %859 = vperm.xlu0 %3197, %v61_v42   ;;  %v894_v40 = vld [vmem:[%s4416_s5] sm:$0xff]  ;;  %v895_v41 = vld [vmem:[%s4416_s5 + $0x8] sm:$0xff] }
   0x8   :  { %v3199_v1 = vld [vmem:[%s4433_s26 + $0x40] sm:$0xff]   ;;  %v3200_v2 = vld [vmem:[%s4433_s26 + $0x48] sm:$0xff]   ;;  %v3201_v3 = vld [vmem:[%s4433_s26 + $0x50] sm:$0xff]   ;;  %869 = vperm.xlu1 %3198, %v63_v44   ;;  %v3744_v42 = vpack.c.bf16 %v895_v41, %v894_v40 }
   0x9   :  { %2464 = vmatpush3.bf16.msra.mxu0 %v3199_v1  ;;  %v3202_v4 = vld [vmem:[%s4433_s26 + $0x58] sm:$0xff]   ;;  %v3203_v5 = vld [vmem:[%s4433_s26 + $0x60] sm:$0xff]   ;;  %v3204_v6 = vld [vmem:[%s4433_s26 + $0x68] sm:$0xff]  }
   0xa   :  { %2465 = vmatprep.subr.bf16.mxu0 %v3305_v0  ;;  %v3205_v7 = vld [vmem:[%s4433_s26 + $0x70] sm:$0xff]   ;;  %v3206_v8 = vld [vmem:[%s4433_s26 + $0x78] sm:$0xff]   ;;  %v89_v9 = vld [vmem:[%s4434_s29 + $0x1] sm:$0xff] }
   0xb   :  { %v90_v10 = vld [vmem:[%s4434_s29 + $0x9] sm:$0xff]  ;;  %v3207_v12 = vld [vmem:[%s4433_s26] sm:$0xff]   ;;  %v91_v14 = vld [vmem:[%s4434_s29 + $0x11] sm:$0xff]  ;;  %874 = vperm.xlu0 %3197, %v64_v45  }
   0xc   :  { %v94_v11 = vpack.c.bf16 %v90_v10, %v89_v9  ;;  %v3208_v13 = vld [vmem:[%s4433_s26 + $0x8] sm:$0xff]   ;;  %v92_v15 = vld [vmem:[%s4434_s29 + $0x19] sm:$0xff]  ;;  %v3209_v17 = vld [vmem:[%s4433_s26 + $0x10] sm:$0xff]  }
   0xd   :  { %2466 = vmatpush3.bf16.msra.mxu0 %v3200_v2  ;;  %v95_v16 = vpack.c.bf16 %v92_v15, %v91_v14  ;;  %v3210_v18 = vld [vmem:[%s4433_s26 + $0x18] sm:$0xff]   ;;  %v93_v19 = vld [vmem:[%s4434_s29 + $0x21] sm:$0x3]  ;;  %v3212_v22 = vld [vmem:[%s4433_s26 + $0x28] sm:$0xff]  }
   0xe   :  { %2467 = vmatprep.subr.bf16.mxu0 %v3305_v0  ;;  %v96_v20 = vpack.c.bf16 %v93_v19, %v93_v19  ;;  %v3211_v21 = vld [vmem:[%s4433_s26 + $0x20] sm:$0xff]   ;;  %v3213_v23 = vld [vmem:[%s4433_s26 + $0x30] sm:$0xff]   ;;  %v3214_v24 = vld [vmem:[%s4433_s26 + $0x38] sm:$0xff]  }
   0xf   :  { %v65_v25 = vld [vmem:[%s4434_s29] sm:$0xff]  ;;  %v66_v26 = vld [vmem:[%s4434_s29 + $0x8] sm:$0xff]  ;;  %v67_v30 = vld [vmem:[%s4434_s29 + $0x10] sm:$0xff] }
  0x10   :  { %v70_v27 = vpack.c.bf16 %v66_v26, %v65_v25  ;;  %v3215_v28 = vld [vmem:[%s4433_s26 + $0x80] sm:$0xff]   ;;  %v3216_v29 = vld [vmem:[%s4433_s26 + $0x88] sm:$0xff]   ;;  %v68_v31 = vld [vmem:[%s4434_s29 + $0x18] sm:$0xff] }
  0x11   :  { %2468 = vmatpush3.bf16.msra.mxu0 %v3201_v3  ;;  %v71_v32 = vpack.c.bf16 %v68_v31, %v67_v30  ;;  %v3217_v33 = vld [vmem:[%s4433_s26 + $0x90] sm:$0xff]   ;;  %v3218_v34 = vld [vmem:[%s4433_s26 + $0x98] sm:$0xff]   ;;  %v69_v35 = vld [vmem:[%s4434_s29 + $0x20] sm:$0x3] }
  0x12   :  { %2469 = vmatprep.subr.bf16.mxu0 %v3305_v0  ;;  %v72_v36 = vpack.c.bf16 %v69_v35, %v69_v35  ;;  %v3219_v37 = vld [vmem:[%s4433_s26 + $0xa0] sm:$0xff]   ;;  %v3220_v38 = vld [vmem:[%s4433_s26 + $0xa8] sm:$0xff]   ;;  %v3221_v43 = vld [vmem:[%s4433_s26 + $0xb0] sm:$0xff]  }
  0x13   :  { %v3222_v46 = vld [vmem:[%s4433_s26 + $0xb8] sm:$0xff]   ;;  %v322_v47 = vld [vmem:[%s4434_s29 + $0x2] sm:$0xff]  ;;  %v323_v48 = vld [vmem:[%s4434_s29 + $0xa] sm:$0xff] }
  0x14   :  { %v327_v49 = vpack.c.bf16 %v323_v48, %v322_v47  ;;  %v324_v52 = vld [vmem:[%s4434_s29 + $0x12] sm:$0xff]  ;;  %v325_v53 = vld [vmem:[%s4434_s29 + $0x1a] sm:$0xff]  ;;  %v326_v57 = vld [vmem:[%s4434_s29 + $0x22] sm:$0x3] }
  0x15   :  { %2470 = vmatpush3.bf16.msra.mxu0 %v3202_v4  ;;  %v328_v54 = vpack.c.bf16 %v325_v53, %v324_v52  ;;  %v329_v58 = vpack.c.bf16 %v326_v57, %v326_v57  ;;  %v481_v1 = vld [vmem:[%s4415_s1 + $0x9] sm:$0xff]  ;;  %v3231_v3 = vld [vmem:[%s4413_s3] sm:$0xff]   ;;  %v3234_v9 = vld [vmem:[%s4413_s3 + $0x18] sm:$0xff]  }
  0x16   :  { %2471 = vmatprep.subr.bf16.mxu0 %v3305_v0  ;;  %v485_v2 = vpack.c.bf16 %v481_v1, %v480_v63  ;;  %v3232_v4 = vld [vmem:[%s4413_s3 + $0x8] sm:$0xff]   ;;  %v484_v10 = vld [vmem:[%s4415_s1 + $0x21] sm:$0x3]  ;;  %v3237_v14 = vld [vmem:[%s4413_s3 + $0x30] sm:$0xff]  }
  0x17   :  { %v3238_v15 = vld [vmem:[%s4413_s3 + $0x38] sm:$0xff]   ;;  %v3239_v19 = vld [vmem:[%s4413_s3 + $0x80] sm:$0xff]   ;;  %v3245_v30 = vld [vmem:[%s4413_s3 + $0xb0] sm:$0xff]  }
  0x18   :  { %v3242_v25 = vld [vmem:[%s4413_s3 + $0x98] sm:$0xff]   ;;  %v460_v26 = vld [vmem:[%s4415_s1 + $0x20] sm:$0x3]  ;;  %v896_v44 = vld [vmem:[%s4416_s5 + $0x10] sm:$0xff] }
  0x19   :  { %2472 = vmatpush3.bf16.msra.mxu0 %v3203_v5  ;;  %v482_v5 = vld [vmem:[%s4415_s1 + $0x11] sm:$0xff]  ;;  %v898_v47 = vld [vmem:[%s4416_s5 + $0x20] sm:$0xff]  ;;  %v899_v48 = vld [vmem:[%s4416_s5 + $0x28] sm:$0xff] }
  0x1a   :  { %2473 = vmatprep.subr.bf16.mxu0 %v3305_v0  ;;  %v3246_v31 = vld [vmem:[%s4413_s3 + $0xb8] sm:$0xff]   ;;  %v902_v53 = vld [vmem:[%s4416_s5 + $0x40] sm:$0xff] }
  0x1b   :  { %v715_v35 = vld [vmem:[%s4415_s1 + $0x12] sm:$0xff] }
  0x1c   :  { %v897_v45 = vld [vmem:[%s4416_s5 + $0x18] sm:$0xff] }
  0x1d   :  { %2474 = vmatpush3.bf16.msra.mxu0 %v3204_v6  ;;  %v483_v6 = vld [vmem:[%s4415_s1 + $0x19] sm:$0xff] }
  0x1e   :  { %2475 = vmatprep.subr.bf16.mxu0 %v3305_v0  ;;  %v905_v57 = vld [vmem:[%s4416_s5 + $0x58] sm:$0xff] }
  0x1f   :  { %v909_v63 = vld [vmem:[%s4416_s5 + $0x78] sm:$0xff] }
  0x21   :  { %2476 = vmatpush3.bf16.msra.mxu0 %v3205_v7  ;;  %v486_v7 = vpack.c.bf16 %v483_v6, %v482_v5 }
  0x22   :  { %2477 = vmatprep.subr.bf16.mxu0 %v3305_v0 }
  0x25   :  { %2478 = vmatpush3.bf16.msra.mxu0 %v3206_v8  ;;  %v3233_v8 = vld [vmem:[%s4413_s3 + $0x10] sm:$0xff]  }
  0x26   :  { %2491 = vmatprep.subr.bf16.mxu0 %v3305_v0 }
  0x28   :  { %2480 = vmatmul.mubr.bf16.vlgmr.msra.gmra.mrb[0].mxu0 %v94_v11  ;;  %v487_v11 = vpack.c.bf16 %v484_v10, %v484_v10 }
  0x29   :  { %2492 = vmatpush3.bf16.msra.mxu0 %v3207_v12  ;;  %2483 = vmatprep.mubr.msk.bf16.mxu0 %vm3306_vm0, %v3305_v0  ;;  %v3235_v12 = vld [vmem:[%s4413_s3 + $0x20] sm:$0xff]  }
  0x2a   :  { %2493 = vmatprep.subr.bf16.mxu0 %v3305_v0 }
  0x2d   :  { %2494 = vmatpush3.bf16.msra.mxu0 %v3208_v13  ;;  %v3236_v13 = vld [vmem:[%s4413_s3 + $0x28] sm:$0xff]  }
  0x2e   :  { %2495 = vmatprep.subr.bf16.mxu0 %v3305_v0 }
  0x30   :  { %2484 = vmatmul.mubr.bf16.gmra.mrb[4].mxu0 %v95_v16  ;;  %v456_v16 = vld [vmem:[%s4415_s1] sm:$0xff] }
  0x31   :  { %2496 = vmatpush3.bf16.msra.mxu0 %v3209_v17  ;;  %2487 = vmatprep.mubr.msk.bf16.mxu0 %vm3306_vm0, %v3305_v0  ;;  %v457_v17 = vld [vmem:[%s4415_s1 + $0x8] sm:$0xff] }
  0x32   :  { %2497 = vmatprep.subr.bf16.mxu0 %v3305_v0 }
  0x35   :  { %2498 = vmatpush3.bf16.msra.mxu0 %v3210_v18  ;;  %v461_v18 = vpack.c.bf16 %v457_v17, %v456_v16 }
  0x36   :  { %2499 = vmatprep.subr.bf16.mxu0 %v3305_v0 }
  0x38   :  { %2488 = vmatmul.mubr.bf16.gmra.mrb[8].mxu0 %v96_v20  ;;  %v3240_v20 = vld [vmem:[%s4413_s3 + $0x88] sm:$0xff]  }
  0x39   :  { %2500 = vmatpush3.bf16.msra.mxu0 %v3211_v21  ;;  %2507 = vmatprep.mubr.msk.bf16.mxu0 %vm3306_vm0, %v3305_v0  ;;  %v458_v21 = vld [vmem:[%s4415_s1 + $0x10] sm:$0xff] }
  0x3a   :  { %2501 = vmatprep.subr.bf16.mxu0 %v3305_v0 }
  0x3d   :  { %2502 = vmatpush3.bf16.msra.mxu0 %v3212_v22  ;;  %v459_v22 = vld [vmem:[%s4415_s1 + $0x18] sm:$0xff] }
  0x3e   :  { %2503 = vmatprep.subr.bf16.mxu0 %v3305_v0 }
  0x41   :  { %2504 = vmatpush3.bf16.msra.mxu0 %v3213_v23  ;;  %v462_v23 = vpack.c.bf16 %v459_v22, %v458_v21 }
  0x42   :  { %2505 = vmatprep.subr.bf16.mxu0 %v3305_v0 }
  0x45   :  { %2506 = vmatpush3.bf16.msra.mxu0 %v3214_v24  ;;  %v3241_v24 = vld [vmem:[%s4413_s3 + $0x90] sm:$0xff]  }
  0x46   :  { %2519 = vmatprep.subr.bf16.mxu0 %v3305_v0 }
  0x48   :  { %2508 = vmatmul.mubr.bf16.vlgmr.msra.gmra.mrb[0].mxu0 %v70_v27  ;;  %v463_v27 = vpack.c.bf16 %v460_v26, %v460_v26 }
  0x49   :  { %2520 = vmatpush3.bf16.msra.mxu0 %v3215_v28  ;;  %2511 = vmatprep.mubr.msk.bf16.mxu0 %vm3306_vm0, %v3305_v0  ;;  %v3243_v28 = vld [vmem:[%s4413_s3 + $0xa0] sm:$0xff]  }
  0x4a   :  { %2521 = vmatprep.subr.bf16.mxu0 %v3305_v0 }
  0x4d   :  { %2522 = vmatpush3.bf16.msra.mxu0 %v3216_v29  ;;  %v3244_v29 = vld [vmem:[%s4413_s3 + $0xa8] sm:$0xff]  }
  0x4e   :  { %2523 = vmatprep.subr.bf16.mxu0 %v3305_v0 }
  0x50   :  { %2512 = vmatmul.mubr.bf16.gmra.mrb[4].mxu0 %v71_v32  ;;  %v713_v32 = vld [vmem:[%s4415_s1 + $0x2] sm:$0xff] }
  0x51   :  { %2524 = vmatpush3.bf16.msra.mxu0 %v3217_v33  ;;  %2515 = vmatprep.mubr.msk.bf16.mxu0 %vm3306_vm0, %v3305_v0  ;;  %v714_v33 = vld [vmem:[%s4415_s1 + $0xa] sm:$0xff] }
  0x52   :  { %2525 = vmatprep.subr.bf16.mxu0 %v3305_v0 }
  0x55   :  { %2526 = vmatpush3.bf16.msra.mxu0 %v3218_v34  ;;  %v718_v34 = vpack.c.bf16 %v714_v33, %v713_v32 }
  0x56   :  { %2527 = vmatprep.subr.bf16.mxu0 %v3305_v0 }
  0x58   :  { %2516 = vmatmul.mubr.bf16.gmra.mrb[8].mxu0 %v72_v36  ;;  %v716_v36 = vld [vmem:[%s4415_s1 + $0x1a] sm:$0xff] }
  0x59   :  { %2528 = vmatpush3.bf16.msra.mxu0 %v3219_v37  ;;  %2535 = vmatprep.mubr.msk.bf16.mxu0 %vm3306_vm0, %v3305_v0  ;;  %v719_v37 = vpack.c.bf16 %v716_v36, %v715_v35  ;;  %v981_v35 = vlaneseq }
  0x5a   :  { %2529 = vmatprep.subr.bf16.mxu0 %v3305_v0 }
  0x5b   :  { %v982_v36 = vshrl.u32 %v981_v35, 7 }
  0x5d   :  { %2530 = vmatpush3.bf16.msra.mxu0 %v3220_v38  ;;  %v717_v38 = vld [vmem:[%s4415_s1 + $0x22] sm:$0x3] }
  0x5e   :  { %2531 = vmatprep.subr.bf16.mxu0 %v3305_v0  ;;  %v720_v39 = vpack.c.bf16 %v717_v38, %v717_v38 }
  0x61   :  { %2532 = vmatpush3.bf16.msra.mxu0 %v3221_v43  ;;  %v3308_v43 = vmov 0.0|0.0  }
  0x62   :  { %2533 = vmatprep.subr.bf16.mxu0 %v3305_v0  ;;  %2949 = vmatprep.subr.bf16.mxu1 %v3308_v43 }
  0x63   :  { %2951 = vmatpush3.bf16.msra.mxu1 %v3744_v42 }
  0x64   :  { %2952 = vmatprep.subr.bf16.mxu1 %v3308_v43 }
  0x65   :  { %2534 = vmatpush3.bf16.msra.mxu0 %v3222_v46  ;;  %v3758_v46 = vpack.c.bf16 %v897_v45, %v896_v44 }
  0x66   :  { %2547 = vmatprep.subr.bf16.mxu0 %v3305_v0 }
  0x67   :  { %2954 = vmatpush3.bf16.msra.mxu1 %v3758_v46 }
  0x68   :  { %2536 = vmatmul.mubr.bf16.vlgmr.msra.gmra.mrb[0].mxu0 %v327_v49  ;;  %2955 = vmatprep.subr.bf16.mxu1 %v3308_v43  ;;  %v3770_v49 = vpack.c.bf16 %v899_v48, %v898_v47 }
  0x69   :  { %2548 = vmatpush3.bf16.msra.mxu0 %v3223_v50  ;;  %2539 = vmatprep.mubr.msk.bf16.mxu0 %vm3306_vm0, %v3305_v0  ;;  %v900_v50 = vld [vmem:[%s4416_s5 + $0x30] sm:$0xff] }
  0x6a   :  { %2549 = vmatprep.subr.bf16.mxu0 %v3305_v0 }
  0x6b   :  { %2957 = vmatpush3.bf16.msra.mxu1 %v3770_v49 }
  0x6c   :  { %2958 = vmatprep.subr.bf16.mxu1 %v3308_v43 }
  0x6d   :  { %2550 = vmatpush3.bf16.msra.mxu0 %v3224_v51  ;;  %v901_v51 = vld [vmem:[%s4416_s5 + $0x38] sm:$0xff] }
  0x6e   :  { %2551 = vmatprep.subr.bf16.mxu0 %v3305_v0  ;;  %v3782_v52 = vpack.c.bf16 %v901_v51, %v900_v50 }
  0x70   :  { %2540 = vmatmul.mubr.bf16.gmra.mrb[4].mxu0 %v328_v54  ;;  %2960 = vmatpush3.bf16.msra.mxu1 %v3782_v52  ;;  %v903_v54 = vld [vmem:[%s4416_s5 + $0x48] sm:$0xff] }
  0x71   :  { %2552 = vmatpush3.bf16.msra.mxu0 %v3225_v55  ;;  %2543 = vmatprep.mubr.msk.bf16.mxu0 %vm3306_vm0, %v3305_v0  ;;  %v3794_v55 = vpack.c.bf16 %v903_v54, %v902_v53 }
  0x72   :  { %2553 = vmatprep.subr.bf16.mxu0 %v3305_v0  ;;  %2961 = vmatprep.subr.bf16.mxu1 %v3308_v43 }
  0x74   :  { %2963 = vmatpush3.bf16.msra.mxu1 %v3794_v55 }
  0x75   :  { %2554 = vmatpush3.bf16.msra.mxu0 %v3226_v56  ;;  %2964 = vmatprep.subr.bf16.mxu1 %v3308_v43  ;;  %v904_v56 = vld [vmem:[%s4416_s5 + $0x50] sm:$0xff] }
  0x76   :  { %2555 = vmatprep.subr.bf16.mxu0 %v3305_v0 }
  0x78   :  { %2544 = vmatmul.mubr.bf16.gmra.mrb[8].mxu0 %v329_v58  ;;  %v3806_v58 = vpack.c.bf16 %v905_v57, %v904_v56 }
  0x79   :  { %2556 = vmatpush3.bf16.msra.mxu0 %v3227_v59  ;;  %2563 = vmatprep.mubr.msk.bf16.mxu0 %vm3306_vm0, %v3305_v0  ;;  %v906_v59 = vld [vmem:[%s4416_s5 + $0x60] sm:$0xff] }
  0x7a   :  { %2557 = vmatprep.subr.bf16.mxu0 %v3305_v0  ;;  %2966 = vmatpush3.bf16.msra.mxu1 %v3806_v58 }
  0x7b   :  { %2967 = vmatprep.subr.bf16.mxu1 %v3308_v43 }
  0x7d   :  { %2558 = vmatpush3.bf16.msra.mxu0 %v3228_v60  ;;  %v907_v60 = vld [vmem:[%s4416_s5 + $0x68] sm:$0xff] }
  0x7e   :  { %2559 = vmatprep.subr.bf16.mxu0 %v3305_v0 }
  0x81   :  { %2560 = vmatpush3.bf16.msra.mxu0 %v3229_v61  ;;  %v3815_v61 = vpack.c.bf16 %v907_v60, %v906_v59 }
  0x82   :  { %2561 = vmatprep.subr.bf16.mxu0 %v3305_v0 }
  0x83   :  { %2969 = vmatpush3.bf16.msra.mxu1 %v3815_v61 }
  0x84   :  { %2970 = vmatprep.subr.bf16.mxu1 %v3308_v43 }
  0x85   :  { %2562 = vmatpush3.bf16.msra.mxu0 %v3230_v62  ;;  %v908_v62 = vld [vmem:[%s4416_s5 + $0x70] sm:$0xff] }
  0x86   :  { %2575 = vmatprep.subr.bf16.mxu0 %v3305_v0  ;;  %v3827_v1 = vpack.c.bf16 %v909_v63, %v908_v62 }
  0x88   :  { %2564 = vmatmul.mubr.bf16.vlgmr.msra.gmra.mrb[0].mxu0 %v485_v2  ;;  %2972 = vmatpush3.bf16.msra.mxu1 %v3827_v1  ;;  %v3836_v2 = vpop.permute.xlu0 %854 }
  0x89   :  { %2576 = vmatpush3.bf16.msra.mxu0 %v3231_v3  ;;  %2567 = vmatprep.mubr.msk.bf16.mxu0 %vm3306_vm0, %v3305_v0 }
  0x8a   :  { %2577 = vmatprep.subr.bf16.mxu0 %v3305_v0  ;;  %2973 = vmatprep.subr.bf16.mxu1 %v3308_v43 }
  0x8d   :  { %2578 = vmatpush3.bf16.msra.mxu0 %v3232_v4  ;;  %v3840_v4 = vpop.permute.xlu0 %859 }
  0x8e   :  { %2579 = vmatprep.subr.bf16.mxu0 %v3305_v0 }
  0x90   :  { %2568 = vmatmul.mubr.bf16.gmra.mrb[4].mxu0 %v486_v7  ;;  %v3844_v7 = vpop.permute.xlu1 %864 }
  0x91   :  { %2580 = vmatpush3.bf16.msra.mxu0 %v3233_v8  ;;  %2571 = vmatprep.mubr.msk.bf16.mxu0 %vm3306_vm0, %v3305_v0  ;;  %v3860_v21 = vpop.permute.xlu0 %874 }
  0x92   :  { %2581 = vmatprep.subr.bf16.mxu0 %v3305_v0 }
  0x95   :  { %2582 = vmatpush3.bf16.msra.mxu0 %v3234_v9 }
  0x96   :  { %2583 = vmatprep.subr.bf16.mxu0 %v3305_v0 }
  0x98   :  { %2572 = vmatmul.mubr.bf16.gmra.mrb[8].mxu0 %v487_v11 }
  0x99   :  { %2584 = vmatpush3.bf16.msra.mxu0 %v3235_v12  ;;  %2591 = vmatprep.mubr.msk.bf16.mxu0 %vm3306_vm0, %v3305_v0 }
  0x9a   :  { %2585 = vmatprep.subr.bf16.mxu0 %v3305_v0 }
  0x9d   :  { %2586 = vmatpush3.bf16.msra.mxu0 %v3236_v13  ;;  %v3852_v13 = vpop.permute.xlu1 %869 }
  0x9e   :  { %2587 = vmatprep.subr.bf16.mxu0 %v3305_v0 }
  0xa1   :  { %2588 = vmatpush3.bf16.msra.mxu0 %v3237_v14 }
  0xa2   :  { %2589 = vmatprep.subr.bf16.mxu0 %v3305_v0 }
  0xa5   :  { %2590 = vmatpush3.bf16.msra.mxu0 %v3238_v15 }
  0xa6   :  { %2603 = vmatprep.subr.bf16.mxu0 %v3305_v0 }
  0xa8   :  { %2592 = vmatmul.mubr.bf16.vlgmr.msra.gmra.mrb[0].mxu0 %v461_v18 }
  0xa9   :  { %2604 = vmatpush3.bf16.msra.mxu0 %v3239_v19  ;;  %2595 = vmatprep.mubr.msk.bf16.mxu0 %vm3306_vm0, %v3305_v0 }
  0xaa   :  { %2605 = vmatprep.subr.bf16.mxu0 %v3305_v0 }
  0xad   :  { %2606 = vmatpush3.bf16.msra.mxu0 %v3240_v20 }
  0xae   :  { %2607 = vmatprep.subr.bf16.mxu0 %v3305_v0 }
  0xb0   :  { %2596 = vmatmul.mubr.bf16.gmra.mrb[4].mxu0 %v462_v23 }
  0xb1   :  { %2608 = vmatpush3.bf16.msra.mxu0 %v3241_v24  ;;  %2599 = vmatprep.mubr.msk.bf16.mxu0 %vm3306_vm0, %v3305_v0 }
  0xb2   :  { %2609 = vmatprep.subr.bf16.mxu0 %v3305_v0 }
  0xb5   :  { %2610 = vmatpush3.bf16.msra.mxu0 %v3242_v25 }
  0xb6   :  { %2611 = vmatprep.subr.bf16.mxu0 %v3305_v0 }
  0xb8   :  { %2600 = vmatmul.mubr.bf16.gmra.mrb[8].mxu0 %v463_v27 }
  0xb9   :  { %2612 = vmatpush3.bf16.msra.mxu0 %v3243_v28  ;;  %2619 = vmatprep.mubr.msk.bf16.mxu0 %vm3306_vm0, %v3305_v0 }
  0xba   :  { %2613 = vmatprep.subr.bf16.mxu0 %v3305_v0 }
  0xbd   :  { %2614 = vmatpush3.bf16.msra.mxu0 %v3244_v29 }
  0xbe   :  { %2615 = vmatprep.subr.bf16.mxu0 %v3305_v0 }
  0xc1   :  { %2616 = vmatpush3.bf16.msra.mxu0 %v3245_v30 }
  0xc2   :  { %2617 = vmatprep.subr.bf16.mxu0 %v3305_v0 }
  0xc5   :  { %2618 = vmatpush3.bf16.msra.mxu0 %v3246_v31 }
  0xc6   :  { %3021 = vmatprep.subr.bf16.mxu0 %v3308_v43 }
  0xc8   :  { %2620 = vmatmul.mubr.bf16.vlgmr.msra.gmra.mrb[0].mxu0 %v718_v34 }
  0xc9   :  { %2623 = vmatprep.mubr.msk.bf16.mxu0 %vm3306_vm0, %v3305_v0  ;;  %3023 = vmatpush3.bf16.msra.mxu0 %v3744_v42 }
  0xca   :  { %3024 = vmatprep.subr.bf16.mxu0 %v3308_v43 }
  0xcd   :  { %3026 = vmatpush3.bf16.msra.mxu0 %v3758_v46 }
  0xce   :  { %3027 = vmatprep.subr.bf16.mxu0 %v3308_v43 }
  0xd0   :  { %2624 = vmatmul.mubr.bf16.gmra.mrb[4].mxu0 %v719_v37  ;;  %v3885_v37 = vsub.s32 0, %v982_v36  ;;  %v56_v36 = vld [vmem:[%s4418_s6] sm:$0x1] }
  0xd1   :  { %2627 = vmatprep.mubr.msk.bf16.mxu0 %vm3306_vm0, %v3305_v0  ;;  %3029 = vmatpush3.bf16.msra.mxu0 %v3770_v49 }
  0xd2   :  { %3030 = vmatprep.subr.bf16.mxu0 %v3308_v43 }
  0xd5   :  { %3032 = vmatpush3.bf16.msra.mxu0 %v3782_v52 }
  0xd6   :  { %3033 = vmatprep.subr.bf16.mxu0 %v3308_v43 }
  0xd8   :  { %2628 = vmatmul.mubr.bf16.gmra.mrb[8].mxu0 %v720_v39 }
  0xd9   :  { %2852 = vmatprep.mubr.msk.f32.mxu0 %vm3306_vm0, %v3305_v0  ;;  %3035 = vmatpush3.bf16.msra.mxu0 %v3794_v55 }
  0xda   :  { %3036 = vmatprep.subr.bf16.mxu0 %v3308_v43 }
  0xdd   :  { %3038 = vmatpush3.bf16.msra.mxu0 %v3806_v58 }
  0xde   :  { %3039 = vmatprep.subr.bf16.mxu0 %v3308_v43 }
  0xe1   :  { %3041 = vmatpush3.bf16.msra.mxu0 %v3815_v61 }
  0xe2   :  { %3042 = vmatprep.subr.bf16.mxu0 %v3308_v43 }
  0xe5   :  { %3044 = vmatpush3.bf16.msra.mxu0 %v3827_v1 }
  0xe6   :  { %3069 = vmatprep.subr.bf16.mxu0 %v3308_v43 }
 0x19b   :  { %v3838_v3 = vpop.f32.mrb[0].mxu0 }
 0x19c   :  { %v2621_v5 = vpop.f32.mrb[1].mxu0  ;;  %v877_v8 = vmul.f32 %v3836_v2, %v3838_v3 }
 0x19d   :  { %v3842_v6 = vpop.f32.mrb[2].mxu0 }
 0x19e   :  { %v878_v9 = vmul.f32 %v3840_v4, %v3842_v6  ;;  %v2622_v10 = vpop.f32.mrb[3].mxu0 }
 0x1a0   :  { %v882_v11 = vadd.f32 %v878_v9, %v877_v8 }
 0x1a3   :  { %v3850_v12 = vpop.f32.mrb[4].mxu0 }
 0x1a4   :  { %v879_v14 = vmul.f32 %v3844_v7, %v3850_v12  ;;  %v2625_v15 = vpop.f32.mrb[5].mxu0 }
 0x1a5   :  { %v3856_v16 = vpop.f32.mrb[6].mxu0 }
 0x1a6   :  { %v883_v17 = vadd.f32 %v882_v11, %v879_v14  ;;  %v880_v18 = vmul.f32 %v3852_v13, %v3856_v16  ;;  %v2626_v19 = vpop.f32.mrb[7].mxu0 }
 0x1a8   :  { %v884_v20 = vadd.f32 %v883_v17, %v880_v18 }
 0x1ab   :  { %v3862_v22 = vpop.f32.mrb[8].mxu0 }
 0x1ac   :  { %v881_v23 = vmul.f32 %v3860_v21, %v3862_v22  ;;  %v2629_v24 = vpop.f32.mrb[9].mxu0 }
 0x1ad   :  { %v839_v25 = vpop.f32.mrb[10].mxu0  ;;  %v3247_v24 = vld [vmem:[%s4417_s4 + $0x40] sm:$0xff]  }
 0x1ae   :  { %v886_v26 = vsel %vm885_vm1, %v881_v23, 0.0  ;;  %v2630_v27 = vpop.f32.mrb[11].mxu0  ;;  %v3248_v25 = vld [vmem:[%s4417_s4 + $0x48] sm:$0xff]  }
 0x1af   :  { %v887_v28 = vadd.f32 %v886_v26, %v884_v20  ;;  %v3249_v26 = vld [vmem:[%s4417_s4 + $0x50] sm:$0xff]   ;;  %v3250_v27 = vld [vmem:[%s4417_s4 + $0x58] sm:$0xff]  }
 0x1b1   :  { %v888_v29 = vrot.slane %v887_v28, 4 }
 0x1b3   :  { %v889_v30 = vadd.f32 %v888_v29, %v887_v28  ;;  %v3251_v28 = vld [vmem:[%s4417_s4 + $0x60] sm:$0xff]   ;;  %v3252_v29 = vld [vmem:[%s4417_s4 + $0x68] sm:$0xff]  }
 0x1b5   :  { %v890_v31 = vrot.slane %v889_v30, 2 }
 0x1b7   :  { %v891_v32 = vadd.f32 %v890_v31, %v889_v30  ;;  %v3253_v30 = vld [vmem:[%s4417_s4 + $0x70] sm:$0xff]   ;;  %v3254_v31 = vld [vmem:[%s4417_s4 + $0x78] sm:$0xff]  }
 0x1b9   :  { %v892_v33 = vrot.slane %v891_v32, 1 }
 0x1bb   :  { %v893_v34 = vadd.f32 %v892_v33, %v891_v32 }
 0x1bd   :  { %2664 = vmatmul.mubr.f32.vlgmr.msra.gmra.mrb[0].mxu1 %v893_v34 }
 0x1be   :  { %2975 = vmatpush3.bf16.msra.mxu1 %v3744_v42  ;;  %2698 = vmatprep.mubr.msk.f32.mxu1 %vm3306_vm0, %v3305_v0 }
 0x1bf   :  { %2976 = vmatprep.subr.bf16.mxu1 %v3308_v43 }
 0x1c2   :  { %2978 = vmatpush3.bf16.msra.mxu1 %v3758_v46 }
 0x1c3   :  { %2979 = vmatprep.subr.bf16.mxu1 %v3308_v43 }
 0x1c6   :  { %2981 = vmatpush3.bf16.msra.mxu1 %v3770_v49 }
 0x1c7   :  { %2982 = vmatprep.subr.bf16.mxu1 %v3308_v43 }
 0x1ca   :  { %2984 = vmatpush3.bf16.msra.mxu1 %v3782_v52 }
 0x1cb   :  { %2985 = vmatprep.subr.bf16.mxu1 %v3308_v43 }
 0x1ce   :  { %2987 = vmatpush3.bf16.msra.mxu1 %v3794_v55 }
 0x1cf   :  { %2988 = vmatprep.subr.bf16.mxu1 %v3308_v43 }
 0x1d2   :  { %2990 = vmatpush3.bf16.msra.mxu1 %v3806_v58 }
 0x1d3   :  { %2991 = vmatprep.subr.bf16.mxu1 %v3308_v43 }
 0x1d6   :  { %2993 = vmatpush3.bf16.msra.mxu1 %v3815_v61 }
 0x1d7   :  { %2994 = vmatprep.subr.bf16.mxu1 %v3308_v43 }
 0x1da   :  { %2996 = vmatpush3.bf16.msra.mxu1 %v3827_v1 }
 0x1db   :  { %2701 = vmatprep.subr.bf16.mxu1 %v3305_v0 }
 0x290   :  { %v976_v38 = vpop.f32.mrb[0].mxu1 }
 0x291   :  { %v3887_v39 = vmul.f32 0.001953125, %v976_v38  ;;  %v2665_v40 = vpop.f32.mrb[1].mxu1 }
 0x293   :  { %v984_v41 = vrot.slane %v3887_v39, %v3885_v37 }
 0x295   :  { %v985_v44 = vsub.f32 %v3838_v3, %v984_v41  ;;  %v986_v45 = vsub.f32 %v3842_v6, %v984_v41  ;;  %v987_v47 = vsub.f32 %v3850_v12, %v984_v41  ;;  %v988_v48 = vsub.f32 %v3856_v16, %v984_v41 }
 0x296   :  { %v989_v50 = vsub.f32 %v3862_v22, %v984_v41  ;;  %v57_v41 = vld [vmem:[%s4419_s7] sm:$0x1] }
 0x297   :  { %v990_v51 = vmul.f32 %v985_v44, %v3836_v2  ;;  %v991_v53 = vmul.f32 %v986_v45, %v3840_v4  ;;  %v992_v54 = vmul.f32 %v987_v47, %v3844_v7  ;;  %v993_v57 = vmul.f32 %v988_v48, %v3852_v13 }
 0x298   :  { %v994_v56 = vmul.f32 %v989_v50, %v3860_v21 }
 0x299   :  { %v995_v59 = vmul.f32 %v990_v51, %v990_v51  ;;  %v996_v60 = vmul.f32 %v991_v53, %v991_v53  ;;  %v997_v62 = vmul.f32 %v992_v54, %v992_v54  ;;  %v998_v8 = vmul.f32 %v993_v57, %v993_v57 }
 0x29a   :  { %v999_v5 = vmul.f32 %v994_v56, %v994_v56 }
 0x29b   :  { %v1000_v63 = vadd.f32 %v996_v60, %v995_v59 }
 0x29c   :  { %v1003_v11 = vsel %vm885_vm1, %v999_v5, 0.0 }
 0x29d   :  { %v1001_v9 = vadd.f32 %v1000_v63, %v997_v62 }
 0x29f   :  { %v1002_v10 = vadd.f32 %v1001_v9, %v998_v8 }
 0x2a1   :  { %v1004_v14 = vadd.f32 %v1003_v11, %v1002_v10  ;;  %v3255_v11 = vld [vmem:[%s4417_s4] sm:$0xff]  }
 0x2a3   :  { %v1005_v15 = vrot.slane %v1004_v14, 4 }
 0x2a5   :  { %v1006_v17 = vadd.f32 %v1005_v15, %v1004_v14 }
 0x2a7   :  { %v1007_v18 = vrot.slane %v1006_v17, 2 }
 0x2a9   :  { %v1008_v19 = vadd.f32 %v1007_v18, %v1006_v17  ;;  %v3256_v17 = vld [vmem:[%s4417_s4 + $0x8] sm:$0xff]   ;;  %v3257_v18 = vld [vmem:[%s4417_s4 + $0x10] sm:$0xff]  }
 0x2ab   :  { %v1009_v20 = vrot.slane %v1008_v19, 1 }
 0x2ad   :  { %v1010_v23 = vadd.f32 %v1009_v20, %v1008_v19  ;;  %v3258_v19 = vld [vmem:[%s4417_s4 + $0x18] sm:$0xff]  }
 0x2af   :  { %2699 = vmatmul.mubr.f32.vlgmr.msra.gmra.mrb[2].mxu1 %v1010_v23  ;;  %v3259_v23 = vld [vmem:[%s4417_s4 + $0x20] sm:$0xff]  }
 0x2b0   :  { %2717 = vmatprep.mubr.msk.bf16.mxu1 %vm3306_vm0, %v3305_v0  ;;  %2702 = vmatpush3.bf16.msra.mxu1 %v3247_v24 }
 0x2b1   :  { %2703 = vmatprep.subr.bf16.mxu1 %v3305_v0 }
 0x2b4   :  { %2704 = vmatpush3.bf16.msra.mxu1 %v3248_v25  ;;  %v3260_v25 = vld [vmem:[%s4417_s4 + $0x28] sm:$0xff]  }
 0x2b5   :  { %2705 = vmatprep.subr.bf16.mxu1 %v3305_v0 }
 0x2b8   :  { %2706 = vmatpush3.bf16.msra.mxu1 %v3249_v26  ;;  %v3261_v26 = vld [vmem:[%s4417_s4 + $0x30] sm:$0xff]  }
 0x2b9   :  { %2707 = vmatprep.subr.bf16.mxu1 %v3305_v0 }
 0x2bc   :  { %2708 = vmatpush3.bf16.msra.mxu1 %v3250_v27  ;;  %v3262_v27 = vld [vmem:[%s4417_s4 + $0x38] sm:$0xff]  }
 0x2bd   :  { %2709 = vmatprep.subr.bf16.mxu1 %v3305_v0 }
 0x2c0   :  { %2710 = vmatpush3.bf16.msra.mxu1 %v3251_v28 }
 0x2c1   :  { %2711 = vmatprep.subr.bf16.mxu1 %v3305_v0 }
 0x2c4   :  { %2712 = vmatpush3.bf16.msra.mxu1 %v3252_v29 }
 0x2c5   :  { %2713 = vmatprep.subr.bf16.mxu1 %v3305_v0 }
 0x2c8   :  { %2714 = vmatpush3.bf16.msra.mxu1 %v3253_v30  ;;  %v3263_v30 = vld [vmem:[%s4417_s4 + $0x80] sm:$0xff]  }
 0x2c9   :  { %2715 = vmatprep.subr.bf16.mxu1 %v3305_v0 }
 0x2cc   :  { %2716 = vmatpush3.bf16.msra.mxu1 %v3254_v31 }
 0x2cd   :  { %2729 = vmatprep.subr.bf16.mxu1 %v3305_v0 }
 0x382   :  { %v1077_v32 = vpop.f32.mrb[2].mxu1 }
 0x383   :  { %v1081_v33 = vmul.f32 0.001953125, %v1077_v32  ;;  %v2700_v34 = vpop.f32.mrb[3].mxu1  ;;  %v3264_v32 = vld [vmem:[%s4417_s4 + $0x88] sm:$0xff]  }
 0x385   :  { %v1082_v35 = vadd.f32 1e-05, %v1081_v33 }
 0x387   :  { %3271 = vrsqrt.f32 %v1082_v35  ;;  %v3265_v35 = vld [vmem:[%s4417_s4 + $0x90] sm:$0xff]  }
 0x391   :  { %v3272_v38 = vpop.eup %3271 }
 0x392   :  { %v1084_v40 = vmul.f32 %v3272_v38, %v56_v36  ;;  %v3266_v38 = vld [vmem:[%s4417_s4 + $0x98] sm:$0xff]  }
 0x394   :  { %v1085_v44 = vmul.f32 %v1084_v40, %v3887_v39  ;;  %v1091_v45 = vrot.slane %v1084_v40, %v3885_v37 }
 0x396   :  { %v1086_v47 = vsub.f32 %v57_v41, %v1085_v44  ;;  %v1093_v48 = vmul.f32 %v1091_v45, %v3838_v3  ;;  %v1094_v50 = vmul.f32 %v1091_v45, %v3842_v6  ;;  %v1095_v51 = vmul.f32 %v1091_v45, %v3850_v12  ;;  %v3267_v41 = vld [vmem:[%s4417_s4 + $0xa0] sm:$0xff]  }
 0x397   :  { %v1096_v53 = vmul.f32 %v1091_v45, %v3856_v16  ;;  %v1097_v54 = vmul.f32 %v1091_v45, %v3862_v22  ;;  %v3268_v45 = vld [vmem:[%s4417_s4 + $0xa8] sm:$0xff]  }
 0x398   :  { %v1102_v56 = vrot.slane %v1086_v47, %v3885_v37  ;;  %v3269_v47 = vld [vmem:[%s4417_s4 + $0xb0] sm:$0xff]  }
 0x39a   :  { %v1104_v57 = vadd.f32 %v1102_v56, %v1093_v48  ;;  %v1105_v59 = vadd.f32 %v1102_v56, %v1094_v50  ;;  %v1106_v60 = vadd.f32 %v1102_v56, %v1095_v51  ;;  %v1107_v62 = vadd.f32 %v1102_v56, %v1096_v53  ;;  %v3270_v48 = vld [vmem:[%s4417_s4 + $0xb8] sm:$0xff]  }
 0x39b   :  { %v1108_v39 = vadd.f32 %v1102_v56, %v1097_v54 }
 0x39c   :  { %v1109_v63 = vmax.f32 %v1104_v57, 0.0  ;;  %v1110_v5 = vmax.f32 %v1105_v59, 0.0  ;;  %v1111_v8 = vmax.f32 %v1106_v60, 0.0  ;;  %v1112_v9 = vmax.f32 %v1107_v62, 0.0 }
 0x39d   :  { %v1113_v3 = vmax.f32 %v1108_v39, 0.0 }
 0x39e   :  { %v1114_v6 = vmul.f32 %v1109_v63, %v3836_v2  ;;  %v1115_v12 = vmul.f32 %v1110_v5, %v3840_v4  ;;  %v1116_v16 = vmul.f32 %v1111_v8, %v3844_v7  ;;  %v1117_v22 = vmul.f32 %v1112_v9, %v3852_v13 }
 0x39f   :  { %v1118_v10 = vmul.f32 %v1113_v3, %v3860_v21 }
 0x3a0   :  { %1121 = vst [vmem:[#allocation2 + $0x1] sm:$0xff] %v1114_v6  ;;  %1122 = vst [vmem:[#allocation2 + $0x9] sm:$0xff] %v1115_v12  ;;  %v1155_v14 = vpack.c.bf16 %v1115_v12, %v1114_v6  ;;  %v1156_v15 = vpack.c.bf16 %v1117_v22, %v1116_v16 }
 0x3a1   :  { %1123 = vst [vmem:[#allocation2 + $0x11] sm:$0xff] %v1116_v16  ;;  %1124 = vst [vmem:[#allocation2 + $0x19] sm:$0xff] %v1117_v22 }
 0x3a2   :  { %1125 = vst [vmem:[#allocation2 + $0x21] sm:$0x3] %v1118_v10  ;;  %2718 = vmatmul.mubr.bf16.vlgmr.msra.gmra.mrb[4].mxu1 %v1155_v14 }
 0x3a3   :  { %2730 = vmatpush3.bf16.msra.mxu1 %v3255_v11  ;;  %2721 = vmatprep.mubr.msk.bf16.mxu1 %vm3306_vm0, %v3305_v0 }
 0x3a4   :  { %2731 = vmatprep.subr.bf16.mxu1 %v3305_v0 }
 0x3a7   :  { %2732 = vmatpush3.bf16.msra.mxu1 %v3256_v17  ;;  %v1126_v28 = vld [vmem:[#allocation2] sm:$0xff]  ;;  %v1127_v29 = vld [vmem:[#allocation2 + $0x8] sm:$0xff] }
 0x3a8   :  { %2733 = vmatprep.subr.bf16.mxu1 %v3305_v0  ;;  %v1131_v31 = vpack.c.bf16 %v1127_v29, %v1126_v28  ;;  %v1128_v33 = vld [vmem:[#allocation2 + $0x10] sm:$0xff]  ;;  %v1129_v34 = vld [vmem:[#allocation2 + $0x18] sm:$0xff]  ;;  %v1383_v50 = vld [vmem:[#allocation2 + $0x2] sm:$0xff] }
 0x3a9   :  { %v1154_v20 = vld [vmem:[#allocation2 + $0x21] sm:$0x3]  ;;  %v1132_v36 = vpack.c.bf16 %v1129_v34, %v1128_v33  ;;  %v1384_v51 = vld [vmem:[#allocation2 + $0xa] sm:$0xff]  ;;  %v1385_v54 = vld [vmem:[#allocation2 + $0x12] sm:$0xff] }
 0x3aa   :  { %2722 = vmatmul.mubr.bf16.gmra.mrb[8].mxu1 %v1156_v15  ;;  %v1157_v24 = vpack.c.bf16 %v1154_v20, %v1154_v20  ;;  %v1130_v40 = vld [vmem:[#allocation2 + $0x20] sm:$0x3]  ;;  %v1388_v53 = vpack.c.bf16 %v1384_v51, %v1383_v50  ;;  %v1387_v59 = vld [vmem:[#allocation2 + $0x22] sm:$0x3] }
 0x3ab   :  { %2734 = vmatpush3.bf16.msra.mxu1 %v3257_v18  ;;  %2725 = vmatprep.mubr.msk.bf16.mxu1 %vm3306_vm0, %v3305_v0  ;;  %v1133_v44 = vpack.c.bf16 %v1130_v40, %v1130_v40  ;;  %v1386_v56 = vld [vmem:[#allocation2 + $0x1a] sm:$0xff] }
 0x3ac   :  { %2735 = vmatprep.subr.bf16.mxu1 %v3305_v0  ;;  %v1389_v57 = vpack.c.bf16 %v1386_v56, %v1385_v54 }
 0x3af   :  { %2736 = vmatpush3.bf16.msra.mxu1 %v3258_v19 }
 0x3b0   :  { %2737 = vmatprep.subr.bf16.mxu1 %v3305_v0 }
 0x3b2   :  { %2726 = vmatmul.mubr.bf16.gmra.mrb[12].mxu1 %v1157_v24  ;;  %v1758_v24 = vld [vmem:[%s4420_s11] sm:$0xff] }
 0x3b3   :  { %2738 = vmatpush3.bf16.msra.mxu1 %v3259_v23  ;;  %2745 = vmatprep.mubr.msk.bf16.mxu1 %vm3306_vm0, %v3305_v0 }
 0x3b4   :  { %2739 = vmatprep.subr.bf16.mxu1 %v3305_v0 }
 0x3b7   :  { %2740 = vmatpush3.bf16.msra.mxu1 %v3260_v25  ;;  %v1759_v25 = vld [vmem:[%s4420_s11 + $0x8] sm:$0xff] }
 0x3b8   :  { %2741 = vmatprep.subr.bf16.mxu1 %v3305_v0 }
 0x3bb   :  { %2742 = vmatpush3.bf16.msra.mxu1 %v3261_v26  ;;  %v3046_v26 = vpack.c.bf16 %v1759_v25, %v1758_v24  ;;  %v1780_v24 = vld [vmem:[%s4421_s12 + $0x30] sm:$0xff]  ;;  %v1781_v25 = vld [vmem:[%s4421_s12 + $0x38] sm:$0xff] }
 0x3bc   :  { %2743 = vmatprep.subr.bf16.mxu1 %v3305_v0 }
 0x3bf   :  { %2744 = vmatpush3.bf16.msra.mxu1 %v3262_v27 }
 0x3c0   :  { %2757 = vmatprep.subr.bf16.mxu1 %v3305_v0 }
 0x3c2   :  { %2746 = vmatmul.mubr.bf16.vlgmr.msra.gmra.mrb[4].mxu1 %v1131_v31 }
 0x3c3   :  { %2758 = vmatpush3.bf16.msra.mxu1 %v3263_v30  ;;  %2749 = vmatprep.mubr.msk.bf16.mxu1 %vm3306_vm0, %v3305_v0 }
 0x3c4   :  { %2759 = vmatprep.subr.bf16.mxu1 %v3305_v0 }
 0x3c7   :  { %2760 = vmatpush3.bf16.msra.mxu1 %v3264_v32 }
 0x3c8   :  { %2761 = vmatprep.subr.bf16.mxu1 %v3305_v0 }
 0x3ca   :  { %2750 = vmatmul.mubr.bf16.gmra.mrb[8].mxu1 %v1132_v36 }
 0x3cb   :  { %2762 = vmatpush3.bf16.msra.mxu1 %v3265_v35  ;;  %2753 = vmatprep.mubr.msk.bf16.mxu1 %vm3306_vm0, %v3305_v0 }
 0x3cc   :  { %2763 = vmatprep.subr.bf16.mxu1 %v3305_v0 }
 0x3cf   :  { %2764 = vmatpush3.bf16.msra.mxu1 %v3266_v38 }
 0x3d0   :  { %2765 = vmatprep.subr.bf16.mxu1 %v3305_v0 }
 0x3d2   :  { %2754 = vmatmul.mubr.bf16.gmra.mrb[12].mxu1 %v1133_v44 }
 0x3d3   :  { %2766 = vmatpush3.bf16.msra.mxu1 %v3267_v41  ;;  %2773 = vmatprep.mubr.msk.bf16.mxu1 %vm3306_vm0, %v3305_v0 }
 0x3d4   :  { %2767 = vmatprep.subr.bf16.mxu1 %v3305_v0 }
 0x3d7   :  { %2768 = vmatpush3.bf16.msra.mxu1 %v3268_v45 }
 0x3d8   :  { %2769 = vmatprep.subr.bf16.mxu1 %v3305_v0 }
 0x3db   :  { %2770 = vmatpush3.bf16.msra.mxu1 %v3269_v47 }
 0x3dc   :  { %2771 = vmatprep.subr.bf16.mxu1 %v3305_v0 }
 0x3df   :  { %2772 = vmatpush3.bf16.msra.mxu1 %v3270_v48 }
 0x3e0   :  { %2997 = vmatprep.subr.bf16.mxu1 %v3308_v43 }
 0x3e2   :  { %2774 = vmatmul.mubr.bf16.vlgmr.msra.gmra.mrb[4].mxu1 %v1388_v53 }
 0x3e3   :  { %2777 = vmatprep.mubr.msk.bf16.mxu1 %vm3306_vm0, %v3305_v0  ;;  %2999 = vmatpush3.bf16.msra.mxu1 %v3744_v42  ;;  %v1390_v42 = vpack.c.bf16 %v1387_v59, %v1387_v59 }
 0x3e4   :  { %3000 = vmatprep.subr.bf16.mxu1 %v3308_v43 }
 0x3e7   :  { %3002 = vmatpush3.bf16.msra.mxu1 %v3758_v46 }
 0x3e8   :  { %3003 = vmatprep.subr.bf16.mxu1 %v3308_v43 }
 0x3ea   :  { %2778 = vmatmul.mubr.bf16.gmra.mrb[8].mxu1 %v1389_v57 }
 0x3eb   :  { %2781 = vmatprep.mubr.msk.bf16.mxu1 %vm3306_vm0, %v3305_v0  ;;  %3005 = vmatpush3.bf16.msra.mxu1 %v3770_v49 }
 0x3ec   :  { %3006 = vmatprep.subr.bf16.mxu1 %v3308_v43 }
 0x3ef   :  { %3008 = vmatpush3.bf16.msra.mxu1 %v3782_v52 }
 0x3f0   :  { %3009 = vmatprep.subr.bf16.mxu1 %v3308_v43 }
 0x3f2   :  { %2782 = vmatmul.mubr.bf16.gmra.mrb[12].mxu1 %v1390_v42 }
 0x3f3   :  { %3011 = vmatpush3.bf16.msra.mxu1 %v3794_v55  ;;  %2817 = vmatprep.mubr.msk.f32.mxu1 %vm3306_vm0, %v3305_v0 }
 0x3f4   :  { %3012 = vmatprep.subr.bf16.mxu1 %v3308_v43 }
 0x3f7   :  { %3014 = vmatpush3.bf16.msra.mxu1 %v3806_v58 }
 0x3f8   :  { %3015 = vmatprep.subr.bf16.mxu1 %v3308_v43 }
 0x3fb   :  { %3017 = vmatpush3.bf16.msra.mxu1 %v3815_v61 }
 0x3fc   :  { %3018 = vmatprep.subr.bf16.mxu1 %v3308_v43 }
 0x3ff   :  { %3020 = vmatpush3.bf16.msra.mxu1 %v3827_v1 }
 0x400   :  { %3045 = vmatprep.subr.bf16.mxu1 %v3308_v43 }
 0x4b5   :  { %v4053_v46 = vpop.f32.mrb[4].mxu1 }
 0x4b6   :  { %v2775_v49 = vpop.f32.mrb[5].mxu1  ;;  %v1517_v55 = vmul.f32 %v4053_v46, %v3836_v2 }
 0x4b7   :  { %v4055_v52 = vpop.f32.mrb[6].mxu1 }
 0x4b8   :  { %v1518_v58 = vmul.f32 %v4055_v52, %v3840_v4  ;;  %v2776_v60 = vpop.f32.mrb[7].mxu1 }
 0x4b9   :  { %v1774_v60 = vld [vmem:[%s4421_s12] sm:$0xff] }
 0x4ba   :  { %v1522_v62 = vadd.f32 %v1518_v58, %v1517_v55 }
 0x4bd   :  { %v4061_v61 = vpop.f32.mrb[8].mxu1 }
 0x4be   :  { %v1519_v1 = vmul.f32 %v4061_v61, %v3844_v7  ;;  %v2779_v39 = vpop.f32.mrb[9].mxu1 }
 0x4bf   :  { %v4065_v63 = vpop.f32.mrb[10].mxu1 }
 0x4c0   :  { %v1523_v5 = vadd.f32 %v1522_v62, %v1519_v1  ;;  %v1520_v8 = vmul.f32 %v4065_v63, %v3852_v13  ;;  %v2780_v9 = vpop.f32.mrb[11].mxu1  ;;  %v1775_v62 = vld [vmem:[%s4421_s12 + $0x8] sm:$0xff] }
 0x4c1   :  { %v4104_v39 = vpack.c.bf16 %v1775_v62, %v1774_v60  ;;  %v1761_v9 = vld [vmem:[%s4420_s11 + $0x18] sm:$0xff]  ;;  %v58_v62 = vld [vmem:[%s4422_s8] sm:$0x1] }
 0x4c2   :  { %v1524_v3 = vadd.f32 %v1523_v5, %v1520_v8  ;;  %v1760_v8 = vld [vmem:[%s4420_s11 + $0x10] sm:$0xff] }
 0x4c5   :  { %v4069_v6 = vpop.f32.mrb[12].mxu1 }
 0x4c6   :  { %v1521_v12 = vmul.f32 %v4069_v6, %v3860_v21  ;;  %v2783_v16 = vpop.f32.mrb[13].mxu1 }
 0x4c7   :  { %v1509_v22 = vpop.f32.mrb[14].mxu1  ;;  %v1777_v16 = vld [vmem:[%s4421_s12 + $0x18] sm:$0xff] }
 0x4c8   :  { %v1525_v10 = vsel %vm885_vm1, %v1521_v12, 0.0  ;;  %v2784_v11 = vpop.f32.mrb[15].mxu1  ;;  %v1776_v12 = vld [vmem:[%s4421_s12 + $0x10] sm:$0xff] }
 0x4c9   :  { %v1526_v14 = vadd.f32 %v1525_v10, %v1524_v3  ;;  %v3049_v3 = vpack.c.bf16 %v1761_v9, %v1760_v8  ;;  %v4122_v22 = vpack.c.bf16 %v1777_v16, %v1776_v12  ;;  %v1762_v10 = vld [vmem:[%s4420_s11 + $0x20] sm:$0xff]  ;;  %v1763_v11 = vld [vmem:[%s4420_s11 + $0x28] sm:$0xff] }
 0x4ca   :  { %v59_v8 = vld [vmem:[%s4423_s9] sm:$0x1] }
 0x4cb   :  { %v1527_v15 = vrot.slane %v1526_v14, 4 }
 0x4cd   :  { %v1528_v17 = vadd.f32 %v1527_v15, %v1526_v14  ;;  %v3052_v14 = vpack.c.bf16 %v1763_v11, %v1762_v10  ;;  %v1778_v15 = vld [vmem:[%s4421_s12 + $0x20] sm:$0xff] }
 0x4cf   :  { %v1529_v18 = vrot.slane %v1528_v17, 2 }
 0x4d1   :  { %v1530_v19 = vadd.f32 %v1529_v18, %v1528_v17  ;;  %v1779_v17 = vld [vmem:[%s4421_s12 + $0x28] sm:$0xff] }
 0x4d2   :  { %v4139_v18 = vpack.c.bf16 %v1779_v17, %v1778_v15 }
 0x4d3   :  { %v1531_v20 = vrot.slane %v1530_v19, 1 }
 0x4d5   :  { %v1532_v23 = vadd.f32 %v1531_v20, %v1530_v19  ;;  %v1764_v19 = vld [vmem:[%s4420_s11 + $0x30] sm:$0xff]  ;;  %v1765_v20 = vld [vmem:[%s4420_s11 + $0x38] sm:$0xff] }
 0x4d7   :  { %2818 = vmatmul.mubr.f32.vlgmr.msra.gmra.mrb[16].mxu1 %v1532_v23  ;;  %v3055_v23 = vpack.c.bf16 %v1765_v20, %v1764_v19 }
 0x4d8   :  { %2887 = vmatprep.mubr.msk.f32.mxu1 %vm3306_vm0, %v3305_v0  ;;  %3047 = vmatpush3.bf16.msra.mxu1 %v3046_v26  ;;  %v4156_v26 = vpack.c.bf16 %v1781_v25, %v1780_v24 }
 0x4d9   :  { %3048 = vmatprep.subr.bf16.mxu1 %v3308_v43 }
 0x4dc   :  { %3050 = vmatpush3.bf16.msra.mxu1 %v3049_v3 }
 0x4dd   :  { %3051 = vmatprep.subr.bf16.mxu1 %v3308_v43 }
 0x4e0   :  { %3053 = vmatpush3.bf16.msra.mxu1 %v3052_v14 }
 0x4e1   :  { %3054 = vmatprep.subr.bf16.mxu1 %v3308_v43 }
 0x4e4   :  { %3056 = vmatpush3.bf16.msra.mxu1 %v3055_v23 }
 0x4e5   :  { %3057 = vmatprep.subr.bf16.mxu1 %v3308_v43 }
 0x5aa   :  { %v1615_v27 = vpop.f32.mrb[16].mxu1 }
 0x5ab   :  { %v4083_v28 = vmul.f32 0.001953125, %v1615_v27  ;;  %v2819_v29 = vpop.f32.mrb[17].mxu1  ;;  %v1766_v27 = vld [vmem:[%s4420_s11 + $0x40] sm:$0xff] }
 0x5ac   :  { %v1767_v29 = vld [vmem:[%s4420_s11 + $0x48] sm:$0xff] }
 0x5ad   :  { %v1623_v30 = vrot.slane %v4083_v28, %v3885_v37 }
 0x5af   :  { %v1624_v31 = vsub.f32 %v4053_v46, %v1623_v30  ;;  %v1625_v32 = vsub.f32 %v4055_v52, %v1623_v30  ;;  %v1626_v33 = vsub.f32 %v4061_v61, %v1623_v30  ;;  %v1627_v34 = vsub.f32 %v4065_v63, %v1623_v30 }
 0x5b0   :  { %v1628_v35 = vsub.f32 %v4069_v6, %v1623_v30  ;;  %v3058_v30 = vpack.c.bf16 %v1767_v29, %v1766_v27 }
 0x5b1   :  { %v1629_v36 = vmul.f32 %v1624_v31, %v3836_v2  ;;  %v1630_v38 = vmul.f32 %v1625_v32, %v3840_v4  ;;  %v1631_v40 = vmul.f32 %v1626_v33, %v3844_v7  ;;  %v1632_v44 = vmul.f32 %v1627_v34, %v3852_v13  ;;  %v1782_v31 = vld [vmem:[%s4421_s12 + $0x40] sm:$0xff]  ;;  %v1783_v32 = vld [vmem:[%s4421_s12 + $0x48] sm:$0xff]  ;;  %v1768_v34 = vld [vmem:[%s4420_s11 + $0x50] sm:$0xff] }
 0x5b2   :  { %v1633_v41 = vmul.f32 %v1628_v35, %v3860_v21  ;;  %v4173_v33 = vpack.c.bf16 %v1783_v32, %v1782_v31  ;;  %3059 = vmatpush3.bf16.msra.mxu1 %v3058_v30  ;;  %v1769_v35 = vld [vmem:[%s4420_s11 + $0x58] sm:$0xff] }
 0x5b3   :  { %v1634_v45 = vmul.f32 %v1629_v36, %v1629_v36  ;;  %v1635_v47 = vmul.f32 %v1630_v38, %v1630_v38  ;;  %v1636_v48 = vmul.f32 %v1631_v40, %v1631_v40  ;;  %v1637_v53 = vmul.f32 %v1632_v44, %v1632_v44  ;;  %3060 = vmatprep.subr.bf16.mxu1 %v3308_v43  ;;  %v1784_v38 = vld [vmem:[%s4421_s12 + $0x50] sm:$0xff]  ;;  %v1785_v40 = vld [vmem:[%s4421_s12 + $0x58] sm:$0xff]  ;;  %v1770_v44 = vld [vmem:[%s4420_s11 + $0x60] sm:$0xff] }
 0x5b4   :  { %v1638_v51 = vmul.f32 %v1633_v41, %v1633_v41  ;;  %v3061_v36 = vpack.c.bf16 %v1769_v35, %v1768_v34  ;;  %v4190_v41 = vpack.c.bf16 %v1785_v40, %v1784_v38 }
 0x5b5   :  { %v1639_v50 = vadd.f32 %v1635_v47, %v1634_v45  ;;  %v1771_v45 = vld [vmem:[%s4420_s11 + $0x68] sm:$0xff] }
 0x5b6   :  { %v1642_v57 = vsel %vm885_vm1, %v1638_v51, 0.0  ;;  %3062 = vmatpush3.bf16.msra.mxu1 %v3061_v36  ;;  %v3064_v47 = vpack.c.bf16 %v1771_v45, %v1770_v44  ;;  %v1772_v51 = vld [vmem:[%s4420_s11 + $0x70] sm:$0xff] }
 0x5b7   :  { %v1640_v54 = vadd.f32 %v1639_v50, %v1636_v48  ;;  %3063 = vmatprep.subr.bf16.mxu1 %v3308_v43  ;;  %v1786_v48 = vld [vmem:[%s4421_s12 + $0x60] sm:$0xff]  ;;  %v1787_v50 = vld [vmem:[%s4421_s12 + $0x68] sm:$0xff] }
 0x5b9   :  { %v1641_v56 = vadd.f32 %v1640_v54, %v1637_v53  ;;  %v4210_v53 = vpack.c.bf16 %v1787_v50, %v1786_v48  ;;  %v1773_v54 = vld [vmem:[%s4420_s11 + $0x78] sm:$0xff] }
 0x5ba   :  { %3065 = vmatpush3.bf16.msra.mxu1 %v3064_v47 }
 0x5bb   :  { %v1643_v59 = vadd.f32 %v1642_v57, %v1641_v56  ;;  %v1788_v56 = vld [vmem:[%s4421_s12 + $0x70] sm:$0xff]  ;;  %v1789_v57 = vld [vmem:[%s4421_s12 + $0x78] sm:$0xff]  ;;  %3066 = vmatprep.subr.bf16.mxu1 %v3308_v43 }
 0x5bd   :  { %v1644_v42 = vrot.slane %v1643_v59, 4 }
 0x5bf   :  { %v1645_v49 = vadd.f32 %v1644_v42, %v1643_v59  ;;  %v3067_v59 = vpack.c.bf16 %v1773_v54, %v1772_v51  ;;  %v4223_v42 = vpack.c.bf16 %v1789_v57, %v1788_v56 }
 0x5c1   :  { %v1646_v55 = vrot.slane %v1645_v49, 2  ;;  %3068 = vmatpush3.bf16.msra.mxu1 %v3067_v59 }
 0x5c2   :  { %3093 = vmatprep.subr.bf16.mxu1 %v3308_v43 }
 0x5c3   :  { %v1647_v58 = vadd.f32 %v1646_v55, %v1645_v49 }
 0x5c5   :  { %v1648_v1 = vrot.slane %v1647_v58, 1 }
 0x5c7   :  { %v1649_v5 = vadd.f32 %v1648_v1, %v1647_v58 }
 0x5c9   :  { %2853 = vmatmul.mubr.f32.vlgmr.msra.gmra.mrb[12].mxu0 %v1649_v5 }
 0x5ca   :  { %3071 = vmatpush3.bf16.msra.mxu0 %v4104_v39  ;;  %2934 = vmatprep.mubr.msk.f32.mxu0 %vm3306_vm0, %v3305_v0 }
 0x5cb   :  { %3072 = vmatprep.subr.bf16.mxu0 %v3308_v43 }
 0x5ce   :  { %3074 = vmatpush3.bf16.msra.mxu0 %v4122_v22 }
 0x5cf   :  { %3075 = vmatprep.subr.bf16.mxu0 %v3308_v43 }
 0x5d2   :  { %3077 = vmatpush3.bf16.msra.mxu0 %v4139_v18 }
 0x5d3   :  { %3078 = vmatprep.subr.bf16.mxu0 %v3308_v43 }
 0x5d6   :  { %3080 = vmatpush3.bf16.msra.mxu0 %v4156_v26 }
 0x5d7   :  { %3081 = vmatprep.subr.bf16.mxu0 %v3308_v43 }
 0x5da   :  { %3083 = vmatpush3.bf16.msra.mxu0 %v4173_v33 }
 0x5db   :  { %3084 = vmatprep.subr.bf16.mxu0 %v3308_v43 }
 0x5de   :  { %3086 = vmatpush3.bf16.msra.mxu0 %v4190_v41 }
 0x5df   :  { %3087 = vmatprep.subr.bf16.mxu0 %v3308_v43 }
 0x5e2   :  { %3089 = vmatpush3.bf16.msra.mxu0 %v4210_v53 }
 0x5e3   :  { %3090 = vmatprep.subr.bf16.mxu0 %v3308_v43 }
 0x5e6   :  { %3092 = vmatpush3.bf16.msra.mxu0 %v4223_v42 }
 0x69c   :  { %v1716_v49 = vpop.f32.mrb[12].mxu0 }
 0x69d   :  { %v1720_v55 = vmul.f32 0.001953125, %v1716_v49  ;;  %v2854_v58 = vpop.f32.mrb[13].mxu0 }
 0x69f   :  { %v1721_v60 = vadd.f32 1e-05, %v1720_v55 }
 0x6a1   :  { %3273 = vrsqrt.f32 %v1721_v60 }
 0x6ab   :  { %v3274_v1 = vpop.eup %3273 }
 0x6ac   :  { %v1723_v5 = vmul.f32 %v3274_v1, %v58_v62 }
 0x6ae   :  { %v1724_v9 = vmul.f32 %v1723_v5, %v4083_v28  ;;  %v1730_v3 = vrot.slane %v1723_v5, %v3885_v37 }
 0x6b0   :  { %v1725_v12 = vsub.f32 %v59_v8, %v1724_v9  ;;  %v1732_v16 = vmul.f32 %v1730_v3, %v4053_v46  ;;  %v1733_v10 = vmul.f32 %v1730_v3, %v4055_v52  ;;  %v1734_v11 = vmul.f32 %v1730_v3, %v4061_v61 }
 0x6b1   :  { %v1735_v14 = vmul.f32 %v1730_v3, %v4065_v63  ;;  %v1736_v15 = vmul.f32 %v1730_v3, %v4069_v6 }
 0x6b2   :  { %v1741_v17 = vrot.slane %v1725_v12, %v3885_v37 }
 0x6b4   :  { %v1743_v19 = vadd.f32 %v1741_v17, %v1732_v16  ;;  %v1744_v20 = vadd.f32 %v1741_v17, %v1733_v10  ;;  %v1745_v23 = vadd.f32 %v1741_v17, %v1734_v11  ;;  %v1746_v24 = vadd.f32 %v1741_v17, %v1735_v14 }
 0x6b5   :  { %v1747_v28 = vadd.f32 %v1741_v17, %v1736_v15 }
 0x6b6   :  { %v1748_v25 = vmax.f32 %v1743_v19, 0.0  ;;  %v1749_v29 = vmax.f32 %v1744_v20, 0.0  ;;  %v1750_v46 = vmax.f32 %v1745_v23, 0.0  ;;  %v1751_v52 = vmax.f32 %v1746_v24, 0.0 }
 0x6b7   :  { %v1752_v61 = vmax.f32 %v1747_v28, 0.0 }
 0x6b8   :  { %v1753_v27 = vmul.f32 %v1748_v25, %v3836_v2  ;;  %v1754_v37 = vmul.f32 %v1749_v29, %v3840_v4  ;;  %v1755_v2 = vmul.f32 %v1750_v46, %v3844_v7  ;;  %v1756_v4 = vmul.f32 %v1751_v52, %v3852_v13  ;;  %v4281_v13 = vld [vmem:[%s4424_s13] ss:$0 sm:$0xff] }
 0x6b9   :  { %v1757_v7 = vmul.f32 %v1752_v61, %v3860_v21  ;;  %v4286_v21 = vld [vmem:[%s4425_s14] ss:$0 sm:$0xff] }
 0x6ba   :  { %2888 = vmatmul.mubr.f32.vlgmr.msra.gmra.mrb[18].mxu1 %v1753_v27  ;;  %2935 = vmatmul.mubr.f32.vlgmr.msra.gmra.mrb[14].mxu0 %v1753_v27  ;;  %v1792_v46 = vld [vmem:[%s4426_s15] sm:$0xff] }
 0x6bb   :  { %3101 = vmatpush3.bf16.msra.mxu1 %v4104_v39  ;;  %2890 = vmatprep.mubr.msk.f32.mxu1 %vm3306_vm0, %v3305_v0 }
 0x6bc   :  { %3094 = vmatprep.subr.bf16.mxu1 %v3308_v43  ;;  %2937 = vmatprep.mubr.msk.f32.mxu0 %vm3306_vm0, %v3305_v0 }
 0x6be   :  { %2891 = vmatmul.mubr.f32.gmra.mrb[20].mxu1 %v1754_v37  ;;  %2938 = vmatmul.mubr.f32.gmra.mrb[16].mxu0 %v1754_v37 }
 0x6bf   :  { %3102 = vmatpush3.bf16.msra.mxu1 %v4122_v22  ;;  %2893 = vmatprep.mubr.msk.f32.mxu1 %vm3306_vm0, %v3305_v0 }
 0x6c0   :  { %3095 = vmatprep.subr.bf16.mxu1 %v3308_v43  ;;  %2940 = vmatprep.mubr.msk.f32.mxu0 %vm3306_vm0, %v3305_v0 }
 0x6c2   :  { %2894 = vmatmul.mubr.f32.gmra.mrb[22].mxu1 %v1755_v2  ;;  %2941 = vmatmul.mubr.f32.gmra.mrb[18].mxu0 %v1755_v2 }
 0x6c3   :  { %3103 = vmatpush3.bf16.msra.mxu1 %v4139_v18  ;;  %2896 = vmatprep.mubr.msk.f32.mxu1 %vm3306_vm0, %v3305_v0 }
 0x6c4   :  { %3096 = vmatprep.subr.bf16.mxu1 %v3308_v43 }
 0x6c6   :  { %2897 = vmatmul.mubr.f32.gmra.mrb[24].mxu1 %v1756_v4 }
 0x6c7   :  { %3104 = vmatpush3.bf16.msra.mxu1 %v4156_v26  ;;  %2899 = vmatprep.mubr.msk.f32.mxu1 %vm3306_vm0, %v3305_v0 }
 0x6c8   :  { %3097 = vmatprep.subr.bf16.mxu1 %v3308_v43 }
 0x6ca   :  { %2900 = vmatmul.mubr.f32.gmra.mrb[26].mxu1 %v1757_v7 }
 0x6cb   :  { %3105 = vmatpush3.bf16.msra.mxu1 %v4173_v33  ;;  %2943 = vmatprep.mubr.msk.f32.mxu1 %vm3306_vm0, %v3305_v0 }
 0x6cc   :  { %3098 = vmatprep.subr.bf16.mxu1 %v3308_v43 }
 0x6cf   :  { %3106 = vmatpush3.bf16.msra.mxu1 %v4190_v41 }
 0x6d0   :  { %3099 = vmatprep.subr.bf16.mxu1 %v3308_v43 }
 0x6d3   :  { %3107 = vmatpush3.bf16.msra.mxu1 %v4210_v53 }
 0x6d4   :  { %3100 = vmatprep.subr.bf16.mxu1 %v3308_v43 }
 0x6d7   :  { %3108 = vmatpush3.bf16.msra.mxu1 %v4223_v42 }
 0x6da   :  { %2944 = vmatmul.mubr.f32.vlgmr.msra.gmra.mrb[28].mxu1 %v1756_v4 }
 0x6db   :  { %2946 = vmatprep.mubr.msk.f32.mxu1 %vm3306_vm0, %v3305_v0 }
 0x6de   :  { %2947 = vmatmul.mubr.f32.gmra.mrb[30].mxu1 %v1757_v7 }
 0x78d   :  { %v1869_v63 = vpop.f32.mrb[18].mxu1  ;;  %v1965_v6 = vpop.f32.mrb[14].mxu0 }
 0x78e   :  { %v4289_v43 = vadd.f32 %v4281_v13, %v1869_v63  ;;  %v4292_v39 = vadd.f32 %v4286_v21, %v1965_v6  ;;  %v2889_v0 = vpop.f32.mrb[19].mxu1  ;;  %v2936_v22 = vpop.f32.mrb[15].mxu0 }
 0x790   :  { %v1989_v18 = vmax.f32 %v4289_v43, %v4292_v39 }
 0x791   :  { %v1874_v26 = vpop.f32.mrb[20].mxu1  ;;  %v1970_v30 = vpop.f32.mrb[16].mxu0 }
 0x792   :  { %v1994_v31 = vsub.f32 %v4289_v43, %v1989_v18  ;;  %v2009_v32 = vsub.f32 %v4292_v39, %v1989_v18  ;;  %v4299_v33 = vadd.f32 %v4281_v13, %v1874_v26  ;;  %v4302_v34 = vadd.f32 %v4286_v21, %v1970_v30  ;;  %v2892_v35 = vpop.f32.mrb[21].mxu1  ;;  %v2939_v36 = vpop.f32.mrb[17].mxu0 }
 0x794   :  { %v1999_v38 = vmul.f32 1.442695, %v1994_v31  ;;  %v2014_v40 = vmul.f32 1.442695, %v2009_v32  ;;  %v4306_v41 = vmax.f32 %v4299_v33, %v4302_v34 }
 0x795   :  { %v1879_v44 = vpop.f32.mrb[22].mxu1  ;;  %v1975_v45 = vpop.f32.mrb[18].mxu0 }
 0x796   :  { %3275 = vpow2.f32 %v1999_v38  ;;  %v1995_v47 = vsub.f32 %v4299_v33, %v4306_v41  ;;  %v2010_v48 = vsub.f32 %v4302_v34, %v4306_v41  ;;  %v4313_v50 = vadd.f32 %v4281_v13, %v1879_v44  ;;  %v2895_v51 = vpop.f32.mrb[23].mxu1  ;;  %v2942_v53 = vpop.f32.mrb[19].mxu0 }
 0x797   :  { %3277 = vpow2.f32 %v2014_v40  ;;  %v4316_v54 = vadd.f32 %v4286_v21, %v1975_v45 }
 0x798   :  { %v2001_v56 = vmul.f32 1.442695, %v1995_v47  ;;  %v2016_v57 = vmul.f32 1.442695, %v2010_v48 }
 0x799   :  { %v4320_v59 = vmax.f32 %v4313_v50, %v4316_v54  ;;  %v1884_v42 = vpop.f32.mrb[24].mxu1 }
 0x79a   :  { %3279 = vpow2.f32 %v2001_v56  ;;  %v2898_v49 = vpop.f32.mrb[25].mxu1  ;;  %v4327_v20 = vadd.f32 %v4281_v13, %v1884_v42 }
 0x79b   :  { %3281 = vpow2.f32 %v2016_v57  ;;  %v1996_v55 = vsub.f32 %v4313_v50, %v4320_v59  ;;  %v2011_v58 = vsub.f32 %v4316_v54, %v4320_v59 }
 0x79d   :  { %v2003_v60 = vmul.f32 1.442695, %v1996_v55  ;;  %v2018_v62 = vmul.f32 1.442695, %v2011_v58  ;;  %v1889_v1 = vpop.f32.mrb[26].mxu1 }
 0x79e   :  { %v2901_v5 = vpop.f32.mrb[27].mxu1  ;;  %v4338_v2 = vadd.f32 %v4281_v13, %v1889_v1 }
 0x79f   :  { %3283 = vpow2.f32 %v2003_v60 }
 0x7a0   :  { %v3276_v8 = vpop.eup %3275  ;;  %3285 = vpow2.f32 %v2018_v62  ;;  %v1795_v62 = vld [vmem:[%s4426_s15 + $0x18] sm:$0xff] }
 0x7a1   :  { %v3278_v9 = vpop.eup %3277 }
 0x7a2   :  { %v2024_v3 = vadd.f32 %v3278_v9, %v3276_v8 }
 0x7a4   :  { %v3280_v12 = vpop.eup %3279  ;;  %3287 = vlog2.f32 %v2024_v3 }
 0x7a5   :  { %v3282_v16 = vpop.eup %3281 }
 0x7a6   :  { %v2025_v10 = vadd.f32 %v3282_v16, %v3280_v12  ;;  %v1796_v16 = vld [vmem:[%s4426_s15 + $0x20] sm:$0x3] }
 0x7a8   :  { %3289 = vlog2.f32 %v2025_v10 }
 0x7a9   :  { %v3284_v11 = vpop.eup %3283 }
 0x7aa   :  { %v3286_v14 = vpop.eup %3285 }
 0x7ab   :  { %v2026_v15 = vadd.f32 %v3286_v14, %v3284_v11 }
 0x7ad   :  { %3291 = vlog2.f32 %v2026_v15  ;;  %v1980_v17 = vpop.f32.mrb[28].mxu1 }
 0x7ae   :  { %v3288_v19 = vpop.eup %3287  ;;  %v4330_v23 = vadd.f32 %v4286_v21, %v1980_v17  ;;  %v2945_v24 = vpop.f32.mrb[29].mxu1 }
 0x7af   :  { %v2030_v28 = vmul.f32 0.6931472, %v3288_v19 }
 0x7b0   :  { %v1992_v25 = vmax.f32 %v4327_v20, %v4330_v23 }
 0x7b1   :  { %v2039_v27 = vadd.f32 %v2030_v28, %v1989_v18  ;;  %v1985_v29 = vpop.f32.mrb[30].mxu1 }
 0x7b2   :  { %v3290_v37 = vpop.eup %3289  ;;  %v1997_v52 = vsub.f32 %v4327_v20, %v1992_v25  ;;  %v2012_v4 = vsub.f32 %v4330_v23, %v1992_v25  ;;  %v4343_v61 = vadd.f32 %v4286_v21, %v1985_v29  ;;  %v2948_v7 = vpop.f32.mrb[31].mxu1  ;;  %v1793_v21 = vld [vmem:[%s4426_s15 + $0x8] sm:$0xff] }
 0x7b3   :  { %v2044_v63 = vsub.f32 %v4289_v43, %v2039_v27  ;;  %v2061_v6 = vsub.f32 %v4292_v39, %v2039_v27  ;;  %v2032_v0 = vmul.f32 0.6931472, %v3290_v37 }
 0x7b4   :  { %v2005_v22 = vmul.f32 1.442695, %v1997_v52  ;;  %v2020_v18 = vmul.f32 1.442695, %v2012_v4  ;;  %v1993_v13 = vmax.f32 %v4338_v2, %v4343_v61 }
 0x7b5   :  { %v2049_v26 = vadd.f32 %v2044_v63, %v1792_v46  ;;  %v2066_v30 = vadd.f32 %v2061_v6, %v1792_v46  ;;  %v2040_v31 = vadd.f32 %v2032_v0, %v4306_v41 }
 0x7b6   :  { %3293 = vpow2.f32 %v2005_v22  ;;  %v1998_v43 = vsub.f32 %v4338_v2, %v1993_v13  ;;  %v2013_v39 = vsub.f32 %v4343_v61, %v1993_v13 }
 0x7b7   :  { %v3292_v32 = vpop.eup %3291  ;;  %2055 = vst.msk [vmem:[%s4427_s16] sm:$0xff] %vm2054_vm2, %v2049_v26  ;;  %2071 = vst.msk [vmem:[%s4428_s17] sm:$0xff] %vm2054_vm2, %v2066_v30  ;;  %v2045_v35 = vsub.f32 %v4299_v33, %v2040_v31  ;;  %v2062_v36 = vsub.f32 %v4302_v34, %v2040_v31  ;;  %3295 = vpow2.f32 %v2020_v18  ;;  %v1794_v33 = vld [vmem:[%s4426_s15 + $0x10] sm:$0xff] }
 0x7b8   :  { %v2034_v38 = vmul.f32 0.6931472, %v3292_v32  ;;  %v2007_v40 = vmul.f32 1.442695, %v1998_v43  ;;  %v2022_v41 = vmul.f32 1.442695, %v2013_v39 }
 0x7b9   :  { %v2050_v44 = vadd.f32 %v2045_v35, %v1793_v21  ;;  %v2067_v45 = vadd.f32 %v2062_v36, %v1793_v21 }
 0x7ba   :  { %v2041_v47 = vadd.f32 %v2034_v38, %v4320_v59  ;;  %3297 = vpow2.f32 %v2007_v40 }
 0x7bb   :  { %2056 = vst.msk [vmem:[%s4427_s16 + $0x8] sm:$0xff] %vm2054_vm2, %v2050_v44  ;;  %2072 = vst.msk [vmem:[%s4428_s17 + $0x8] sm:$0xff] %vm2054_vm2, %v2067_v45  ;;  %3299 = vpow2.f32 %v2022_v41 }
 0x7bc   :  { %v2046_v34 = vsub.f32 %v4313_v50, %v2041_v47  ;;  %v2063_v48 = vsub.f32 %v4316_v54, %v2041_v47 }
 0x7be   :  { %v2051_v51 = vadd.f32 %v2046_v34, %v1794_v33  ;;  %v2068_v53 = vadd.f32 %v2063_v48, %v1794_v33 }
 0x7c0   :  { %v3294_v56 = vpop.eup %3293  ;;  %2057 = vst.msk [vmem:[%s4427_s16 + $0x10] sm:$0xff] %vm2054_vm2, %v2051_v51  ;;  %2073 = vst.msk [vmem:[%s4428_s17 + $0x10] sm:$0xff] %vm2054_vm2, %v2068_v53 }
 0x7c1   :  { %v3296_v57 = vpop.eup %3295 }
 0x7c2   :  { %v2027_v59 = vadd.f32 %v3296_v57, %v3294_v56 }
 0x7c4   :  { %v3298_v42 = vpop.eup %3297  ;;  %3301 = vlog2.f32 %v2027_v59 }
 0x7c5   :  { %v3300_v50 = vpop.eup %3299 }
 0x7c6   :  { %v2028_v49 = vadd.f32 %v3300_v50, %v3298_v42 }
 0x7c8   :  { %3303 = vlog2.f32 %v2028_v49 }
 0x7ce   :  { %v3302_v54 = vpop.eup %3301 }
 0x7cf   :  { %v2036_v55 = vmul.f32 0.6931472, %v3302_v54 }
 0x7d1   :  { %v2042_v58 = vadd.f32 %v2036_v55, %v1992_v25 }
 0x7d2   :  { %v3304_v60 = vpop.eup %3303 }
 0x7d3   :  { %v2047_v1 = vsub.f32 %v4327_v20, %v2042_v58  ;;  %v2064_v5 = vsub.f32 %v4330_v23, %v2042_v58  ;;  %v2038_v8 = vmul.f32 0.6931472, %v3304_v60 }
 0x7d5   :  { %v2052_v9 = vadd.f32 %v2047_v1, %v1795_v62  ;;  %v2069_v3 = vadd.f32 %v2064_v5, %v1795_v62  ;;  %v2043_v12 = vadd.f32 %v2038_v8, %v1993_v13 }
 0x7d7   :  { %2058 = vst.msk [vmem:[%s4427_s16 + $0x18] sm:$0xff] %vm2054_vm2, %v2052_v9  ;;  %2074 = vst.msk [vmem:[%s4428_s17 + $0x18] sm:$0xff] %vm2054_vm2, %v2069_v3  ;;  %v2048_v10 = vsub.f32 %v4338_v2, %v2043_v12  ;;  %v2065_v11 = vsub.f32 %v4343_v61, %v2043_v12 }
 0x7d9   :  { %v2053_v14 = vadd.f32 %v2048_v10, %v1796_v16  ;;  %v2070_v15 = vadd.f32 %v2065_v11, %v1796_v16 }
 0x7db   :  { %2060 = vst.msk [vmem:[%s4427_s16 + $0x20] sm:$0x3] %vm2059_vm3, %v2053_v14  ;;  %2075 = vst.msk [vmem:[%s4428_s17 + $0x20] sm:$0x3] %vm2059_vm3, %v2070_v15 }

</bundles_post_ra>
